<compile_context>
chip_gen: v5e
topology: v5e:2x2
jax: 0.10.0
libtpu: 0.0.40
codegen_flags: <defaults>
</compile_context>

<pallas_src>
import functools

import jax
import jax.numpy as jnp
from jax.experimental import pallas as pl
from jax.experimental.pallas import tpu as pltpu


def _round_up(x, m):
    return ((x + m - 1) // m) * m


# ---------------------------------------------------------------------------
# Kernel 1: conv1/conv2/conv3 (+ folded BN shift + ReLU) and global max pool,
# tiled over points with a running-max accumulator in the output block.
# ---------------------------------------------------------------------------
def conv_pool_kernel(x_ref, w1_ref, t1_ref, w2_ref, t2_ref, w3_ref, t3_ref,
                     feat_ref, *, tile_n, n_valid):
    n = pl.program_id(1)

    @pl.when(n == 0)
    def _init():
        feat_ref[...] = jnp.full_like(feat_ref, -jnp.inf)

    x = x_ref[0]                                                    # (TN, k)

    # conv1 (1x1) + bn1 shift + relu  -> (TN, 64)
    h = jnp.dot(x, w1_ref[...], preferred_element_type=jnp.float32)
    h = jnp.maximum(h + t1_ref[...], 0.0).astype(w2_ref.dtype)

    # conv2 (1x1) + bn2 shift + relu  -> (TN, 128)
    h = jnp.dot(h, w2_ref[...], preferred_element_type=jnp.float32)
    h = jnp.maximum(h + t2_ref[...], 0.0).astype(w3_ref.dtype)

    # conv3 (1x1) + bn3 shift + relu  -> (TN, 1024), stays f32 for the max.
    h = jnp.dot(h, w3_ref[...], preferred_element_type=jnp.float32)
    h = jnp.maximum(h + t3_ref[...], 0.0)

    def _accumulate(hh):
        tile_max = jnp.max(hh, axis=0)                              # (1024,)
        feat_ref[...] = jnp.maximum(feat_ref[...], tile_max[None, None, :])

    if n_valid % tile_n != 0:
        # Only the final points tile contains padded rows: gate the masking
        # (a full (TN, 1024) where) behind pl.when so every other tile runs
        # the cheap unmasked reduce-max.
        is_last = n == pl.num_programs(1) - 1

        @pl.when(is_last)
        def _masked():
            row = jax.lax.broadcasted_iota(jnp.int32, (tile_n, 1), 0)
            valid = (n * tile_n + row) < n_valid
            _accumulate(jnp.where(valid, h, -jnp.inf))

        @pl.when(jnp.logical_not(is_last))
        def _plain():
            _accumulate(h)
    else:
        _accumulate(h)


# ---------------------------------------------------------------------------
# Kernel 2: pooled-feature FC head, batched over B (single invocation).
# fc3 bias + identity are pre-folded into t6.  Output lanes pre-padded to a
# multiple of 128 by the wrapper so stores are lane-dense.
# ---------------------------------------------------------------------------
def fc_head_kernel(feat_ref, wf1_ref, t4_ref, wf2_ref, t5_ref, wf3_ref, t6_ref,
                   o_ref):
    f = feat_ref[...].astype(wf1_ref.dtype)                         # (B, 1024)
    f = jnp.dot(f, wf1_ref[...], preferred_element_type=jnp.float32)
    f = jnp.maximum(f + t4_ref[...], 0.0).astype(wf2_ref.dtype)
    f = jnp.dot(f, wf2_ref[...], preferred_element_type=jnp.float32)
    f = jnp.maximum(f + t5_ref[...], 0.0).astype(wf3_ref.dtype)
    out = jnp.dot(f, wf3_ref[...], preferred_element_type=jnp.float32)
    o_ref[...] = (out + t6_ref[...]).astype(o_ref.dtype)


def stnkd_forward(x_bnk, params, *, tile_n=1024, compute_dtype=jnp.bfloat16):
    """x_bnk: (B, N, k) float32.  Returns (B, k, k) float32."""
    B, N, k = x_bnk.shape
    assert N >= 1, "global max pool over zero points would be -inf"
    (w1, t1, w2, t2, w3, t3, wf1, t4, wf2, t5, wf3, t6) = params

    # Point-axis tiling (cap VMEM; feed the MXU M dimension).
    TN = min(tile_n, _round_up(N, 8))
    N_pad = _round_up(N, TN)
    if N_pad != N:
        x_bnk = jnp.pad(x_bnk, ((0, 0), (0, N_pad - N), (0, 0)))
    n_tiles = N_pad // TN

    # Matmul operands in compute_dtype (bf16 default: bf16-native MXU on all
    # generations, half the weight/activation DMA bytes); shifts stay f32.
    x = x_bnk.astype(compute_dtype)
    w1c, w2c, w3c = (w.astype(compute_dtype) for w in (w1, w2, w3))
    wf1c, wf2c, wf3c = (w.astype(compute_dtype) for w in (wf1, wf2, wf3))

    full = lambda arr: pl.BlockSpec(arr.shape, lambda b, n: (0,) * arr.ndim)

    isz = jnp.dtype(compute_dtype).itemsize
    flops1 = 2 * B * N_pad * (k * 64 + 64 * 128 + 128 * 1024)
    bytes1 = (x.size * isz
              + (w1c.size + w2c.size + w3c.size) * isz
              + (t1.size + t2.size + t3.size) * 4
              + B * 1024 * 4)

    feat = pl.pallas_call(
        functools.partial(conv_pool_kernel, tile_n=TN, n_valid=N),
        out_shape=jax.ShapeDtypeStruct((B, 1, 1024), jnp.float32),
        grid_spec=pltpu.PrefetchScalarGridSpec(
            num_scalar_prefetch=0,
            grid=(B, n_tiles),
            in_specs=[pl.BlockSpec((1, TN, k), lambda b, n: (b, n, 0)),
                      full(w1c), full(t1),
                      full(w2c), full(t2),
                      full(w3c), full(t3)],
            out_specs=pl.BlockSpec((1, 1, 1024), lambda b, n: (b, 0, 0)),
        ),
        compiler_params=pltpu.CompilerParams(
            dimension_semantics=("parallel", "arbitrary"),
            vmem_limit_bytes=32 * 1024 * 1024),
        cost_estimate=pl.CostEstimate(
            flops=flops1, transcendentals=0, bytes_accessed=bytes1),
    )(x, w1c, t1, w2c, t2, w3c, t3)

    feat = feat.reshape(B, 1024)

    # FC head: one invocation, M=B matmuls.  Pad the output lane dim to a
    # multiple of 128 so stores are lane-dense even for small k (k=3, k=9);
    # the slice back to k*k in the wrapper is free in XLA.
    KK = k * k
    KK_pad = _round_up(KK, 128)
    wf3p, t6p = wf3c, t6
    if KK_pad != KK:
        wf3p = jnp.pad(wf3c, ((0, 0), (0, KK_pad - KK)))
        t6p = jnp.pad(t6, ((0, 0), (0, KK_pad - KK)))

    flops2 = 2 * B * (1024 * 512 + 512 * 256 + 256 * KK_pad)
    bytes2 = (feat.size * 4
              + (wf1c.size + wf2c.size + wf3p.size) * isz
              + (t4.size + t5.size + t6p.size) * 4
              + B * KK_pad * 4)

    vmem_spec = lambda: pl.BlockSpec(memory_space=pltpu.MemorySpace.VMEM)

    out_flat = pl.pallas_call(
        fc_head_kernel,
        out_shape=jax.ShapeDtypeStruct((B, KK_pad), jnp.float32),
        in_specs=[vmem_spec() for _ in range(7)],
        out_specs=vmem_spec(),
        compiler_params=pltpu.CompilerParams(
            vmem_limit_bytes=32 * 1024 * 1024),
        cost_estimate=pl.CostEstimate(
            flops=flops2, transcendentals=0, bytes_accessed=bytes2),
    )(feat, wf1c, t4, wf2c, t5, wf3p, t6p)

    return out_flat[:, :KK].reshape(B, k, k)


# ---------------------------------------------------------------------------
# Parameter construction: fold conv/fc bias + inference BatchNorm into
# (scaled weight, shift) pairs; fold the identity into the fc3 shift.
# ---------------------------------------------------------------------------
def _fold_bn_into_weight(w, bias, gamma, beta, mean, var, eps=1e-5):
    # y = gamma * ((x @ w + bias) - mean) / sqrt(var + eps) + beta
    #   = x @ (w * scale) + (scale * (bias - mean) + beta)
    scale = gamma / jnp.sqrt(var + eps)
    return w * scale[None, :], (scale * (bias - mean) + beta)[None, :]


def make_params(key, k):
    """Deterministic synthetic parameters matching STNkd(k) shapes (folded)."""
    ks = jax.random.split(key, 12)

    def w(kk, shape, scale=0.05):
        return jax.random.normal(kk, shape, jnp.float32) * scale

    def bn(kk, c):
        g = 1.0 + 0.1 * jax.random.normal(kk, (c,), jnp.float32)
        b = 0.05 * jnp.arange(c, dtype=jnp.float32) / c
        m = 0.01 * jnp.arange(c, dtype=jnp.float32) / c
        v = 1.0 + 0.1 * jnp.abs(jax.random.normal(kk, (c,), jnp.float32))
        return g, b, m, v

    # Weights stored as (in, out) so x(N,in) @ W -> (N,out).
    w1 = w(ks[0], (k, 64));        b1 = w(ks[1], (64,))
    w2 = w(ks[2], (64, 128));      b2 = w(ks[3], (128,))
    w3 = w(ks[4], (128, 1024));    b3 = w(ks[5], (1024,))
    wf1 = w(ks[6], (1024, 512));   bf1 = w(ks[7], (512,))
    wf2 = w(ks[8], (512, 256));    bf2 = w(ks[9], (256,))
    wf3 = w(ks[10], (256, k * k)); bf3 = w(ks[11], (k * k,))

    w1f, t1 = _fold_bn_into_weight(w1, b1, *bn(ks[1], 64))
    w2f, t2 = _fold_bn_into_weight(w2, b2, *bn(ks[3], 128))
    w3f, t3 = _fold_bn_into_weight(w3, b3, *bn(ks[5], 1024))
    wf1f, t4 = _fold_bn_into_weight(wf1, bf1, *bn(ks[7], 512))
    wf2f, t5 = _fold_bn_into_weight(wf2, bf2, *bn(ks[9], 256))

    t6 = (bf3 + jnp.eye(k, dtype=jnp.float32).reshape(-1))[None, :]

    return (w1f, t1, w2f, t2, w3f, t3, wf1f, t4, wf2f, t5, wf3, t6)


def stnkd_reference(x_bnk, params):
    """Pure-JAX reference (same folded math) for correctness checks."""
    (w1, t1, w2, t2, w3, t3, wf1, t4, wf2, t5, wf3, t6) = params
    h = jnp.maximum(x_bnk @ w1 + t1, 0.0)
    h = jnp.maximum(h @ w2 + t2, 0.0)
    h = jnp.maximum(h @ w3 + t3, 0.0)
    feat = jnp.max(h, axis=1)                       # (B, 1024)
    f = jnp.maximum(feat @ wf1 + t4, 0.0)
    f = jnp.maximum(f @ wf2 + t5, 0.0)
    out = f @ wf3 + t6
    k = int(round(out.shape[-1] ** 0.5))
    return out.reshape(-1, k, k)


if __name__ == "__main__":
    # Small demo shapes; N deliberately not a multiple of 8/128 so the padded
    # last-tile masking path is exercised.
    B, K, N = 2, 16, 500
    key = jax.random.PRNGKey(0)
    kx, kp, kx2, kp2 = jax.random.split(key, 4)

    # PyTorch layout (B, k, N) -> kernel layout (B, N, k).
    x_torch_layout = jax.random.normal(kx, (B, K, N), jnp.float32)
    x = jnp.transpose(x_torch_layout, (0, 2, 1))

    params = make_params(kp, K)
    ref = stnkd_reference(x, params)

    # Default path: bf16 operands, f32 accumulation/epilogue.
    out = jax.block_until_ready(stnkd_forward(x, params))
    assert out.shape == (B, K, K)
    assert jnp.allclose(out, ref, atol=1e-1, rtol=1e-1)

    # f32 path: exact check.
    out_f32 = jax.block_until_ready(
        stnkd_forward(x, params, compute_dtype=jnp.float32))
    assert jnp.allclose(out_f32, ref, atol=1e-4, rtol=1e-4)

    # Small tile -> multiple point tiles: exercises the running-max
    # accumulator and the pl.when-gated last-tile mask.
    out_tiled = jax.block_until_ready(
        stnkd_forward(x, params, tile_n=128, compute_dtype=jnp.float32))
    assert jnp.allclose(out_tiled, ref, atol=1e-4, rtol=1e-4)

    # Small-k case (k=3): exercises the lane-padded FC-head output path.
    B2, K2, N2 = 2, 3, 64
    x2 = jnp.transpose(jax.random.normal(kx2, (B2, K2, N2), jnp.float32),
                       (0, 2, 1))
    params2 = make_params(kp2, K2)
    ref2 = stnkd_reference(x2, params2)
    out2 = jax.block_until_ready(
        stnkd_forward(x2, params2, compute_dtype=jnp.float32))
    assert out2.shape == (B2, K2, K2)
    assert jnp.allclose(out2, ref2, atol=1e-4, rtol=1e-4)

    print("KERNEL_OK")
</pallas_src>

<mosaic_0001>
module attributes {stable_mosaic.version = 11 : i64} {
  func.func @conv_pool_kernel(%arg0: i32, %arg1: i32, %arg2: memref<1x504x16xbf16, #tpu.memory_space<vmem>>, %arg3: memref<16x64xbf16, #tpu.memory_space<vmem>>, %arg4: memref<1x64xf32, #tpu.memory_space<vmem>>, %arg5: memref<64x128xbf16, #tpu.memory_space<vmem>>, %arg6: memref<1x128xf32, #tpu.memory_space<vmem>>, %arg7: memref<128x1024xbf16, #tpu.memory_space<vmem>>, %arg8: memref<1x1024xf32, #tpu.memory_space<vmem>>, %arg9: memref<1x1x1024xf32, #tpu.memory_space<vmem>>) attributes {dimension_semantics = [#tpu.dimension_semantics<parallel>, #tpu.dimension_semantics<arbitrary>], iteration_bounds = array<i64: 2, 1>, scalar_prefetch = 0 : i64, scratch_operands = 0 : i64, tpu.core_type = #tpu.core_type<tc>, window_params = [{transform_indices = @transform_0, window_bounds = array<i64: 1, 504, 16>}, {pipeline_mode = #tpu.pipeline_mode<synchronous>, transform_indices = @transform_1, window_bounds = array<i64: 16, 64>}, {pipeline_mode = #tpu.pipeline_mode<synchronous>, transform_indices = @transform_2, window_bounds = array<i64: 1, 64>}, {pipeline_mode = #tpu.pipeline_mode<synchronous>, transform_indices = @transform_3, window_bounds = array<i64: 64, 128>}, {pipeline_mode = #tpu.pipeline_mode<synchronous>, transform_indices = @transform_4, window_bounds = array<i64: 1, 128>}, {pipeline_mode = #tpu.pipeline_mode<synchronous>, transform_indices = @transform_5, window_bounds = array<i64: 128, 1024>}, {pipeline_mode = #tpu.pipeline_mode<synchronous>, transform_indices = @transform_6, window_bounds = array<i64: 1, 1024>}, {transform_indices = @transform_7, window_bounds = array<i64: 1, 1, 1024>}]} {
    %c0_i32 = arith.constant 0 : i32
    %0 = arith.cmpi eq, %arg1, %c0_i32 : i32
    %1 = arith.extui %0 : i1 to i32
    %c0_i32_0 = arith.constant 0 : i32
    %2 = arith.cmpi ne, %1, %c0_i32_0 : i32
    scf.if %2 {
      %cst_23 = arith.constant 0xFF800000 : f32
      %34 = vector.broadcast %cst_23 : f32 to vector<1x1x1024xf32>
      %c0_24 = arith.constant 0 : index
      %c0_25 = arith.constant 0 : index
      %c0_26 = arith.constant 0 : index
      %35 = vector.load %arg9[%c0_24, %c0_25, %c0_26] : memref<1x1x1024xf32, #tpu.memory_space<vmem>>, vector<1x1x1024xf32>
      tpu.vector_store %arg9[%c0_24, %c0_25, %c0_26], %34 {strides = array<i32>} : memref<1x1x1024xf32, #tpu.memory_space<vmem>>, vector<1x1x1024xf32>,
    } else {
    }
    %c0 = arith.constant 0 : index
    %c0_1 = arith.constant 0 : index
    %c0_2 = arith.constant 0 : index
    %3 = vector.load %arg2[%c0, %c0_1, %c0_2] : memref<1x504x16xbf16, #tpu.memory_space<vmem>>, vector<1x504x16xbf16>
    %4 = vector.shape_cast %3 : vector<1x504x16xbf16> to vector<504x16xbf16>
    %c0_3 = arith.constant 0 : index
    %c0_4 = arith.constant 0 : index
    %5 = vector.load %arg3[%c0_3, %c0_4] : memref<16x64xbf16, #tpu.memory_space<vmem>>, vector<16x64xbf16>
    %cst = arith.constant dense<0.000000e+00> : vector<504x64xf32>
    %6 = tpu.matmul %4, %5, %cst {dimension_numbers = #tpu.dot_dimension_numbers<[1], [0], [0], [1], [0, 0, 1, 1], [], []>} : vector<504x16xbf16>, vector<16x64xbf16>, vector<504x64xf32> -> vector<504x64xf32>
    %c0_5 = arith.constant 0 : index
    %c0_6 = arith.constant 0 : index
    %7 = vector.load %arg4[%c0_5, %c0_6] : memref<1x64xf32, #tpu.memory_space<vmem>>, vector<1x64xf32>
    %8 = vector.broadcast %7 : vector<1x64xf32> to vector<504x64xf32>
    %9 = arith.addf %6, %8 : vector<504x64xf32>
    %cst_7 = arith.constant 0.000000e+00 : f32
    %10 = vector.broadcast %cst_7 : f32 to vector<504x64xf32>
    %11 = arith.maximumf %9, %10 : vector<504x64xf32>
    %12 = arith.truncf %11 : vector<504x64xf32> to vector<504x64xbf16>
    %c0_8 = arith.constant 0 : index
    %c0_9 = arith.constant 0 : index
    %13 = vector.load %arg5[%c0_8, %c0_9] : memref<64x128xbf16, #tpu.memory_space<vmem>>, vector<64x128xbf16>
    %cst_10 = arith.constant dense<0.000000e+00> : vector<504x128xf32>
    %14 = tpu.matmul %12, %13, %cst_10 {dimension_numbers = #tpu.dot_dimension_numbers<[1], [0], [0], [1], [0, 0, 1, 1], [], []>} : vector<504x64xbf16>, vector<64x128xbf16>, vector<504x128xf32> -> vector<504x128xf32>
    %c0_11 = arith.constant 0 : index
    %c0_12 = arith.constant 0 : index
    %15 = vector.load %arg6[%c0_11, %c0_12] : memref<1x128xf32, #tpu.memory_space<vmem>>, vector<1x128xf32>
    %16 = vector.broadcast %15 : vector<1x128xf32> to vector<504x128xf32>
    %17 = arith.addf %14, %16 : vector<504x128xf32>
    %cst_13 = arith.constant 0.000000e+00 : f32
    %18 = vector.broadcast %cst_13 : f32 to vector<504x128xf32>
    %19 = arith.maximumf %17, %18 : vector<504x128xf32>
    %20 = arith.truncf %19 : vector<504x128xf32> to vector<504x128xbf16>
    %c0_14 = arith.constant 0 : index
    %c0_15 = arith.constant 0 : index
    %21 = vector.load %arg7[%c0_14, %c0_15] : memref<128x1024xbf16, #tpu.memory_space<vmem>>, vector<128x1024xbf16>
    %cst_16 = arith.constant dense<0.000000e+00> : vector<504x1024xf32>
    %22 = tpu.matmul %20, %21, %cst_16 {dimension_numbers = #tpu.dot_dimension_numbers<[1], [0], [0], [1], [0, 0, 1, 1], [], []>} : vector<504x128xbf16>, vector<128x1024xbf16>, vector<504x1024xf32> -> vector<504x1024xf32>
    %c0_17 = arith.constant 0 : index
    %c0_18 = arith.constant 0 : index
    %23 = vector.load %arg8[%c0_17, %c0_18] : memref<1x1024xf32, #tpu.memory_space<vmem>>, vector<1x1024xf32>
    %24 = vector.broadcast %23 : vector<1x1024xf32> to vector<504x1024xf32>
    %25 = arith.addf %22, %24 : vector<504x1024xf32>
    %cst_19 = arith.constant 0.000000e+00 : f32
    %26 = vector.broadcast %cst_19 : f32 to vector<504x1024xf32>
    %27 = arith.maximumf %25, %26 : vector<504x1024xf32>
    %c0_i32_20 = arith.constant 0 : i32
    %28 = arith.cmpi eq, %arg1, %c0_i32_20 : i32
    %29 = arith.extui %28 : i1 to i32
    %c0_i32_21 = arith.constant 0 : i32
    %30 = arith.cmpi ne, %29, %c0_i32_21 : i32
    scf.if %30 {
      %34 = tpu.iota {dimensions = array<i32: 0>} : vector<504x1xi32>
      %c504_i32 = arith.constant 504 : i32
      %35 = arith.muli %arg1, %c504_i32 : i32
      %36 = vector.broadcast %35 : i32 to vector<504x1xi32>
      %37 = arith.addi %36, %34 : vector<504x1xi32>
      %c500_i32 = arith.constant 500 : i32
      %38 = vector.broadcast %c500_i32 : i32 to vector<504x1xi32>
      %39 = arith.cmpi slt, %37, %38 : vector<504x1xi32>
      %cst_23 = arith.constant 0xFF800000 : f32
      %40 = vector.shape_cast %39 : vector<504x1xi1> to vector<504x1xi1>
      %41 = vector.broadcast %40 : vector<504x1xi1> to vector<504x1024xi1>
      %42 = vector.broadcast %cst_23 : f32 to vector<504x1024xf32>
      %43 = arith.select %41, %27, %42 : vector<504x1024xi1>, vector<504x1024xf32>
      %cst_24 = arith.constant dense<0xFF800000> : vector<1024xf32>
      %44 = vector.multi_reduction <maximumf>, %43, %cst_24 [0] : vector<504x1024xf32> to vector<1024xf32>
      %c0_25 = arith.constant 0 : index
      %c0_26 = arith.constant 0 : index
      %c0_27 = arith.constant 0 : index
      %45 = vector.load %arg9[%c0_25, %c0_26, %c0_27] : memref<1x1x1024xf32, #tpu.memory_space<vmem>>, vector<1x1x1024xf32>
      %46 = vector.shape_cast %44 : vector<1024xf32> to vector<1x1x1024xf32>
      %47 = arith.maximumf %45, %46 : vector<1x1x1024xf32>
      %c0_28 = arith.constant 0 : index
      %c0_29 = arith.constant 0 : index
      %c0_30 = arith.constant 0 : index
      %48 = vector.load %arg9[%c0_28, %c0_29, %c0_30] : memref<1x1x1024xf32, #tpu.memory_space<vmem>>, vector<1x1x1024xf32>
      tpu.vector_store %arg9[%c0_28, %c0_29, %c0_30], %47 {strides = array<i32>} : memref<1x1x1024xf32, #tpu.memory_space<vmem>>, vector<1x1x1024xf32>,
    } else {
    }
    %true = arith.constant true
    %31 = arith.xori %28, %true : i1
    %32 = arith.extui %31 : i1 to i32
    %c0_i32_22 = arith.constant 0 : i32
    %33 = arith.cmpi ne, %32, %c0_i32_22 : i32
    scf.if %33 {
      %cst_23 = arith.constant dense<0xFF800000> : vector<1024xf32>
      %34 = vector.multi_reduction <maximumf>, %27, %cst_23 [0] : vector<504x1024xf32> to vector<1024xf32>
      %c0_24 = arith.constant 0 : index
      %c0_25 = arith.constant 0 : index
      %c0_26 = arith.constant 0 : index
      %35 = vector.load %arg9[%c0_24, %c0_25, %c0_26] : memref<1x1x1024xf32, #tpu.memory_space<vmem>>, vector<1x1x1024xf32>
      %36 = vector.shape_cast %34 : vector<1024xf32> to vector<1x1x1024xf32>
      %37 = arith.maximumf %35, %36 : vector<1x1x1024xf32>
      %c0_27 = arith.constant 0 : index
      %c0_28 = arith.constant 0 : index
      %c0_29 = arith.constant 0 : index
      %38 = vector.load %arg9[%c0_27, %c0_28, %c0_29] : memref<1x1x1024xf32, #tpu.memory_space<vmem>>, vector<1x1x1024xf32>
      tpu.vector_store %arg9[%c0_27, %c0_28, %c0_29], %37 {strides = array<i32>} : memref<1x1x1024xf32, #tpu.memory_space<vmem>>, vector<1x1x1024xf32>,
    } else {
    }
    return
  }
  func.func @transform_0(%arg0: i32, %arg1: i32) -> (i32, i32, i32) {
    %c0_i32 = arith.constant 0 : i32
    %c0_i32_0 = arith.constant 0 : i32
    return %arg0, %arg1, %c0_i32 : i32, i32, i32
  }
  func.func @transform_1(%arg0: i32, %arg1: i32) -> (i32, i32) {
    %c0_i32 = arith.constant 0 : i32
    %c0_i32_0 = arith.constant 0 : i32
    %c0_i32_1 = arith.constant 0 : i32
    return %c0_i32, %c0_i32_0 : i32, i32
  }
  func.func @transform_2(%arg0: i32, %arg1: i32) -> (i32, i32) {
    %c0_i32 = arith.constant 0 : i32
    %c0_i32_0 = arith.constant 0 : i32
    %c0_i32_1 = arith.constant 0 : i32
    return %c0_i32, %c0_i32_0 : i32, i32
  }
  func.func @transform_3(%arg0: i32, %arg1: i32) -> (i32, i32) {
    %c0_i32 = arith.constant 0 : i32
    %c0_i32_0 = arith.constant 0 : i32
    %c0_i32_1 = arith.constant 0 : i32
    return %c0_i32, %c0_i32_0 : i32, i32
  }
  func.func @transform_4(%arg0: i32, %arg1: i32) -> (i32, i32) {
    %c0_i32 = arith.constant 0 : i32
    %c0_i32_0 = arith.constant 0 : i32
    %c0_i32_1 = arith.constant 0 : i32
    return %c0_i32, %c0_i32_0 : i32, i32
  }
  func.func @transform_5(%arg0: i32, %arg1: i32) -> (i32, i32) {
    %c0_i32 = arith.constant 0 : i32
    %c0_i32_0 = arith.constant 0 : i32
    %c0_i32_1 = arith.constant 0 : i32
    return %c0_i32, %c0_i32_0 : i32, i32
  }
  func.func @transform_6(%arg0: i32, %arg1: i32) -> (i32, i32) {
    %c0_i32 = arith.constant 0 : i32
    %c0_i32_0 = arith.constant 0 : i32
    %c0_i32_1 = arith.constant 0 : i32
    return %c0_i32, %c0_i32_0 : i32, i32
  }
  func.func @transform_7(%arg0: i32, %arg1: i32) -> (i32, i32, i32) {
    %c0_i32 = arith.constant 0 : i32
    %c0_i32_0 = arith.constant 0 : i32
    %c0_i32_1 = arith.constant 0 : i32
    return %arg0, %c0_i32, %c0_i32_0 : i32, i32, i32
  }
}

</mosaic_0001>

<bundles_post_ra>
// kernel: tpu_custom_call.1
= control target key start
LH: loop header
LB: loop body
LE: loop exit
PB: predicated region body
PF: predicated region fallthrough
CT: control target
= control target key end

     0   :  { %12 = vsyncpa [#allocation3], 0  ;;  %s8054_s0 = inlined_call_operand.vmem [shape: bf16[2,504,16], index: 0, kind: input, shape index: {}]   ;;  %s8055_s1 = inlined_call_operand.vmem [shape: bf16[16,64], index: 1, kind: input, shape index: {}]   ;;  %s8056_s2 = inlined_call_operand.vmem [shape: f32[1,64], index: 2, kind: input, shape index: {}]   ;;  %s8057_s3 = inlined_call_operand.vmem [shape: bf16[64,128], index: 3, kind: input, shape index: {}]   ;;  %s8058_s4 = inlined_call_operand.vmem [shape: f32[1,128], index: 4, kind: input, shape index: {}]   ;;  %s8059_s5 = inlined_call_operand.vmem [shape: bf16[128,1024], index: 5, kind: input, shape index: {}]   ;;  %s8060_s6 = inlined_call_operand.vmem [shape: f32[1,1024], index: 6, kind: input, shape index: {}]   ;;  %s8061_s7 = inlined_call_operand.hbm [shape: f32[2,1,1024], index: 7, kind: output, shape index: {}]  }
   0x1   :  { %14 = vsyncpa [#allocation3 + $0x1], 0  ;;  %s6393_s24 = smov 0   ;;  %s6395_s25 = smov 0  }
   0x2   :  { %s6397_s26 = smov 0   ;;  %s6399_s27 = smov 0  }
   0x3   :  { %s6401_s28 = smov 0   ;;  %s6403_s29 = smov 0  }
   0x4 LB: > { %s5622_s30 = sadd.s32 4294967295, %s6351_s29   ;;  %s5623_s8 = sadd.s32 4294967294, %s6351_s29   ;;  %s6351_s29 = sphi %s6403_s29, %s20_s29   ;;  %s6347_s28 = sphi %s6401_s28, %s8072_s28   ;;  %s6343_s27 = sphi %s6399_s27, %s8071_s27   ;;  %s6339_s26 = sphi %s6397_s26, %s8070_s26   ;;  %s6335_s25 = sphi %s6395_s25, %s8069_s25   ;;  %s6331_s24 = sphi %s6393_s24, %s8068_s24  }
   0x5   : > { %s32_s9 = sadd.s32 1, %s6347_s28  ;;  %s193_s10 = sadd.s32 1, %s6339_s26 }
   0x6   : > { %p34_p0 = scmp.ge.s32.totalorder %s32_s9, 2  ;;  %p203_p1 = scmp.ne.s32.totalorder %s6339_s26, %s6335_s25 }
   0x7   : > { %p204_p2 = scmp.eq.s32.totalorder %s5622_s30, 1  ;;  %p209_p3 = scmp.ne.s32.totalorder %s6335_s25, %s6331_s24 }
   0x8   : > { %s8074_s9 = smov (%p34_p0, %s32_s9), 0  ;;  %p210_p5 = scmp.eq.s32.totalorder %s5623_s8, 1 }
   0x9   : > { %p6433_p4 = por %p204_p2, %p203_p1  ;;  %s190_s12 = ssub.s32 %s6347_s28, %s8074_s9 }
   0xa   : > { %p5626_p6 = scmp.ge.s32.totalorder %s6351_s29, 1  ;;  %p191_p7 = scmp.eq.s32.totalorder %s190_s12, 0 }
   0xb   : > { %p6440_p8 = por %p210_p5, %p209_p3  ;;  %p259_p9 = scmp.lt.s32.totalorder %s6351_s29, 3 }
   0xc   : > { %s6446_s14 = scalar_select %p191_p7, %s6339_s26, %s193_s10  }
   0xd   : > { %p260_p10 = pnand %p5626_p6, %p259_p9 }
   0xf   : > { %263 = sbr.rel (%p260_p10) target bundleno = 1594 (0x63a), region = 48 }
  0x14   : > { %v6128_v0 = vld [vmem:[%s8055_s1] sm:$0xff]  ;;  %p296_p11 = scmp.lt.s32.totalorder %s6343_s27, 1  ;;  %vm544_vm0 = vcmask 130048   ;;  %v6132_v13 = vld [vmem:[%s8057_s3 + $0x18] sm:$0xff]  ;;  %v6131_v16 = vld [vmem:[%s8057_s3 + $0x10] sm:$0xff]  ;;  %vm940_vm1 = vcmask 523264  }
  0x15   : > { %648 = vmatpush.bf16.msra.mxu0 %v6128_v0  ;;  %6197 = vmatpush.bf16.msra.mxu3 %v6128_v0  ;;  %v6130_v17 = vld [vmem:[%s8057_s3 + $0x8] sm:$0xff]  ;;  %v6129_v18 = vld [vmem:[%s8057_s3] sm:$0xff]  ;;  %vm4935_vm3 = vcmask 1040384   ;;  %vm4937_vm4 = vcmask 1042434   ;;  %vm4939_vm5 = vcmask 1041408   ;;  %vm4941_vm6 = vcmask 1044484  }
  0x16   : > { %s297_s17 = scalar_select %p296_p11, %s6343_s27, 1  ;;  %1041 = vmatpush.bf16.msra.mxu1 %v6132_v13  ;;  %6198 = vmatpush.bf16.msra.mxu2 %v6132_v13  ;;  %v6071_v19 = vld [vmem:[%s8059_s5 + $0x1c8] sm:$0xf]  ;;  %v6190_v24 = vld [vmem:[%s8059_s5 + $0x1cc] sm:$0xf]  ;;  %vm4943_vm7 = vcmask 1046534  }
  0x17   : > { %v6194_v20 = vld [vmem:[%s8059_s5 + $0x1e4] sm:$0xf0]  ;;  %v6073_v25 = vld [vmem:[%s8059_s5 + $0x1e8] sm:$0xf0]  ;;  %v6189_v27 = vld [vmem:[%s8059_s5 + $0x1c4] sm:$0xf] }
  0x18   : > { %s6210_s18 = smul.u32 252, %s297_s17  ;;  %v6072_v21 = vor.u32 %v6194_v20, %v6071_v19  ;;  %v6076_v26 = vor.u32 %v6190_v24, %v6073_v25  ;;  %v6065_v28 = vld [vmem:[%s8059_s5 + $0x1e0] sm:$0xf0]  ;;  %v6525_v33 = vld [vmem:[%s8056_s2] ss:$0 sm:$0xff]  ;;  %s292_s23 = sand.u32 1, %s6335_s25  }
  0x19   : > { %v6068_v29 = vor.u32 %v6189_v27, %v6065_v28  ;;  %v6063_v34 = vld [vmem:[%s8059_s5 + $0x1c0] sm:$0xf]  ;;  %v6039_v44 = vld [vmem:[%s8059_s5 + $0x188] sm:$0xf]  ;;  %v6181_v56 = vld [vmem:[%s8059_s5 + $0x184] sm:$0xf] }
  0x1a   : > { %s6456_s21 = scalar_lea.vmem %s8054_s0, %s6210_s18  ;;  %1042 = vmatpush.bf16.msra.mxu1 %v6131_v16  ;;  %6199 = vmatpush.bf16.msra.mxu2 %v6131_v16  ;;  %v6193_v35 = vld [vmem:[%s8059_s5 + $0x1dc] sm:$0xf0]  ;;  %v6186_v45 = vld [vmem:[%s8059_s5 + $0x1a4] sm:$0xf0]  ;;  %v6033_v57 = vld [vmem:[%s8059_s5 + $0x1a0] sm:$0xf0] }
  0x1b   : > { %v6097_v1 = vld [vmem:[%s6456_s21] sm:$0xff]  ;;  %v6114_v2 = vld [vmem:[%s6456_s21 + $0x88] sm:$0xff]  ;;  %v6115_v4 = vld [vmem:[%s6456_s21 + $0x90] sm:$0xff]  ;;  %2038 = vmatpush.bf16.msrb.mxu0 %v6072_v21  ;;  %1870 = vmatpush.bf16.msrb.mxu3 %v6068_v29  ;;  %v6064_v36 = vor.u32 %v6193_v35, %v6063_v34  ;;  %v6040_v46 = vor.u32 %v6186_v45, %v6039_v44  ;;  %v6036_v58 = vor.u32 %v6181_v56, %v6033_v57  ;;  %s5627_s30 = sshll.u32 %s292_s23, 3  ;;  %s6094_s8 = sshll.u32 %s6343_s27, 3  ;;  %vm4945_vm8 = vcmask 1045508  }
  0x1c   : > { %5757 = vmatmul.msk.bf16.vlgmr.msra.gmra.mxu0 %vm544_vm0, %v6097_v1  ;;  %5774 = vmatmul.msk.bf16.vlgmr.msra.gmra.mxu3 %vm544_vm0, %v6114_v2  ;;  %v6098_v3 = vld [vmem:[%s6456_s21 + $0x8] sm:$0xff]  ;;  %v6099_v5 = vld [vmem:[%s6456_s21 + $0x10] sm:$0xff]  ;;  %v6116_v6 = vld [vmem:[%s6456_s21 + $0x98] sm:$0xff]  ;;  %vm4947_vm9 = vcmask 1043456   ;;  %s294_s15 = scalar_lea.vmem [#allocation2], %s5627_s30  ;;  %s5534_s27 = scalar_lea.sflag [#allocation3], %s292_s23 }
  0x1d   : > { %v6100_v7 = vld [vmem:[%s6456_s21 + $0x18] sm:$0xff]  ;;  %v6117_v8 = vld [vmem:[%s6456_s21 + $0xa0] sm:$0xff]  ;;  %v6118_v10 = vld [vmem:[%s6456_s21 + $0xa8] sm:$0xff]  ;;  %s5546_s16 = sshll.u32 %s294_s15, 4  ;;  %s6293_s30 = scalar_lea.hbm %s8061_s7, 16  ;;  %s5547_s16 = int_to_ptr.vmem [resolvable:$true] %s5546_s16 }
  0x1e   : > { %v6101_v9 = vld [vmem:[%s6456_s21 + $0x20] sm:$0xff]  ;;  %v6102_v11 = vld [vmem:[%s6456_s21 + $0x28] sm:$0xff]  ;;  %v6119_v12 = vld [vmem:[%s6456_s21 + $0xb0] sm:$0xff]  ;;  %1043 = vmatpush.bf16.msra.mxu1 %v6130_v17  ;;  %6200 = vmatpush.bf16.msra.mxu2 %v6130_v17 }
  0x1f   : > { %v6103_v14 = vld [vmem:[%s6456_s21 + $0x30] sm:$0xff]  ;;  %v6120_v15 = vld [vmem:[%s6456_s21 + $0xb8] sm:$0xff]  ;;  %v6121_v23 = vld [vmem:[%s6456_s21 + $0xc0] sm:$0xff]  ;;  %2039 = vmatpush.bf16.msrb.mxu0 %v6040_v46  ;;  %1871 = vmatpush.bf16.msrb.mxu3 %v6036_v58 }
  0x20   : > { %v6104_v22 = vld [vmem:[%s6456_s21 + $0x38] sm:$0xff]  ;;  %v6105_v30 = vld [vmem:[%s6456_s21 + $0x40] sm:$0xff]  ;;  %v6122_v31 = vld [vmem:[%s6456_s21 + $0xc8] sm:$0xff] }
  0x21   : > { %v6106_v51 = vld [vmem:[%s6456_s21 + $0x48] sm:$0xff]  ;;  %v6123_v52 = vld [vmem:[%s6456_s21 + $0xd0] sm:$0xff]  ;;  %v5999_v58 = vld [vmem:[%s8059_s5 + $0x140] sm:$0xf] }
  0x22   : > { %1044 = vmatpush.bf16.msra.mxu1 %v6129_v18  ;;  %6201 = vmatpush.bf16.msra.mxu2 %v6129_v18  ;;  %v6182_v59 = vld [vmem:[%s8059_s5 + $0x18c] sm:$0xf]  ;;  %v6007_v24 = vld [vmem:[%s8059_s5 + $0x148] sm:$0xf] }
  0x23   : > { %v6041_v60 = vld [vmem:[%s8059_s5 + $0x1a8] sm:$0xf0]  ;;  %v6178_v25 = vld [vmem:[%s8059_s5 + $0x164] sm:$0xf0] }
  0x24   : > { %v6044_v61 = vor.u32 %v6182_v59, %v6041_v60  ;;  %v6177_v59 = vld [vmem:[%s8059_s5 + $0x15c] sm:$0xf0] }
  0x25   : > { %v6000_v60 = vor.u32 %v6177_v59, %v5999_v58  ;;  %v6149_v59 = vld [vmem:[%s8059_s5 + $0x84] sm:$0xf] }
  0x26   : > { %2206 = vmatpush.bf16.msrb.mxu1 %v6076_v26  ;;  %1702 = vmatpush.bf16.msrb.mxu2 %v6064_v36  ;;  %v6008_v26 = vor.u32 %v6178_v25, %v6007_v24  ;;  %v6173_v36 = vld [vmem:[%s8059_s5 + $0x144] sm:$0xf] }
  0x28   : > { %2040 = vmatpush.bf16.msrb.mxu0 %v6008_v26  ;;  %v373_v26 = vld [vmem:[%s6456_s21 + $0xf8] sm:$0xf] }
  0x2a   : > { %2207 = vmatpush.bf16.msrb.mxu1 %v6044_v61 }
  0x2c   : > { %5758 = vmatmul.msk.bf16.gmra.mxu0 %vm544_vm0, %v6098_v3  ;;  %5775 = vmatmul.msk.bf16.gmra.mxu3 %vm544_vm0, %v6115_v4 }
  0x3c   : > { %5759 = vmatmul.msk.bf16.gmra.mxu0 %vm544_vm0, %v6099_v5  ;;  %5776 = vmatmul.msk.bf16.gmra.mxu3 %vm544_vm0, %v6116_v6 }
  0x4c   : > { %5760 = vmatmul.msk.bf16.gmra.mxu0 %vm544_vm0, %v6100_v7  ;;  %5777 = vmatmul.msk.bf16.gmra.mxu3 %vm544_vm0, %v6117_v8 }
  0x5c   : > { %5761 = vmatmul.msk.bf16.gmra.mxu0 %vm544_vm0, %v6101_v9  ;;  %5778 = vmatmul.msk.bf16.gmra.mxu3 %vm544_vm0, %v6118_v10  ;;  %v6107_v9 = vld [vmem:[%s6456_s21 + $0x50] sm:$0xff]  ;;  %v6124_v10 = vld [vmem:[%s6456_s21 + $0xd8] sm:$0xff] }
  0x6c   : > { %5762 = vmatmul.msk.bf16.gmra.mxu0 %vm544_vm0, %v6102_v11  ;;  %5779 = vmatmul.msk.bf16.gmra.mxu3 %vm544_vm0, %v6119_v12 }
  0x7c   : > { %5763 = vmatmul.msk.bf16.gmra.mxu0 %vm544_vm0, %v6103_v14  ;;  %5780 = vmatmul.msk.bf16.gmra.mxu3 %vm544_vm0, %v6120_v15  ;;  %v6031_v14 = vld [vmem:[%s8059_s5 + $0x180] sm:$0xf] }
  0x7d   : > { %v6185_v15 = vld [vmem:[%s8059_s5 + $0x19c] sm:$0xf0] }
  0x7e   : > { %v6032_v16 = vor.u32 %v6185_v15, %v6031_v14 }
  0x80   : > { %1703 = vmatpush.bf16.msrb.mxu2 %v6032_v16  ;;  %v5975_v16 = vld [vmem:[%s8059_s5 + $0x108] sm:$0xf] }
  0x84   : > { %1704 = vmatpush.bf16.msrb.mxu2 %v6000_v60  ;;  %v5905_v60 = vld [vmem:[%s8059_s5 + $0xa0] sm:$0xf0] }
  0x8c   : > { %5764 = vmatmul.msk.bf16.gmra.mxu0 %vm544_vm0, %v6104_v22  ;;  %5781 = vmatmul.msk.bf16.gmra.mxu3 %vm544_vm0, %v6121_v23 }
  0x99   : > { %v650_v32 = vpop.f32.mrf.mxu0 }
  0x9a   : > { %v651_v38 = vadd.f32 %v6525_v33, %v650_v32  ;;  %v6125_v32 = vld [vmem:[%s6456_s21 + $0xe0] sm:$0xff] }
  0x9c   : > { %5765 = vmatmul.msk.bf16.gmra.mxu0 %vm544_vm0, %v6105_v30  ;;  %5782 = vmatmul.msk.bf16.gmra.mxu3 %vm544_vm0, %v6122_v31  ;;  %v809_v41 = vmax.f32 %v651_v38, 0.0  ;;  %v6108_v31 = vld [vmem:[%s6456_s21 + $0x58] sm:$0xff] }
  0x9f   : > { %v735_v37 = vpop.f32.mrf.mxu3 }
  0xa0   : > { %v736_v42 = vadd.f32 %v6525_v33, %v735_v37  ;;  %v6001_v37 = vld [vmem:[%s8059_s5 + $0x160] sm:$0xf0] }
  0xa1   : > { %v652_v39 = vpop.f32.mrf.mxu0  ;;  %v6004_v38 = vor.u32 %v6173_v36, %v6001_v37 }
  0xa2   : > { %v653_v40 = vadd.f32 %v6525_v33, %v652_v39  ;;  %v843_v49 = vmax.f32 %v736_v42, 0.0 }
  0xa3   : > { %1872 = vmatpush.bf16.msrb.mxu3 %v6004_v38 }
  0xa4   : > { %v810_v43 = vmax.f32 %v653_v40, 0.0  ;;  %v6174_v40 = vld [vmem:[%s8059_s5 + $0x14c] sm:$0xf] }
  0xa6   : > { %v872_v47 = vpack.c.bf16 %v810_v43, %v809_v41  ;;  %v6009_v41 = vld [vmem:[%s8059_s5 + $0x168] sm:$0xf0] }
  0xa7   : > { %v737_v48 = vpop.f32.mrf.mxu3  ;;  %v6012_v42 = vor.u32 %v6174_v40, %v6009_v41  ;;  %v6111_v40 = vld [vmem:[%s6456_s21 + $0x70] sm:$0xff] }
  0xa8   : > { %v738_v50 = vadd.f32 %v6525_v33, %v737_v48  ;;  %5805 = vmatmul.msk.bf16.vlgmr.msra.gmra.mxu1 %vm940_vm1, %v872_v47 }
  0xa9   : > { %v655_v53 = vpop.f32.mrf.mxu0  ;;  %2208 = vmatpush.bf16.msrb.mxu1 %v6012_v42 }
  0xaa   : > { %v844_v54 = vmax.f32 %v738_v50, 0.0  ;;  %v656_v63 = vadd.f32 %v6525_v33, %v655_v53 }
  0xac   : > { %5766 = vmatmul.msk.bf16.gmra.mxu0 %vm544_vm0, %v6106_v51  ;;  %5783 = vmatmul.msk.bf16.gmra.mxu3 %vm544_vm0, %v6123_v52  ;;  %v889_v55 = vpack.c.bf16 %v844_v54, %v843_v49  ;;  %v811_v2 = vmax.f32 %v656_v63, 0.0  ;;  %v6109_v54 = vld [vmem:[%s6456_s21 + $0x60] sm:$0xff] }
  0xae   : > { %5822 = vmatmul.msk.bf16.vlgmr.msra.gmra.mxu2 %vm940_vm1, %v889_v55  ;;  %v6126_v55 = vld [vmem:[%s6456_s21 + $0xe8] sm:$0xff] }
  0xaf   : > { %v740_v62 = vpop.f32.mrf.mxu3 }
  0xb0   : > { %v741_v3 = vadd.f32 %v6525_v33, %v740_v62 }
  0xb1   : > { %v657_v0 = vpop.f32.mrf.mxu0 }
  0xb2   : > { %v658_v1 = vadd.f32 %v6525_v33, %v657_v0  ;;  %v845_v7 = vmax.f32 %v741_v3, 0.0 }
  0xb4   : > { %v812_v4 = vmax.f32 %v658_v1, 0.0 }
  0xb6   : > { %v873_v5 = vpack.c.bf16 %v812_v4, %v811_v2 }
  0xb7   : > { %v742_v6 = vpop.f32.mrf.mxu3 }
  0xb8   : > { %v743_v8 = vadd.f32 %v6525_v33, %v742_v6  ;;  %5806 = vmatmul.msk.bf16.gmra.mxu1 %vm940_vm1, %v873_v5  ;;  %v6165_v5 = vld [vmem:[%s8059_s5 + $0x104] sm:$0xf] }
  0xb9   : > { %v660_v11 = vpop.f32.mrf.mxu0  ;;  %v5969_v6 = vld [vmem:[%s8059_s5 + $0x120] sm:$0xf0] }
  0xba   : > { %v846_v12 = vmax.f32 %v743_v8, 0.0  ;;  %v661_v18 = vadd.f32 %v6525_v33, %v660_v11 }
  0xbc   : > { %5767 = vmatmul.msk.bf16.gmra.mxu0 %vm544_vm0, %v6107_v9  ;;  %5784 = vmatmul.msk.bf16.gmra.mxu3 %vm544_vm0, %v6124_v10  ;;  %v890_v13 = vpack.c.bf16 %v846_v12, %v845_v7  ;;  %v813_v21 = vmax.f32 %v661_v18, 0.0  ;;  %v5972_v7 = vor.u32 %v6165_v5, %v5969_v6  ;;  %v6110_v12 = vld [vmem:[%s6456_s21 + $0x68] sm:$0xff] }
  0xbe   : > { %5823 = vmatmul.msk.bf16.gmra.mxu2 %vm940_vm1, %v890_v13  ;;  %1873 = vmatpush.bf16.msrb.mxu3 %v5972_v7  ;;  %v6127_v13 = vld [vmem:[%s6456_s21 + $0xf0] sm:$0xff]  ;;  %v6141_v7 = vld [vmem:[%s8059_s5 + $0x44] sm:$0xf] }
  0xbf   : > { %v745_v17 = vpop.f32.mrf.mxu3 }
  0xc0   : > { %v746_v22 = vadd.f32 %v6525_v33, %v745_v17  ;;  %v6170_v17 = vld [vmem:[%s8059_s5 + $0x124] sm:$0xf0] }
  0xc1   : > { %v662_v19 = vpop.f32.mrf.mxu0  ;;  %v5976_v18 = vor.u32 %v6170_v17, %v5975_v16  ;;  %v5847_v16 = vld [vmem:[%s8059_s5 + $0x8] sm:$0xf] }
  0xc2   : > { %v663_v20 = vadd.f32 %v6525_v33, %v662_v19  ;;  %v847_v29 = vmax.f32 %v746_v22, 0.0 }
  0xc3   : > { %2041 = vmatpush.bf16.msrb.mxu0 %v5976_v18 }
  0xc4   : > { %v814_v23 = vmax.f32 %v663_v20, 0.0  ;;  %v6166_v20 = vld [vmem:[%s8059_s5 + $0x10c] sm:$0xf] }
  0xc6   : > { %v874_v27 = vpack.c.bf16 %v814_v23, %v813_v21  ;;  %v5977_v21 = vld [vmem:[%s8059_s5 + $0x128] sm:$0xf0] }
  0xc7   : > { %v747_v28 = vpop.f32.mrf.mxu3  ;;  %v5980_v23 = vor.u32 %v6166_v20, %v5977_v21 }
  0xc8   : > { %v748_v30 = vadd.f32 %v6525_v33, %v747_v28  ;;  %5807 = vmatmul.msk.bf16.gmra.mxu1 %vm940_vm1, %v874_v27 }
  0xc9   : > { %v665_v34 = vpop.f32.mrf.mxu0  ;;  %2209 = vmatpush.bf16.msrb.mxu1 %v5980_v23 }
  0xca   : > { %v848_v35 = vmax.f32 %v748_v30, 0.0  ;;  %v666_v44 = vadd.f32 %v6525_v33, %v665_v34  ;;  %v6169_v34 = vld [vmem:[%s8059_s5 + $0x11c] sm:$0xf0] }
  0xcc   : > { %5768 = vmatmul.msk.bf16.gmra.mxu0 %vm544_vm0, %v6108_v31  ;;  %5785 = vmatmul.msk.bf16.gmra.mxu3 %vm544_vm0, %v6125_v32  ;;  %v891_v39 = vpack.c.bf16 %v848_v35, %v847_v29  ;;  %v815_v47 = vmax.f32 %v666_v44, 0.0  ;;  %v505_v31 = vunpack.c.l.b16 %v373_v26  ;;  %v5967_v32 = vld [vmem:[%s8059_s5 + $0x100] sm:$0xf] }
  0xcd   : > { %v5968_v35 = vor.u32 %v6169_v34, %v5967_v32 }
  0xce   : > { %5824 = vmatmul.msk.bf16.gmra.mxu2 %vm940_vm1, %v891_v39  ;;  %v537_v41 = vpack.c.b16 %v505_v31, %v505_v31  ;;  %v6161_v31 = vld [vmem:[%s8059_s5 + $0xdc] sm:$0xf0] }
  0xcf   : > { %v750_v43 = vpop.f32.mrf.mxu3  ;;  %1705 = vmatpush.bf16.msrb.mxu2 %v5968_v35 }
  0xd0   : > { %v751_v48 = vadd.f32 %v6525_v33, %v750_v43 }
  0xd1   : > { %v667_v45 = vpop.f32.mrf.mxu0 }
  0xd2   : > { %v668_v46 = vadd.f32 %v6525_v33, %v667_v45  ;;  %v849_v52 = vmax.f32 %v751_v48, 0.0 }
  0xd4   : > { %v816_v49 = vmax.f32 %v668_v46, 0.0 }
  0xd6   : > { %v875_v50 = vpack.c.bf16 %v816_v49, %v815_v47  ;;  %v6157_v49 = vld [vmem:[%s8059_s5 + $0xc4] sm:$0xf] }
  0xd7   : > { %v752_v51 = vpop.f32.mrf.mxu3 }
  0xd8   : > { %v753_v53 = vadd.f32 %v6525_v33, %v752_v51  ;;  %5808 = vmatmul.msk.bf16.gmra.mxu1 %vm940_vm1, %v875_v50  ;;  %v5937_v50 = vld [vmem:[%s8059_s5 + $0xe0] sm:$0xf0] }
  0xd9   : > { %v670_v56 = vpop.f32.mrf.mxu0  ;;  %v5940_v51 = vor.u32 %v6157_v49, %v5937_v50 }
  0xda   : > { %v850_v57 = vmax.f32 %v753_v53, 0.0  ;;  %v671_v63 = vadd.f32 %v6525_v33, %v670_v56  ;;  %v6162_v53 = vld [vmem:[%s8059_s5 + $0xe4] sm:$0xf0] }
  0xdb   : > { %1874 = vmatpush.bf16.msrb.mxu3 %v5940_v51 }
  0xdc   : > { %5769 = vmatmul.msk.bf16.gmra.mxu0 %vm544_vm0, %v6109_v54  ;;  %5786 = vmatmul.msk.bf16.gmra.mxu3 %vm544_vm0, %v6126_v55  ;;  %v892_v61 = vpack.c.bf16 %v850_v57, %v849_v52  ;;  %v817_v2 = vmax.f32 %v671_v63, 0.0  ;;  %v5943_v52 = vld [vmem:[%s8059_s5 + $0xc8] sm:$0xf]  ;;  %v5908_v63 = vor.u32 %v6149_v59, %v5905_v60 }
  0xdd   : > { %v5944_v57 = vor.u32 %v6162_v53, %v5943_v52  ;;  %v6749_v53 = vld [vmem:[%s8058_s4] ss:$0 sm:$0xff] }
  0xde   : > { %5825 = vmatmul.msk.bf16.gmra.mxu2 %vm940_vm1, %v892_v61  ;;  %v5911_v61 = vld [vmem:[%s8059_s5 + $0x88] sm:$0xf] }
  0xdf   : > { %v755_v62 = vpop.f32.mrf.mxu3  ;;  %2042 = vmatpush.bf16.msrb.mxu0 %v5944_v57  ;;  %1875 = vmatpush.bf16.msrb.mxu3 %v5908_v63 }
  0xe0   : > { %v756_v3 = vadd.f32 %v6525_v33, %v755_v62 }
  0xe1   : > { %v672_v0 = vpop.f32.mrf.mxu0 }
  0xe2   : > { %v673_v1 = vadd.f32 %v6525_v33, %v672_v0  ;;  %v851_v10 = vmax.f32 %v756_v3, 0.0  ;;  %v6154_v0 = vld [vmem:[%s8059_s5 + $0xa4] sm:$0xf0]  ;;  %v6112_v3 = vld [vmem:[%s6456_s21 + $0x78] sm:$0xff] }
  0xe4   : > { %v818_v4 = vmax.f32 %v673_v1, 0.0 }
  0xe6   : > { %v876_v8 = vpack.c.bf16 %v818_v4, %v817_v2  ;;  %v5912_v4 = vor.u32 %v6154_v0, %v5911_v61 }
  0xe7   : > { %v757_v9 = vpop.f32.mrf.mxu3 }
  0xe8   : > { %v758_v11 = vadd.f32 %v6525_v33, %v757_v9  ;;  %5809 = vmatmul.msk.bf16.gmra.mxu1 %vm940_vm1, %v876_v8  ;;  %2043 = vmatpush.bf16.msrb.mxu0 %v5912_v4  ;;  %v5873_v8 = vld [vmem:[%s8059_s5 + $0x60] sm:$0xf0] }
  0xe9   : > { %v675_v14 = vpop.f32.mrf.mxu0  ;;  %v5876_v9 = vor.u32 %v6141_v7, %v5873_v8  ;;  %v5903_v8 = vld [vmem:[%s8059_s5 + $0x80] sm:$0xf] }
  0xea   : > { %v852_v15 = vmax.f32 %v758_v11, 0.0  ;;  %v676_v24 = vadd.f32 %v6525_v33, %v675_v14  ;;  %v6146_v11 = vld [vmem:[%s8059_s5 + $0x64] sm:$0xf0]  ;;  %v6133_v14 = vld [vmem:[%s8059_s5 + $0x4] sm:$0xf] }
  0xeb   : > { %1876 = vmatpush.bf16.msrb.mxu3 %v5876_v9  ;;  %v6153_v9 = vld [vmem:[%s8059_s5 + $0x9c] sm:$0xf0] }
  0xec   : > { %5770 = vmatmul.msk.bf16.gmra.mxu0 %vm544_vm0, %v6110_v12  ;;  %5787 = vmatmul.msk.bf16.gmra.mxu3 %vm544_vm0, %v6127_v13  ;;  %v893_v19 = vpack.c.bf16 %v852_v15, %v851_v10  ;;  %v819_v28 = vmax.f32 %v676_v24, 0.0  ;;  %v5879_v10 = vld [vmem:[%s8059_s5 + $0x48] sm:$0xf]  ;;  %v5841_v15 = vld [vmem:[%s8059_s5 + $0x20] sm:$0xf0] }
  0xed   : > { %v5880_v13 = vor.u32 %v6146_v11, %v5879_v10  ;;  %v5844_v18 = vor.u32 %v6133_v14, %v5841_v15  ;;  %v6158_v24 = vld [vmem:[%s8059_s5 + $0xcc] sm:$0xf]  ;;  %v5904_v11 = vor.u32 %v6153_v9, %v5903_v8 }
  0xee   : > { %5826 = vmatmul.msk.bf16.gmra.mxu2 %vm940_vm1, %v893_v19  ;;  %v6138_v19 = vld [vmem:[%s8059_s5 + $0x24] sm:$0xf0] }
  0xef   : > { %v760_v22 = vpop.f32.mrf.mxu3  ;;  %2044 = vmatpush.bf16.msrb.mxu0 %v5880_v13  ;;  %v5848_v21 = vor.u32 %v6138_v19, %v5847_v16  ;;  %1877 = vmatpush.bf16.msrb.mxu3 %v5844_v18  ;;  %v5913_v13 = vld [vmem:[%s8059_s5 + $0xa8] sm:$0xf0] }
  0xf0   : > { %v761_v29 = vadd.f32 %v6525_v33, %v760_v22 }
  0xf1   : > { %v677_v25 = vpop.f32.mrf.mxu0 }
  0xf2   : > { %v678_v27 = vadd.f32 %v6525_v33, %v677_v25  ;;  %v853_v38 = vmax.f32 %v761_v29, 0.0  ;;  %v5945_v25 = vld [vmem:[%s8059_s5 + $0xe8] sm:$0xf0] }
  0xf3   : > { %2045 = vmatpush.bf16.msrb.mxu0 %v5848_v21  ;;  %v5948_v26 = vor.u32 %v6158_v24, %v5945_v25 }
  0xf4   : > { %v820_v30 = vmax.f32 %v678_v27, 0.0 }
  0xf5   : > { %2210 = vmatpush.bf16.msrb.mxu1 %v5948_v26 }
  0xf6   : > { %v877_v36 = vpack.c.bf16 %v820_v30, %v819_v28  ;;  %v5935_v30 = vld [vmem:[%s8059_s5 + $0xc0] sm:$0xf] }
  0xf7   : > { %v762_v37 = vpop.f32.mrf.mxu3  ;;  %v5936_v32 = vor.u32 %v6161_v31, %v5935_v30 }
  0xf8   : > { %v763_v39 = vadd.f32 %v6525_v33, %v762_v37  ;;  %5810 = vmatmul.msk.bf16.gmra.mxu1 %vm940_vm1, %v877_v36 }
  0xf9   : > { %v680_v42 = vpop.f32.mrf.mxu0  ;;  %1706 = vmatpush.bf16.msrb.mxu2 %v5936_v32 }
  0xfa   : > { %v854_v43 = vmax.f32 %v763_v39, 0.0  ;;  %v681_v46 = vadd.f32 %v6525_v33, %v680_v42 }
  0xfc   : > { %5771 = vmatmul.msk.bf16.gmra.mxu0 %vm544_vm0, %v6111_v40  ;;  %v894_v44 = vpack.c.bf16 %v854_v43, %v853_v38  ;;  %5788 = vmatmul.msk.bf16.gmra.mxu3 %vm544_vm0, %v537_v41  ;;  %v821_v54 = vmax.f32 %v681_v46, 0.0  ;;  %v6113_v38 = vld [vmem:[%s6456_s21 + $0x80] sm:$0xff]  ;;  %s5544_s21 = scalar_lea.hbm %s8061_s7, %s6094_s8 }
  0xfd   : > { %1707 = vmatpush.bf16.msrb.mxu2 %v5904_v11  ;;  %s5548_s17 = sshll.u32 %s5544_s21, 4  ;;  %s5549_s17 = int_to_ptr.hbm [resolvable:$true] %s5548_s17 }
  0xfe   : > { %5827 = vmatmul.msk.bf16.gmra.mxu2 %vm940_vm1, %v894_v44  ;;  %s6287_s18 = sshra.s32 %s5549_s17, 4  ;;  %s6288_s18 = int_to_ptr.hbm [resolvable:$true] %s6287_s18 }
  0xff   : > { %v765_v45 = vpop.f32.mrf.mxu3  ;;  %s6289_s19 = scalar_lea.hbm %s6288_s18, 8  ;;  %p6294_p1 = scmp.lt.s32.totalorder %s6288_s18, %s8061_s7 }
 0x100   : > { %v766_v55 = vadd.f32 %v6525_v33, %v765_v45  ;;  %p6290_p12 = scmp.ne.s32.totalorder %s6288_s18, %s6289_s19  ;;  %p6295_p2 = scmp.lt.s32.totalorder %s6293_s30, %s6289_s19 }
 0x101   : > { %v682_v47 = vpop.f32.mrf.mxu0 }
 0x102   : > { %v683_v48 = vadd.f32 %v6525_v33, %v682_v47  ;;  %v855_v1 = vmax.f32 %v766_v55, 0.0  ;;  %p6291_p13 = pnand %p6290_p12, %p6433_p4  ;;  %p6296_p3 = por %p6295_p2, %p6294_p1 }
 0x104   : > { %v822_v56 = vmax.f32 %v683_v48, 0.0  ;;  %p6292_p0 = pneg %p6291_p13 }
 0x106   : > { %v878_v58 = vpack.c.bf16 %v822_v56, %v821_v54  ;;  %p6297_p5 = pnand %p6296_p3, %p6292_p0 }
 0x107   : > { %v767_v62 = vpop.f32.mrf.mxu3 }
 0x108   : > { %v768_v2 = vadd.f32 %v6525_v33, %v767_v62  ;;  %5811 = vmatmul.msk.bf16.gmra.mxu1 %vm940_vm1, %v878_v58 }
 0x109   : > { %v685_v5 = vpop.f32.mrf.mxu0 }
 0x10a   : > { %v856_v6 = vmax.f32 %v768_v2, 0.0  ;;  %v686_v20 = vadd.f32 %v6525_v33, %v685_v5 }
 0x10c   : > { %5772 = vmatmul.msk.bf16.gmra.mxu0 %vm544_vm0, %v6112_v3  ;;  %v895_v12 = vpack.c.bf16 %v856_v6, %v855_v1  ;;  %v823_v27 = vmax.f32 %v686_v20, 0.0 }
 0x10e   : > { %5828 = vmatmul.msk.bf16.gmra.mxu2 %vm940_vm1, %v895_v12  ;;  %v6150_v12 = vld [vmem:[%s8059_s5 + $0x8c] sm:$0xf] }
 0x10f   : > { %v770_v17 = vpop.f32.mrf.mxu3  ;;  %v5916_v15 = vor.u32 %v6150_v12, %v5913_v13 }
 0x110   : > { %v771_v28 = vadd.f32 %v6525_v33, %v770_v17 }
 0x111   : > { %v687_v22 = vpop.f32.mrf.mxu0  ;;  %2211 = vmatpush.bf16.msrb.mxu1 %v5916_v15  ;;  %v5881_v15 = vld [vmem:[%s8059_s5 + $0x68] sm:$0xf0] }
 0x112   : > { %v688_v23 = vadd.f32 %v6525_v33, %v687_v22  ;;  %v857_v36 = vmax.f32 %v771_v28, 0.0 }
 0x114   : > { %v824_v29 = vmax.f32 %v688_v23, 0.0 }
 0x116   : > { %v879_v34 = vpack.c.bf16 %v824_v29, %v823_v27 }
 0x117   : > { %v772_v35 = vpop.f32.mrf.mxu3 }
 0x118   : > { %v773_v37 = vadd.f32 %v6525_v33, %v772_v35  ;;  %5812 = vmatmul.msk.bf16.gmra.mxu1 %vm940_vm1, %v879_v34 }
 0x119   : > { %v690_v39 = vpop.f32.mrf.mxu0 }
 0x11a   : > { %v858_v40 = vmax.f32 %v773_v37, 0.0  ;;  %v691_v43 = vadd.f32 %v6525_v33, %v690_v39 }
 0x11c   : > { %5773 = vmatmul.msk.bf16.gmra.mxu0 %vm544_vm0, %v6113_v38  ;;  %v896_v41 = vpack.c.bf16 %v858_v40, %v857_v36  ;;  %v825_v46 = vmax.f32 %v691_v43, 0.0 }
 0x11e   : > { %5829 = vmatmul.msk.bf16.gmra.mxu2 %vm940_vm1, %v896_v41 }
 0x11f   : > { %v775_v42 = vpop.f32.mrf.mxu3 }
 0x120   : > { %v776_v47 = vadd.f32 %v6525_v33, %v775_v42 }
 0x121   : > { %v692_v44 = vpop.f32.mrf.mxu0 }
 0x122   : > { %v693_v45 = vadd.f32 %v6525_v33, %v692_v44  ;;  %v859_v52 = vmax.f32 %v776_v47, 0.0 }
 0x124   : > { %v826_v48 = vmax.f32 %v693_v45, 0.0 }
 0x125   : > { %v1046_v49 = vpop.f32.mrf.mxu1 }
 0x126   : > { %v880_v50 = vpack.c.bf16 %v826_v48, %v825_v46  ;;  %v1047_v57 = vadd.f32 %v6749_v53, %v1046_v49 }
 0x127   : > { %v777_v51 = vpop.f32.mrf.mxu3 }
 0x128   : > { %v778_v54 = vadd.f32 %v6525_v33, %v777_v51  ;;  %5813 = vmatmul.msk.bf16.gmra.mxu1 %vm940_vm1, %v880_v50  ;;  %v1205_v62 = vmax.f32 %v1047_v57, 0.0 }
 0x129   : > { %v695_v55 = vpop.f32.mrf.mxu0 }
 0x12a   : > { %v860_v56 = vmax.f32 %v778_v54, 0.0  ;;  %v696_v63 = vadd.f32 %v6525_v33, %v695_v55 }
 0x12c   : > { %v897_v58 = vpack.c.bf16 %v860_v56, %v859_v52  ;;  %v827_v5 = vmax.f32 %v696_v63, 0.0 }
 0x12d   : > { %v1048_v59 = vpop.f32.mrf.mxu1 }
 0x12e   : > { %v1049_v60 = vadd.f32 %v6749_v53, %v1048_v59  ;;  %5830 = vmatmul.msk.bf16.gmra.mxu2 %vm940_vm1, %v897_v58 }
 0x12f   : > { %v780_v61 = vpop.f32.mrf.mxu3 }
 0x130   : > { %v1206_v0 = vmax.f32 %v1049_v60, 0.0  ;;  %v781_v6 = vadd.f32 %v6525_v33, %v780_v61 }
 0x131   : > { %v697_v1 = vpop.f32.mrf.mxu0  ;;  %v1131_v2 = vpop.f32.mrf.mxu2 }
 0x132   : > { %v6757_v3 = vpack.c.bf16 %v1206_v0, %v1205_v62  ;;  %v698_v4 = vadd.f32 %v6525_v33, %v697_v1  ;;  %v861_v17 = vmax.f32 %v781_v6, 0.0  ;;  %v1132_v18 = vadd.f32 %v6749_v53, %v1131_v2  ;;  %v5871_v6 = vld [vmem:[%s8059_s5 + $0x40] sm:$0xf] }
 0x134   : > { %v828_v7 = vmax.f32 %v698_v4, 0.0  ;;  %1878 = vmatmul.bf16.vlgmr.msrb.gmra.mxu3 %v6757_v3  ;;  %2046 = vmatmul.bf16.vlgmr.msrb.gmra.mxu0 %v6757_v3  ;;  %v1239_v24 = vmax.f32 %v1132_v18, 0.0 }
 0x135   : > { %v1051_v10 = vpop.f32.mrf.mxu1 }
 0x136   : > { %v881_v14 = vpack.c.bf16 %v828_v7, %v827_v5  ;;  %v1052_v25 = vadd.f32 %v6749_v53, %v1051_v10  ;;  %v6145_v7 = vld [vmem:[%s8059_s5 + $0x5c] sm:$0xf0] }
 0x137   : > { %v782_v16 = vpop.f32.mrf.mxu3  ;;  %v5872_v8 = vor.u32 %v6145_v7, %v5871_v6 }
 0x138   : > { %v783_v19 = vadd.f32 %v6525_v33, %v782_v16  ;;  %5814 = vmatmul.msk.bf16.gmra.mxu1 %vm940_vm1, %v881_v14  ;;  %v1207_v32 = vmax.f32 %v1052_v25, 0.0  ;;  %v6142_v14 = vld [vmem:[%s8059_s5 + $0x4c] sm:$0xf] }
 0x139   : > { %v700_v20 = vpop.f32.mrf.mxu0  ;;  %v1133_v21 = vpop.f32.mrf.mxu2  ;;  %1708 = vmatpush.bf16.msrb.mxu2 %v5872_v8 }
 0x13a   : > { %v862_v22 = vmax.f32 %v783_v19, 0.0  ;;  %v1134_v23 = vadd.f32 %v6749_v53, %v1133_v21  ;;  %v701_v34 = vadd.f32 %v6525_v33, %v700_v20 }
 0x13c   : > { %v1240_v26 = vmax.f32 %v1134_v23, 0.0  ;;  %v898_v27 = vpack.c.bf16 %v862_v22, %v861_v17  ;;  %v829_v40 = vmax.f32 %v701_v34, 0.0  ;;  %v5884_v17 = vor.u32 %v6142_v14, %v5881_v15 }
 0x13d   : > { %v1053_v28 = vpop.f32.mrf.mxu1 }
 0x13e   : > { %v6780_v29 = vpack.c.bf16 %v1240_v26, %v1239_v24  ;;  %v1054_v30 = vadd.f32 %v6749_v53, %v1053_v28  ;;  %5831 = vmatmul.msk.bf16.gmra.mxu2 %vm940_vm1, %v898_v27  ;;  %2212 = vmatpush.bf16.msrb.mxu1 %v5884_v17 }
 0x13f   : > { %v785_v31 = vpop.f32.mrf.mxu3 }
 0x140   : > { %v1208_v35 = vmax.f32 %v1054_v30, 0.0  ;;  %v786_v41 = vadd.f32 %v6525_v33, %v785_v31 }
 0x141   : > { %v702_v36 = vpop.f32.mrf.mxu0  ;;  %v1136_v37 = vpop.f32.mrf.mxu2 }
 0x142   : > { %v6785_v38 = vpack.c.bf16 %v1208_v35, %v1207_v32  ;;  %v703_v39 = vadd.f32 %v6525_v33, %v702_v36  ;;  %v863_v46 = vmax.f32 %v786_v41, 0.0  ;;  %v1137_v47 = vadd.f32 %v6749_v53, %v1136_v37 }
 0x144   : > { %v830_v42 = vmax.f32 %v703_v39, 0.0  ;;  %1883 = vmatmul.bf16.gmra.mxu3 %v6785_v38  ;;  %2051 = vmatmul.bf16.gmra.mxu0 %v6785_v38  ;;  %v1241_v54 = vmax.f32 %v1137_v47, 0.0 }
 0x145   : > { %v1056_v43 = vpop.f32.mrf.mxu1 }
 0x146   : > { %v882_v44 = vpack.c.bf16 %v830_v42, %v829_v40  ;;  %v1057_v55 = vadd.f32 %v6749_v53, %v1056_v43 }
 0x147   : > { %v787_v45 = vpop.f32.mrf.mxu3 }
 0x148   : > { %v788_v48 = vadd.f32 %v6525_v33, %v787_v45  ;;  %5815 = vmatmul.msk.bf16.gmra.mxu1 %vm940_vm1, %v882_v44  ;;  %v1209_v62 = vmax.f32 %v1057_v55, 0.0 }
 0x149   : > { %v705_v49 = vpop.f32.mrf.mxu0  ;;  %v1138_v50 = vpop.f32.mrf.mxu2 }
 0x14a   : > { %v864_v51 = vmax.f32 %v788_v48, 0.0  ;;  %v1139_v52 = vadd.f32 %v6749_v53, %v1138_v50  ;;  %v706_v63 = vadd.f32 %v6525_v33, %v705_v49 }
 0x14c   : > { %v1242_v56 = vmax.f32 %v1139_v52, 0.0  ;;  %v899_v57 = vpack.c.bf16 %v864_v51, %v863_v46  ;;  %v831_v9 = vmax.f32 %v706_v63, 0.0 }
 0x14d   : > { %v1058_v58 = vpop.f32.mrf.mxu1 }
 0x14e   : > { %v6796_v59 = vpack.c.bf16 %v1242_v56, %v1241_v54  ;;  %v1059_v60 = vadd.f32 %v6749_v53, %v1058_v58  ;;  %5832 = vmatmul.msk.bf16.gmra.mxu2 %vm940_vm1, %v899_v57 }
 0x14f   : > { %v790_v61 = vpop.f32.mrf.mxu3 }
 0x150   : > { %v1210_v0 = vmax.f32 %v1059_v60, 0.0  ;;  %v791_v10 = vadd.f32 %v6525_v33, %v790_v61 }
 0x151   : > { %v707_v1 = vpop.f32.mrf.mxu0  ;;  %v1141_v2 = vpop.f32.mrf.mxu2 }
 0x152   : > { %v6801_v4 = vpack.c.bf16 %v1210_v0, %v1209_v62  ;;  %v708_v5 = vadd.f32 %v6525_v33, %v707_v1  ;;  %v865_v18 = vmax.f32 %v791_v10, 0.0  ;;  %v1142_v19 = vadd.f32 %v6749_v53, %v1141_v2 }
 0x154   : > { %v832_v11 = vmax.f32 %v708_v5, 0.0  ;;  %1888 = vmatmul.bf16.gmra.mxu3 %v6801_v4  ;;  %2056 = vmatmul.bf16.gmra.mxu0 %v6801_v4  ;;  %v1243_v25 = vmax.f32 %v1142_v19, 0.0 }
 0x155   : > { %v1061_v12 = vpop.f32.mrf.mxu1 }
 0x156   : > { %v883_v13 = vpack.c.bf16 %v832_v11, %v831_v9  ;;  %v1062_v26 = vadd.f32 %v6749_v53, %v1061_v12  ;;  %v5839_v11 = vld [vmem:[%s8059_s5] sm:$0xf] }
 0x157   : > { %v792_v16 = vpop.f32.mrf.mxu3  ;;  %v6137_v12 = vld [vmem:[%s8059_s5 + $0x1c] sm:$0xf0] }
 0x158   : > { %v793_v20 = vadd.f32 %v6525_v33, %v792_v16  ;;  %5816 = vmatmul.msk.bf16.gmra.mxu1 %vm940_vm1, %v883_v13  ;;  %v1211_v35 = vmax.f32 %v1062_v26, 0.0  ;;  %v5840_v13 = vor.u32 %v6137_v12, %v5839_v11 }
 0x159   : > { %v710_v21 = vpop.f32.mrf.mxu0  ;;  %v1143_v22 = vpop.f32.mrf.mxu2 }
 0x15a   : > { %v866_v23 = vmax.f32 %v793_v20, 0.0  ;;  %v1144_v24 = vadd.f32 %v6749_v53, %v1143_v22  ;;  %v711_v36 = vadd.f32 %v6525_v33, %v710_v21  ;;  %1709 = vmatpush.bf16.msrb.mxu2 %v5840_v13  ;;  %v6079_v13 = vld [vmem:[%s8059_s5 + $0x1d0] sm:$0xf] }
 0x15c   : > { %v1244_v27 = vmax.f32 %v1144_v24, 0.0  ;;  %v900_v28 = vpack.c.bf16 %v866_v23, %v865_v18  ;;  %v833_v43 = vmax.f32 %v711_v36, 0.0  ;;  %v6134_v23 = vld [vmem:[%s8059_s5 + $0xc] sm:$0xf] }
 0x15d   : > { %v1063_v30 = vpop.f32.mrf.mxu1  ;;  %v5849_v24 = vld [vmem:[%s8059_s5 + $0x28] sm:$0xf0] }
 0x15e   : > { %v6824_v31 = vpack.c.bf16 %v1244_v27, %v1243_v25  ;;  %v1064_v32 = vadd.f32 %v6749_v53, %v1063_v30  ;;  %5833 = vmatmul.msk.bf16.gmra.mxu2 %vm940_vm1, %v900_v28  ;;  %v5852_v27 = vor.u32 %v6134_v23, %v5849_v24 }
 0x15f   : > { %v795_v34 = vpop.f32.mrf.mxu3 }
 0x160   : > { %v1212_v37 = vmax.f32 %v1064_v32, 0.0  ;;  %v796_v44 = vadd.f32 %v6525_v33, %v795_v34  ;;  %2213 = vmatpush.bf16.msrb.mxu1 %v5852_v27 }
 0x161   : > { %v712_v39 = vpop.f32.mrf.mxu0  ;;  %v1146_v40 = vpop.f32.mrf.mxu2 }
 0x162   : > { %v6829_v41 = vpack.c.bf16 %v1212_v37, %v1211_v35  ;;  %v713_v42 = vadd.f32 %v6525_v33, %v712_v39  ;;  %v867_v49 = vmax.f32 %v796_v44, 0.0  ;;  %v1147_v50 = vadd.f32 %v6749_v53, %v1146_v40 }
 0x164   : > { %v834_v45 = vmax.f32 %v713_v42, 0.0  ;;  %1893 = vmatmul.bf16.gmra.mxu3 %v6829_v41  ;;  %2061 = vmatmul.bf16.gmra.mxu0 %v6829_v41  ;;  %v1245_v57 = vmax.f32 %v1147_v50, 0.0  ;;  %v6191_v42 = vld [vmem:[%s8059_s5 + $0x1d4] sm:$0xf] }
 0x165   : > { %v1066_v46 = vpop.f32.mrf.mxu1 }
 0x166   : > { %v884_v47 = vpack.c.bf16 %v834_v45, %v833_v43  ;;  %v1067_v58 = vadd.f32 %v6749_v53, %v1066_v46  ;;  %v6081_v43 = vld [vmem:[%s8059_s5 + $0x1f0] sm:$0xf0] }
 0x167   : > { %v797_v48 = vpop.f32.mrf.mxu3  ;;  %v6084_v45 = vor.u32 %v6191_v42, %v6081_v43 }
 0x168   : > { %v798_v51 = vadd.f32 %v6525_v33, %v797_v48  ;;  %5817 = vmatmul.msk.bf16.gmra.mxu1 %vm940_vm1, %v884_v47  ;;  %v1213_v2 = vmax.f32 %v1067_v58, 0.0 }
 0x169   : > { %v715_v52 = vpop.f32.mrf.mxu0  ;;  %v1148_v54 = vpop.f32.mrf.mxu2  ;;  %2542 = vmatpush.bf16.msra.mxu3 %v6084_v45 }
 0x16a   : > { %v868_v55 = vmax.f32 %v798_v51, 0.0  ;;  %v1149_v56 = vadd.f32 %v6749_v53, %v1148_v54  ;;  %v716_v5 = vadd.f32 %v6525_v33, %v715_v52 }
 0x16c   : > { %v901_v60 = vpack.c.bf16 %v868_v55, %v867_v49  ;;  %v1246_v61 = vmax.f32 %v1149_v56, 0.0  ;;  %v835_v14 = vmax.f32 %v716_v5, 0.0 }
 0x16d   : > { %v1068_v62 = vpop.f32.mrf.mxu1 }
 0x16e   : > { %v6840_v63 = vpack.c.bf16 %v1246_v61, %v1245_v57  ;;  %v1069_v0 = vadd.f32 %v6749_v53, %v1068_v62  ;;  %5834 = vmatmul.msk.bf16.gmra.mxu2 %vm940_vm1, %v901_v60 }
 0x16f   : > { %v800_v1 = vpop.f32.mrf.mxu3 }
 0x170   : > { %v1214_v6 = vmax.f32 %v1069_v0, 0.0  ;;  %v801_v15 = vadd.f32 %v6525_v33, %v800_v1 }
 0x171   : > { %v717_v7 = vpop.f32.mrf.mxu0  ;;  %v1151_v8 = vpop.f32.mrf.mxu2 }
 0x172   : > { %v6845_v9 = vpack.c.bf16 %v1214_v6, %v1213_v2  ;;  %v718_v10 = vadd.f32 %v6525_v33, %v717_v7  ;;  %v869_v20 = vmax.f32 %v801_v15, 0.0  ;;  %v1152_v21 = vadd.f32 %v6749_v53, %v1151_v8 }
 0x174   : > { %v836_v16 = vmax.f32 %v718_v10, 0.0  ;;  %1898 = vmatmul.bf16.gmra.mxu3 %v6845_v9  ;;  %2066 = vmatmul.bf16.gmra.mxu0 %v6845_v9  ;;  %v1247_v32 = vmax.f32 %v1152_v21, 0.0 }
 0x175   : > { %v1071_v17 = vpop.f32.mrf.mxu1 }
 0x176   : > { %v885_v18 = vpack.c.bf16 %v836_v16, %v835_v14  ;;  %v1072_v34 = vadd.f32 %v6749_v53, %v1071_v17  ;;  %v6195_v14 = vld [vmem:[%s8059_s5 + $0x1ec] sm:$0xf0] }
 0x177   : > { %v802_v19 = vpop.f32.mrf.mxu3  ;;  %v6080_v15 = vor.u32 %v6195_v14, %v6079_v13 }
 0x178   : > { %v803_v22 = vadd.f32 %v6525_v33, %v802_v19  ;;  %5818 = vmatmul.msk.bf16.gmra.mxu1 %vm940_vm1, %v885_v18  ;;  %v1215_v46 = vmax.f32 %v1072_v34, 0.0 }
 0x179   : > { %v720_v25 = vpop.f32.mrf.mxu0  ;;  %v1153_v26 = vpop.f32.mrf.mxu2  ;;  %2374 = vmatpush.bf16.msra.mxu2 %v6080_v15 }
 0x17a   : > { %v870_v28 = vmax.f32 %v803_v22, 0.0  ;;  %v1154_v30 = vadd.f32 %v6749_v53, %v1153_v26  ;;  %v721_v47 = vadd.f32 %v6525_v33, %v720_v25  ;;  %v6087_v25 = vld [vmem:[%s8059_s5 + $0x1d8] sm:$0xf] }
 0x17b   : > { %v6196_v26 = vld [vmem:[%s8059_s5 + $0x1f4] sm:$0xf0] }
 0x17c   : > { %v902_v35 = vpack.c.bf16 %v870_v28, %v869_v20  ;;  %v1248_v36 = vmax.f32 %v1154_v30, 0.0  ;;  %v837_v55 = vmax.f32 %v721_v47, 0.0  ;;  %v6088_v28 = vor.u32 %v6196_v26, %v6087_v25 }
 0x17d   : > { %v1073_v37 = vpop.f32.mrf.mxu1 }
 0x17e   : > { %v6868_v39 = vpack.c.bf16 %v1248_v36, %v1247_v32  ;;  %v1074_v40 = vadd.f32 %v6749_v53, %v1073_v37  ;;  %5835 = vmatmul.msk.bf16.gmra.mxu2 %vm940_vm1, %v902_v35  ;;  %2710 = vmatpush.bf16.msra.mxu0 %v6088_v28  ;;  %v6192_v36 = vld [vmem:[%s8059_s5 + $0x1dc] sm:$0xf] }
 0x17f   : > { %v805_v44 = vpop.f32.mrf.mxu3  ;;  %v6089_v37 = vld [vmem:[%s8059_s5 + $0x1f8] sm:$0xf0] }
 0x180   : > { %8066 = vst [vmem:[#allocation5_spill] sm:$0xff] %v6868_v39  ;;  %v1216_v48 = vmax.f32 %v1074_v40, 0.0  ;;  %v806_v54 = vadd.f32 %v6525_v33, %v805_v44  ;;  %v6920_v40 = vor.u32 %v6192_v36, %v6089_v37 }
 0x181   : > { %v722_v49 = vpop.f32.mrf.mxu0  ;;  %v1156_v50 = vpop.f32.mrf.mxu2 }
 0x182   : > { %v6879_v51 = vpack.c.bf16 %v1216_v48, %v1215_v46  ;;  %v723_v52 = vadd.f32 %v6525_v33, %v722_v49  ;;  %v871_v60 = vmax.f32 %v806_v54, 0.0  ;;  %v1157_v62 = vadd.f32 %v6749_v53, %v1156_v50  ;;  %2878 = vmatpush.bf16.msra.mxu1 %v6920_v40  ;;  %v6269_v49 = vld [vmem:[%s8056_s2] ss:$0 sm:$0xff] }
 0x184   : > { %v838_v56 = vmax.f32 %v723_v52, 0.0  ;;  %1903 = vmatmul.bf16.gmra.mxu3 %v6879_v51  ;;  %2071 = vmatmul.bf16.gmra.mxu0 %v6879_v51  ;;  %v903_v2 = vpack.c.bf16 %v871_v60, %v871_v60  ;;  %v1249_v6 = vmax.f32 %v1157_v62, 0.0 }
 0x185   : > { %v1076_v57 = vpop.f32.mrf.mxu1 }
 0x186   : > { %v886_v58 = vpack.c.bf16 %v838_v56, %v837_v55  ;;  %v1077_v7 = vadd.f32 %v6749_v53, %v1076_v57 }
 0x187   : > { %v807_v61 = vpop.f32.mrf.mxu3 }
 0x188   : > { %5819 = vmatmul.msk.bf16.gmra.mxu1 %vm940_vm1, %v886_v58  ;;  %v1217_v16 = vmax.f32 %v1077_v7, 0.0 }
 0x189   : > { %v725_v0 = vpop.f32.mrf.mxu0  ;;  %v1158_v1 = vpop.f32.mrf.mxu2 }
 0x18a   : > { %v1159_v5 = vadd.f32 %v6749_v53, %v1158_v1  ;;  %v726_v17 = vadd.f32 %v6525_v33, %v725_v0 }
 0x18c   : > { %v1250_v8 = vmax.f32 %v1159_v5, 0.0  ;;  %v839_v23 = vmax.f32 %v726_v17, 0.0 }
 0x18d   : > { %v1078_v10 = vpop.f32.mrf.mxu1 }
 0x18e   : > { %v6889_v11 = vpack.c.bf16 %v1250_v8, %v1249_v6  ;;  %v1079_v12 = vadd.f32 %v6749_v53, %v1078_v10  ;;  %5836 = vmatmul.msk.bf16.gmra.mxu2 %vm940_vm1, %v903_v2 }
 0x190   : > { %v1218_v18 = vmax.f32 %v1079_v12, 0.0 }
 0x191   : > { %v727_v19 = vpop.f32.mrf.mxu0  ;;  %v1161_v20 = vpop.f32.mrf.mxu2 }
 0x192   : > { %v6900_v21 = vpack.c.bf16 %v1218_v18, %v1217_v16  ;;  %v728_v22 = vadd.f32 %v6525_v33, %v727_v19  ;;  %v1162_v33 = vadd.f32 %v6749_v53, %v1161_v20  ;;  %v6946_v16 = vld [vmem:[%s8060_s6] sm:$0xff] }
 0x193   : > { %v6951_v19 = vperm.slane %v6946_v16, 2 }
 0x194   : > { %v840_v24 = vmax.f32 %v728_v22, 0.0  ;;  %1908 = vmatmul.bf16.gmra.mxu3 %v6900_v21  ;;  %2076 = vmatmul.bf16.gmra.mxu0 %v6900_v21  ;;  %v1251_v42 = vmax.f32 %v1162_v33, 0.0 }
 0x195   : > { %v1081_v27 = vpop.f32.mrf.mxu1 }
 0x196   : > { %v887_v30 = vpack.c.bf16 %v840_v24, %v839_v23  ;;  %v1082_v43 = vadd.f32 %v6749_v53, %v1081_v27  ;;  %v6959_v27 = vperm.slane %v6946_v16, 1 }
 0x198   : > { %5820 = vmatmul.msk.bf16.gmra.mxu1 %vm940_vm1, %v887_v30  ;;  %v1219_v48 = vmax.f32 %v1082_v43, 0.0 }
 0x199   : > { %v730_v32 = vpop.f32.mrf.mxu0  ;;  %v1163_v34 = vpop.f32.mrf.mxu2 }
 0x19a   : > { %v1164_v35 = vadd.f32 %v6749_v53, %v1163_v34  ;;  %v731_v50 = vadd.f32 %v6269_v49, %v730_v32 }
 0x19c   : > { %v1252_v44 = vmax.f32 %v1164_v35, 0.0  ;;  %v841_v58 = vmax.f32 %v731_v50, 0.0 }
 0x19d   : > { %v1083_v45 = vpop.f32.mrf.mxu1 }
 0x19e   : > { %v6924_v46 = vpack.c.bf16 %v1252_v44, %v1251_v42  ;;  %v1084_v47 = vadd.f32 %v6749_v53, %v1083_v45  ;;  %1710 = vmatmul.bf16.vlgmr.msrb.gmra.mxu2 %v6757_v3 }
 0x1a0   : > { %v1220_v52 = vmax.f32 %v1084_v47, 0.0  ;;  %v6183_v47 = vld [vmem:[%s8059_s5 + $0x194] sm:$0xf] }
 0x1a1   : > { %v732_v54 = vpop.f32.mrf.mxu0  ;;  %v1166_v55 = vpop.f32.mrf.mxu2 }
 0x1a2   : > { %v6931_v56 = vpack.c.bf16 %v1220_v52, %v1219_v48  ;;  %v733_v57 = vadd.f32 %v6269_v49, %v732_v54  ;;  %v1167_v0 = vadd.f32 %v6749_v53, %v1166_v55  ;;  %v6049_v48 = vld [vmem:[%s8059_s5 + $0x1b0] sm:$0xf0] }
 0x1a3   : > { %v6052_v50 = vor.u32 %v6183_v47, %v6049_v48 }
 0x1a4   : > { %v842_v60 = vmax.f32 %v733_v57, 0.0  ;;  %1913 = vmatmul.bf16.gmra.mxu3 %v6931_v56  ;;  %2081 = vmatmul.bf16.gmra.mxu0 %v6931_v56  ;;  %v1253_v5 = vmax.f32 %v1167_v0, 0.0 }
 0x1a5   : > { %v1086_v61 = vpop.f32.mrf.mxu1  ;;  %2543 = vmatpush.bf16.msra.mxu3 %v6052_v50 }
 0x1a6   : > { %v888_v62 = vpack.c.bf16 %v842_v60, %v841_v58  ;;  %v1087_v6 = vadd.f32 %v6749_v53, %v1086_v61 }
 0x1a8   : > { %5821 = vmatmul.msk.bf16.gmra.mxu1 %vm940_vm1, %v888_v62  ;;  %v1221_v13 = vmax.f32 %v1087_v6, 0.0 }
 0x1a9   : > { %v1168_v1 = vpop.f32.mrf.mxu2 }
 0x1aa   : > { %v1169_v2 = vadd.f32 %v6749_v53, %v1168_v1 }
 0x1ac   : > { %v1254_v7 = vmax.f32 %v1169_v2, 0.0 }
 0x1ad   : > { %v1088_v8 = vpop.f32.mrf.mxu1 }
 0x1ae   : > { %v6939_v10 = vpack.c.bf16 %v1254_v7, %v1253_v5  ;;  %v1089_v12 = vadd.f32 %v6749_v53, %v1088_v8  ;;  %1715 = vmatmul.bf16.gmra.mxu2 %v6785_v38 }
 0x1b0   : > { %v1222_v14 = vmax.f32 %v1089_v12, 0.0 }
 0x1b1   : > { %v1171_v15 = vpop.f32.mrf.mxu2  ;;  %v2047_v17 = vpop.f32.mrf.mxu0 }
 0x1b2   : > { %v6948_v18 = vpack.c.bf16 %v1222_v14, %v1221_v13  ;;  %v1172_v22 = vadd.f32 %v6749_v53, %v1171_v15  ;;  %v2048_v24 = vadd.f32 %v2047_v17, %v6951_v19 }
 0x1b4   : > { %1918 = vmatmul.bf16.gmra.mxu3 %v6948_v18  ;;  %2086 = vmatmul.bf16.gmra.mxu0 %v6948_v18  ;;  %v1255_v33 = vmax.f32 %v1172_v22, 0.0  ;;  %v3048_v32 = vmax.f32 %v2048_v24, 0.0 }
 0x1b5   : > { %v1091_v20 = vpop.f32.mrf.mxu1 }
 0x1b6   : > { %v1092_v34 = vadd.f32 %v6749_v53, %v1091_v20 }
 0x1b7   : > { %v1879_v23 = vpop.f32.mrf.mxu3 }
 0x1b8   : > { %2214 = vmatmul.bf16.vlgmr.msrb.gmra.mxu1 %v6757_v3  ;;  %v1880_v42 = vadd.f32 %v1879_v23, %v6959_v27  ;;  %v1223_v52 = vmax.f32 %v1092_v34, 0.0  ;;  %v6047_v34 = vld [vmem:[%s8059_s5 + $0x190] sm:$0xf] }
 0x1b9   : > { %v1173_v25 = vpop.f32.mrf.mxu2  ;;  %v2049_v26 = vpop.f32.mrf.mxu0 }
 0x1ba   : > { %v1174_v28 = vadd.f32 %v6749_v53, %v1173_v25  ;;  %v2050_v30 = vadd.f32 %v2049_v26, %v6951_v19  ;;  %v3047_v60 = vmax.f32 %v1880_v42, 0.0 }
 0x1bc   : > { %v1256_v35 = vmax.f32 %v1174_v28, 0.0  ;;  %v3056_v36 = vmax.f32 %v2050_v30, 0.0 }
 0x1bd   : > { %v1093_v37 = vpop.f32.mrf.mxu1 }
 0x1be   : > { %v6965_v43 = vpack.c.bf16 %v1256_v35, %v1255_v33  ;;  %v4511_v44 = vmax.f32 %v3048_v32, %v3056_v36  ;;  %v1094_v45 = vadd.f32 %v6749_v53, %v1093_v37  ;;  %1720 = vmatmul.bf16.gmra.mxu2 %v6801_v4  ;;  %v6187_v35 = vld [vmem:[%s8059_s5 + $0x1ac] sm:$0xf0] }
 0x1bf   : > { %v1881_v49 = vpop.f32.mrf.mxu3  ;;  %v6048_v37 = vor.u32 %v6187_v35, %v6047_v34 }
 0x1c0   : > { %v1224_v54 = vmax.f32 %v1094_v45, 0.0  ;;  %v1882_v55 = vadd.f32 %v1881_v49, %v6959_v27 }
 0x1c1   : > { %v1176_v57 = vpop.f32.mrf.mxu2  ;;  %v2052_v58 = vpop.f32.mrf.mxu0  ;;  %2375 = vmatpush.bf16.msra.mxu2 %v6048_v37 }
 0x1c2   : > { %v6976_v61 = vpack.c.bf16 %v1224_v54, %v1223_v52  ;;  %v3055_v62 = vmax.f32 %v1882_v55, 0.0  ;;  %v2053_v0 = vadd.f32 %v2052_v58, %v6951_v19  ;;  %v1177_v7 = vadd.f32 %v6749_v53, %v1176_v57 }
 0x1c4   : > { %v4443_v1 = vmax.f32 %v3047_v60, %v3055_v62  ;;  %v3064_v2 = vmax.f32 %v2053_v0, 0.0  ;;  %1923 = vmatmul.bf16.gmra.mxu3 %v6976_v61  ;;  %2091 = vmatmul.bf16.gmra.mxu0 %v6976_v61  ;;  %v1257_v22 = vmax.f32 %v1177_v7, 0.0  ;;  %v6055_v60 = vld [vmem:[%s8059_s5 + $0x198] sm:$0xf] }
 0x1c5   : > { %v1096_v5 = vpop.f32.mrf.mxu1  ;;  %v6188_v62 = vld [vmem:[%s8059_s5 + $0x1b4] sm:$0xf0] }
 0x1c6   : > { %v4512_v6 = vmax.f32 %v4511_v44, %v3064_v2  ;;  %v1097_v23 = vadd.f32 %v6749_v53, %v1096_v5  ;;  %v6056_v2 = vor.u32 %v6188_v62, %v6055_v60 }
 0x1c7   : > { %v1884_v8 = vpop.f32.mrf.mxu3 }
 0x1c8   : > { %v1885_v12 = vadd.f32 %v1884_v8, %v6959_v27  ;;  %2219 = vmatmul.bf16.gmra.mxu1 %v6785_v38  ;;  %v1225_v42 = vmax.f32 %v1097_v23, 0.0  ;;  %2711 = vmatpush.bf16.msra.mxu0 %v6056_v2  ;;  %v6184_v23 = vld [vmem:[%s8059_s5 + $0x19c] sm:$0xf] }
 0x1c9   : > { %v1178_v13 = vpop.f32.mrf.mxu2  ;;  %v2054_v14 = vpop.f32.mrf.mxu0 }
 0x1ca   : > { %v3063_v15 = vmax.f32 %v1885_v12, 0.0  ;;  %v1179_v17 = vadd.f32 %v6749_v53, %v1178_v13  ;;  %v2055_v20 = vadd.f32 %v2054_v14, %v6951_v19 }
 0x1cc   : > { %v4444_v24 = vmax.f32 %v4443_v1, %v3063_v15  ;;  %v1258_v25 = vmax.f32 %v1179_v17, 0.0  ;;  %v3072_v26 = vmax.f32 %v2055_v20, 0.0 }
 0x1cd   : > { %v1098_v28 = vpop.f32.mrf.mxu1 }
 0x1ce   : > { %v6987_v30 = vpack.c.bf16 %v1258_v25, %v1257_v22  ;;  %v4513_v33 = vmax.f32 %v4512_v6, %v3072_v26  ;;  %v1099_v32 = vadd.f32 %v6749_v53, %v1098_v28  ;;  %1725 = vmatmul.bf16.gmra.mxu2 %v6829_v41 }
 0x1cf   : > { %v1886_v36 = vpop.f32.mrf.mxu3 }
 0x1d0   : > { %v1226_v44 = vmax.f32 %v1099_v32, 0.0  ;;  %v1887_v45 = vadd.f32 %v1886_v36, %v6959_v27 }
 0x1d1   : > { %v1181_v47 = vpop.f32.mrf.mxu2  ;;  %v2057_v48 = vpop.f32.mrf.mxu0 }
 0x1d2   : > { %v6998_v49 = vpack.c.bf16 %v1226_v44, %v1225_v42  ;;  %v3071_v50 = vmax.f32 %v1887_v45, 0.0  ;;  %v2058_v52 = vadd.f32 %v2057_v48, %v6951_v19  ;;  %v1182_v0 = vadd.f32 %v6749_v53, %v1181_v47 }
 0x1d4   : > { %v4445_v54 = vmax.f32 %v4444_v24, %v3071_v50  ;;  %v3080_v55 = vmax.f32 %v2058_v52, 0.0  ;;  %1928 = vmatmul.bf16.gmra.mxu3 %v6998_v49  ;;  %2096 = vmatmul.bf16.gmra.mxu0 %v6998_v49  ;;  %v1259_v14 = vmax.f32 %v1182_v0, 0.0  ;;  %v6057_v24 = vld [vmem:[%s8059_s5 + $0x1b8] sm:$0xf0] }
 0x1d5   : > { %v1101_v57 = vpop.f32.mrf.mxu1  ;;  %v7021_v26 = vor.u32 %v6184_v23, %v6057_v24 }
 0x1d6   : > { %v4514_v58 = vmax.f32 %v4513_v33, %v3080_v55  ;;  %v1102_v15 = vadd.f32 %v6749_v53, %v1101_v57 }
 0x1d7   : > { %v1889_v1 = vpop.f32.mrf.mxu3  ;;  %2879 = vmatpush.bf16.msra.mxu1 %v7021_v26 }
 0x1d8   : > { %v1890_v5 = vadd.f32 %v1889_v1, %v6959_v27  ;;  %2224 = vmatmul.bf16.gmra.mxu1 %v6801_v4  ;;  %v1227_v35 = vmax.f32 %v1102_v15, 0.0 }
 0x1d9   : > { %v1183_v6 = vpop.f32.mrf.mxu2  ;;  %v2059_v7 = vpop.f32.mrf.mxu0 }
 0x1da   : > { %v3079_v8 = vmax.f32 %v1890_v5, 0.0  ;;  %v1184_v12 = vadd.f32 %v6749_v53, %v1183_v6  ;;  %v2060_v13 = vadd.f32 %v2059_v7, %v6951_v19 }
 0x1dc   : > { %v4446_v17 = vmax.f32 %v4445_v54, %v3079_v8  ;;  %v1260_v20 = vmax.f32 %v1184_v12, 0.0  ;;  %v3088_v22 = vmax.f32 %v2060_v13, 0.0 }
 0x1dd   : > { %v1103_v25 = vpop.f32.mrf.mxu1 }
 0x1de   : > { %v7023_v28 = vpack.c.bf16 %v1260_v20, %v1259_v14  ;;  %v4515_v33 = vmax.f32 %v4514_v58, %v3088_v22  ;;  %v1104_v32 = vadd.f32 %v6749_v53, %v1103_v25  ;;  %1730 = vmatmul.bf16.gmra.mxu2 %v6845_v9 }
 0x1df   : > { %v1891_v34 = vpop.f32.mrf.mxu3 }
 0x1e0   : > { %v1228_v36 = vmax.f32 %v1104_v32, 0.0  ;;  %v1892_v37 = vadd.f32 %v1891_v34, %v6959_v27 }
 0x1e1   : > { %v1186_v42 = vpop.f32.mrf.mxu2  ;;  %v2062_v44 = vpop.f32.mrf.mxu0 }
 0x1e2   : > { %v7029_v45 = vpack.c.bf16 %v1228_v36, %v1227_v35  ;;  %v3087_v47 = vmax.f32 %v1892_v37, 0.0  ;;  %v2063_v48 = vadd.f32 %v2062_v44, %v6951_v19  ;;  %v1187_v57 = vadd.f32 %v6749_v53, %v1186_v42 }
 0x1e4   : > { %v4447_v50 = vmax.f32 %v4446_v17, %v3087_v47  ;;  %v3096_v52 = vmax.f32 %v2063_v48, 0.0  ;;  %1933 = vmatmul.bf16.gmra.mxu3 %v7029_v45  ;;  %2101 = vmatmul.bf16.gmra.mxu0 %v7029_v45  ;;  %v1261_v6 = vmax.f32 %v1187_v57, 0.0 }
 0x1e5   : > { %v1106_v54 = vpop.f32.mrf.mxu1 }
 0x1e6   : > { %v4516_v55 = vmax.f32 %v4515_v33, %v3096_v52  ;;  %v1107_v7 = vadd.f32 %v6749_v53, %v1106_v54 }
 0x1e7   : > { %v1894_v58 = vpop.f32.mrf.mxu3 }
 0x1e8   : > { %v1895_v60 = vadd.f32 %v1894_v58, %v6959_v27  ;;  %2229 = vmatmul.bf16.gmra.mxu1 %v6829_v41  ;;  %v1229_v23 = vmax.f32 %v1107_v7, 0.0 }
 0x1e9   : > { %v1188_v62 = vpop.f32.mrf.mxu2  ;;  %v2064_v0 = vpop.f32.mrf.mxu0 }
 0x1ea   : > { %v3095_v1 = vmax.f32 %v1895_v60, 0.0  ;;  %v1189_v2 = vadd.f32 %v6749_v53, %v1188_v62  ;;  %v2065_v5 = vadd.f32 %v2064_v0, %v6951_v19 }
 0x1ec   : > { %v4448_v8 = vmax.f32 %v4447_v50, %v3095_v1  ;;  %v1262_v12 = vmax.f32 %v1189_v2, 0.0  ;;  %v3104_v13 = vmax.f32 %v2065_v5, 0.0 }
 0x1ed   : > { %v1108_v14 = vpop.f32.mrf.mxu1 }
 0x1ee   : > { %v7040_v15 = vpack.c.bf16 %v1262_v12, %v1261_v6  ;;  %v4517_v17 = vmax.f32 %v4516_v55, %v3104_v13  ;;  %v1109_v20 = vadd.f32 %v6749_v53, %v1108_v14  ;;  %1735 = vmatmul.bf16.gmra.mxu2 %v6879_v51  ;;  %v6175_v13 = vld [vmem:[%s8059_s5 + $0x154] sm:$0xf] }
 0x1ef   : > { %v1896_v22 = vpop.f32.mrf.mxu3  ;;  %v6017_v14 = vld [vmem:[%s8059_s5 + $0x170] sm:$0xf0] }
 0x1f0   : > { %v1230_v24 = vmax.f32 %v1109_v20, 0.0  ;;  %v1897_v25 = vadd.f32 %v1896_v22, %v6959_v27  ;;  %v6020_v20 = vor.u32 %v6175_v13, %v6017_v14  ;;  %v6015_v14 = vld [vmem:[%s8059_s5 + $0x150] sm:$0xf] }
 0x1f1   : > { %v1191_v33 = vpop.f32.mrf.mxu2  ;;  %v2067_v32 = vpop.f32.mrf.mxu0 }
 0x1f2   : > { %v7045_v34 = vpack.c.bf16 %v1230_v24, %v1229_v23  ;;  %v3103_v35 = vmax.f32 %v1897_v25, 0.0  ;;  %v2068_v36 = vadd.f32 %v2067_v32, %v6951_v19  ;;  %v1192_v48 = vadd.f32 %v6749_v53, %v1191_v33  ;;  %2544 = vmatpush.bf16.msra.mxu3 %v6020_v20 }
 0x1f4   : > { %v4449_v37 = vmax.f32 %v4448_v8, %v3103_v35  ;;  %v3112_v42 = vmax.f32 %v2068_v36, 0.0  ;;  %1938 = vmatmul.bf16.gmra.mxu3 %v7045_v34  ;;  %2106 = vmatmul.bf16.gmra.mxu0 %v7045_v34  ;;  %v1263_v62 = vmax.f32 %v1192_v48, 0.0 }
 0x1f5   : > { %v1111_v44 = vpop.f32.mrf.mxu1 }
 0x1f6   : > { %v4518_v47 = vmax.f32 %v4517_v17, %v3112_v42  ;;  %v1112_v0 = vadd.f32 %v6749_v53, %v1111_v44 }
 0x1f7   : > { %v1899_v50 = vpop.f32.mrf.mxu3 }
 0x1f8   : > { %v1900_v52 = vadd.f32 %v1899_v50, %v6959_v27  ;;  %2234 = vmatmul.bf16.gmra.mxu1 %v6845_v9  ;;  %v1231_v22 = vmax.f32 %v1112_v0, 0.0 }
 0x1f9   : > { %v1193_v54 = vpop.f32.mrf.mxu2  ;;  %v2069_v55 = vpop.f32.mrf.mxu0 }
 0x1fa   : > { %v3111_v57 = vmax.f32 %v1900_v52, 0.0  ;;  %v1194_v58 = vadd.f32 %v6749_v53, %v1193_v54  ;;  %v2070_v60 = vadd.f32 %v2069_v55, %v6951_v19 }
 0x1fc   : > { %v4450_v1 = vmax.f32 %v4449_v37, %v3111_v57  ;;  %v1264_v2 = vmax.f32 %v1194_v58, 0.0  ;;  %v3120_v5 = vmax.f32 %v2070_v60, 0.0 }
 0x1fd   : > { %v1113_v6 = vpop.f32.mrf.mxu1 }
 0x1fe   : > { %v7056_v7 = vpack.c.bf16 %v1264_v2, %v1263_v62  ;;  %v4519_v8 = vmax.f32 %v4518_v47, %v3120_v5  ;;  %v1114_v12 = vadd.f32 %v6749_v53, %v1113_v6  ;;  %1740 = vmatmul.bf16.gmra.mxu2 %v6900_v21 }
 0x1ff   : > { %v1901_v17 = vpop.f32.mrf.mxu3 }
 0x200   : > { %v1232_v23 = vmax.f32 %v1114_v12, 0.0  ;;  %v1902_v24 = vadd.f32 %v1901_v17, %v6959_v27  ;;  %v6179_v17 = vld [vmem:[%s8059_s5 + $0x16c] sm:$0xf0] }
 0x201   : > { %v1196_v25 = vpop.f32.mrf.mxu2  ;;  %v2072_v33 = vpop.f32.mrf.mxu0 }
 0x202   : > { %v7067_v32 = vpack.c.bf16 %v1232_v23, %v1231_v22  ;;  %v3119_v35 = vmax.f32 %v1902_v24, 0.0  ;;  %v2073_v36 = vadd.f32 %v2072_v33, %v6951_v19  ;;  %v1197_v48 = vadd.f32 %v6749_v53, %v1196_v25 }
 0x203   : > { %v6016_v22 = vor.u32 %v6179_v17, %v6015_v14 }
 0x204   : > { %v4451_v37 = vmax.f32 %v4450_v1, %v3119_v35  ;;  %v3128_v42 = vmax.f32 %v2073_v36, 0.0  ;;  %1943 = vmatmul.bf16.gmra.mxu3 %v7067_v32  ;;  %2111 = vmatmul.bf16.gmra.mxu0 %v7067_v32  ;;  %v1265_v62 = vmax.f32 %v1197_v48, 0.0 }
 0x205   : > { %v1116_v44 = vpop.f32.mrf.mxu1  ;;  %2376 = vmatpush.bf16.msra.mxu2 %v6016_v22 }
 0x206   : > { %v4520_v47 = vmax.f32 %v4519_v8, %v3128_v42  ;;  %v1117_v0 = vadd.f32 %v6749_v53, %v1116_v44 }
 0x207   : > { %v1904_v50 = vpop.f32.mrf.mxu3 }
 0x208   : > { %v1905_v52 = vadd.f32 %v1904_v50, %v6959_v27  ;;  %2239 = vmatmul.bf16.gmra.mxu1 %v6879_v51  ;;  %v1233_v23 = vmax.f32 %v1117_v0, 0.0  ;;  %v6023_v50 = vld [vmem:[%s8059_s5 + $0x158] sm:$0xf] }
 0x209   : > { %v1198_v54 = vpop.f32.mrf.mxu2  ;;  %v2074_v55 = vpop.f32.mrf.mxu0 }
 0x20a   : > { %v3127_v57 = vmax.f32 %v1905_v52, 0.0  ;;  %v1199_v58 = vadd.f32 %v6749_v53, %v1198_v54  ;;  %v2075_v60 = vadd.f32 %v2074_v55, %v6951_v19  ;;  %v6180_v52 = vld [vmem:[%s8059_s5 + $0x174] sm:$0xf0] }
 0x20b   : > { %v6024_v55 = vor.u32 %v6180_v52, %v6023_v50  ;;  %v7123_v50 = vperm.slane %v6946_v16, 0 }
 0x20c   : > { %v4452_v1 = vmax.f32 %v4451_v37, %v3127_v57  ;;  %v1266_v2 = vmax.f32 %v1199_v58, 0.0  ;;  %v3136_v5 = vmax.f32 %v2075_v60, 0.0 }
 0x20d   : > { %v1118_v6 = vpop.f32.mrf.mxu1  ;;  %2712 = vmatpush.bf16.msra.mxu0 %v6024_v55 }
 0x20e   : > { %v7078_v8 = vpack.c.bf16 %v1266_v2, %v1265_v62  ;;  %v4521_v12 = vmax.f32 %v4520_v47, %v3136_v5  ;;  %v1119_v13 = vadd.f32 %v6749_v53, %v1118_v6  ;;  %1745 = vmatmul.bf16.gmra.mxu2 %v6931_v56 }
 0x20f   : > { %v1906_v20 = vpop.f32.mrf.mxu3 }
 0x210   : > { %v1234_v24 = vmax.f32 %v1119_v13, 0.0  ;;  %v1907_v25 = vadd.f32 %v1906_v20, %v6959_v27  ;;  %v6025_v13 = vld [vmem:[%s8059_s5 + $0x178] sm:$0xf0] }
 0x211   : > { %v7089_v33 = vpop.f32.mrf.mxu2  ;;  %v2077_v35 = vpop.f32.mrf.mxu0 }
 0x212   : > { %v7091_v53 = vpack.c.bf16 %v1234_v24, %v1233_v23  ;;  %v3135_v36 = vmax.f32 %v1907_v25, 0.0  ;;  %v2078_v37 = vadd.f32 %v2077_v35, %v6951_v19 }
 0x214   : > { %v4453_v42 = vmax.f32 %v4452_v1, %v3135_v36  ;;  %v3144_v44 = vmax.f32 %v2078_v37, 0.0  ;;  %1948 = vmatmul.bf16.gmra.mxu3 %v7091_v53  ;;  %2116 = vmatmul.bf16.gmra.mxu0 %v7091_v53  ;;  %v6270_v1 = vld [vmem:[%s8058_s4] ss:$0 sm:$0xff] }
 0x215   : > { %v1121_v47 = vpop.f32.mrf.mxu1 }
 0x216   : > { %v4522_v48 = vmax.f32 %v4521_v12, %v3144_v44  ;;  %v1122_v2 = vadd.f32 %v6270_v1, %v1121_v47  ;;  %v6176_v12 = vld [vmem:[%s8059_s5 + $0x15c] sm:$0xf] }
 0x217   : > { %v1909_v54 = vpop.f32.mrf.mxu3  ;;  %v7114_v17 = vor.u32 %v6176_v12, %v6025_v13 }
 0x218   : > { %v1910_v57 = vadd.f32 %v1909_v54, %v6959_v27  ;;  %2244 = vmatmul.bf16.gmra.mxu1 %v6900_v21  ;;  %v1235_v24 = vmax.f32 %v1122_v2, 0.0 }
 0x219   : > { %v1203_v58 = vpop.f32.mrf.mxu2  ;;  %v2079_v60 = vpop.f32.mrf.mxu0  ;;  %2880 = vmatpush.bf16.msra.mxu1 %v7114_v17 }
 0x21a   : > { %v3143_v62 = vmax.f32 %v1910_v57, 0.0  ;;  %v2080_v0 = vadd.f32 %v2079_v60, %v6951_v19 }
 0x21c   : > { %v4454_v5 = vmax.f32 %v4453_v42, %v3143_v62  ;;  %v3152_v6 = vmax.f32 %v2080_v0, 0.0 }
 0x21d   : > { %v1123_v14 = vpop.f32.mrf.mxu1 }
 0x21e   : > { %v4523_v20 = vmax.f32 %v4522_v48, %v3152_v6  ;;  %v1124_v22 = vadd.f32 %v6270_v1, %v1123_v14  ;;  %1750 = vmatmul.bf16.gmra.mxu2 %v6948_v18 }
 0x21f   : > { %v1911_v23 = vpop.f32.mrf.mxu3 }
 0x220   : > { %v1236_v25 = vmax.f32 %v1124_v22, 0.0  ;;  %v1912_v35 = vadd.f32 %v1911_v23, %v6959_v27 }
 0x221   : > { %v1711_v36 = vpop.f32.mrf.mxu2  ;;  %v2082_v37 = vpop.f32.mrf.mxu0 }
 0x222   : > { %v7119_v42 = vpack.c.bf16 %v1236_v25, %v1235_v24  ;;  %v3151_v44 = vmax.f32 %v1912_v35, 0.0  ;;  %v2083_v47 = vadd.f32 %v2082_v37, %v6951_v19  ;;  %v1712_v57 = vadd.f32 %v1711_v36, %v7123_v50 }
 0x224   : > { %v4455_v48 = vmax.f32 %v4454_v5, %v3151_v44  ;;  %v3160_v52 = vmax.f32 %v2083_v47, 0.0  ;;  %1953 = vmatmul.bf16.gmra.mxu3 %v7119_v42  ;;  %2121 = vmatmul.bf16.gmra.mxu0 %v7119_v42  ;;  %v3046_v12 = vmax.f32 %v1712_v57, 0.0 }
 0x225   : > { %v1126_v54 = vpop.f32.mrf.mxu1 }
 0x226   : > { %v4524_v55 = vmax.f32 %v4523_v20, %v3160_v52  ;;  %v1127_v13 = vadd.f32 %v6270_v1, %v1126_v54 }
 0x227   : > { %v1914_v58 = vpop.f32.mrf.mxu3 }
 0x228   : > { %v1915_v60 = vadd.f32 %v1914_v58, %v6959_v27  ;;  %2249 = vmatmul.bf16.gmra.mxu1 %v6931_v56  ;;  %v1237_v37 = vmax.f32 %v1127_v13, 0.0 }
 0x229   : > { %v1713_v62 = vpop.f32.mrf.mxu2  ;;  %v2084_v0 = vpop.f32.mrf.mxu0 }
 0x22a   : > { %v3159_v2 = vmax.f32 %v1915_v60, 0.0  ;;  %v1714_v6 = vadd.f32 %v1713_v62, %v7123_v50  ;;  %v2085_v5 = vadd.f32 %v2084_v0, %v6951_v19 }
 0x22c   : > { %v4456_v14 = vmax.f32 %v4455_v48, %v3159_v2  ;;  %v3054_v22 = vmax.f32 %v1714_v6, 0.0  ;;  %v3168_v23 = vmax.f32 %v2085_v5, 0.0 }
 0x22d   : > { %v1128_v20 = vpop.f32.mrf.mxu1 }
 0x22e   : > { %v4375_v24 = vmax.f32 %v3046_v12, %v3054_v22  ;;  %v4525_v25 = vmax.f32 %v4524_v55, %v3168_v23  ;;  %v1129_v35 = vadd.f32 %v6270_v1, %v1128_v20  ;;  %1755 = vmatmul.bf16.gmra.mxu2 %v6976_v61  ;;  %v7141_v12 = vperm.slane %v6946_v16, 3 }
 0x22f   : > { %v1916_v36 = vpop.f32.mrf.mxu3 }
 0x230   : > { %v1238_v44 = vmax.f32 %v1129_v35, 0.0  ;;  %v1917_v47 = vadd.f32 %v1916_v36, %v6959_v27 }
 0x231   : > { %v1716_v52 = vpop.f32.mrf.mxu2  ;;  %v2087_v58 = vpop.f32.mrf.mxu0 }
 0x232   : > { %v7134_v60 = vpack.c.bf16 %v1238_v44, %v1237_v37  ;;  %v3167_v57 = vmax.f32 %v1917_v47, 0.0  ;;  %v1717_v48 = vadd.f32 %v1716_v52, %v7123_v50  ;;  %v2088_v54 = vadd.f32 %v2087_v58, %v6951_v19  ;;  %v6167_v58 = vld [vmem:[%s8059_s5 + $0x114] sm:$0xf] }
 0x234   : > { %v4457_v62 = vmax.f32 %v4456_v14, %v3167_v57  ;;  %v3062_v0 = vmax.f32 %v1717_v48, 0.0  ;;  %v3176_v55 = vmax.f32 %v2088_v54, 0.0  ;;  %1958 = vmatmul.bf16.gmra.mxu3 %v7134_v60  ;;  %2126 = vmatmul.bf16.gmra.mxu0 %v7134_v60  ;;  %v5985_v57 = vld [vmem:[%s8059_s5 + $0x130] sm:$0xf0] }
 0x235   : > { %v2215_v1 = vpop.f32.mrf.mxu1  ;;  %v5988_v54 = vor.u32 %v6167_v58, %v5985_v57 }
 0x236   : > { %v4376_v2 = vmax.f32 %v4375_v24, %v3062_v0  ;;  %v4526_v6 = vmax.f32 %v4525_v25, %v3176_v55  ;;  %v2216_v36 = vadd.f32 %v2215_v1, %v7141_v12 }
 0x237   : > { %v1919_v5 = vpop.f32.mrf.mxu3  ;;  %2545 = vmatpush.bf16.msra.mxu3 %v5988_v54 }
 0x238   : > { %v1920_v13 = vadd.f32 %v1919_v5, %v6959_v27  ;;  %2254 = vmatmul.bf16.gmra.mxu1 %v6948_v18 }
 0x239   : > { %v1718_v22 = vpop.f32.mrf.mxu2  ;;  %v2089_v23 = vpop.f32.mrf.mxu0 }
 0x23a   : > { %v3175_v14 = vmax.f32 %v1920_v13, 0.0  ;;  %v1719_v20 = vadd.f32 %v1718_v22, %v7123_v50  ;;  %v2090_v35 = vadd.f32 %v2089_v23, %v6951_v19 }
 0x23c   : > { %v4458_v37 = vmax.f32 %v4457_v62, %v3175_v14  ;;  %v3070_v24 = vmax.f32 %v1719_v20, 0.0  ;;  %v3184_v25 = vmax.f32 %v2090_v35, 0.0  ;;  %v3049_v62 = vmax.f32 %v2216_v36, 0.0 }
 0x23d   : > { %v2217_v44 = vpop.f32.mrf.mxu1 }
 0x23e   : > { %v4377_v47 = vmax.f32 %v4376_v2, %v3070_v24  ;;  %v4527_v16 = vmax.f32 %v4526_v6, %v3184_v25  ;;  %v2218_v52 = vadd.f32 %v2217_v44, %v7141_v12  ;;  %1760 = vmatmul.bf16.gmra.mxu2 %v6998_v49 }
 0x23f   : > { %v1921_v48 = vpop.f32.mrf.mxu3 }
 0x240   : > { %v3057_v0 = vmax.f32 %v2218_v52, 0.0  ;;  %v1922_v55 = vadd.f32 %v1921_v48, %v6959_v27 }
 0x241   : > { %v1721_v1 = vpop.f32.mrf.mxu2  ;;  %v2092_v2 = vpop.f32.mrf.mxu0 }
 0x242   : > { %v4579_v6 = vmax.f32 %v3049_v62, %v3057_v0  ;;  %v3183_v5 = vmax.f32 %v1922_v55, 0.0  ;;  %v1722_v13 = vadd.f32 %v1721_v1, %v7123_v50  ;;  %v2093_v22 = vadd.f32 %v2092_v2, %v6951_v19 }
 0x244   : > { %v4459_v23 = vmax.f32 %v4458_v37, %v3183_v5  ;;  %v3078_v14 = vmax.f32 %v1722_v13, 0.0  ;;  %v3192_v20 = vmax.f32 %v2093_v22, 0.0  ;;  %1963 = vmatmul.bf16.gmra.mxu3 %v6780_v29  ;;  %2131 = vmatmul.bf16.gmra.mxu0 %v6780_v29  ;;  %v5983_v22 = vld [vmem:[%s8059_s5 + $0x110] sm:$0xf] }
 0x245   : > { %v2220_v35 = vpop.f32.mrf.mxu1 }
 0x246   : > { %v4378_v36 = vmax.f32 %v4377_v47, %v3078_v14  ;;  %v4528_v24 = vmax.f32 %v4527_v16, %v3192_v20  ;;  %v2221_v25 = vadd.f32 %v2220_v35, %v7141_v12 }
 0x247   : > { %v1924_v44 = vpop.f32.mrf.mxu3 }
 0x248   : > { %v3065_v52 = vmax.f32 %v2221_v25, 0.0  ;;  %v1925_v58 = vadd.f32 %v1924_v44, %v6959_v27  ;;  %2259 = vmatmul.bf16.gmra.mxu1 %v6976_v61 }
 0x249   : > { %v1723_v57 = vpop.f32.mrf.mxu2  ;;  %v2094_v48 = vpop.f32.mrf.mxu0 }
 0x24a   : > { %v4580_v37 = vmax.f32 %v4579_v6, %v3065_v52  ;;  %v3191_v54 = vmax.f32 %v1925_v58, 0.0  ;;  %v1724_v62 = vadd.f32 %v1723_v57, %v7123_v50  ;;  %v2095_v0 = vadd.f32 %v2094_v48, %v6951_v19  ;;  %v6171_v6 = vld [vmem:[%s8059_s5 + $0x12c] sm:$0xf0] }
 0x24b   : > { %v5984_v20 = vor.u32 %v6171_v6, %v5983_v22 }
 0x24c   : > { %v4460_v55 = vmax.f32 %v4459_v23, %v3191_v54  ;;  %v3086_v1 = vmax.f32 %v1724_v62, 0.0  ;;  %v3200_v47 = vmax.f32 %v2095_v0, 0.0 }
 0x24d   : > { %v2222_v16 = vpop.f32.mrf.mxu1  ;;  %2377 = vmatpush.bf16.msra.mxu2 %v5984_v20 }
 0x24e   : > { %v4379_v2 = vmax.f32 %v4378_v36, %v3086_v1  ;;  %v4529_v5 = vmax.f32 %v4528_v24, %v3200_v47  ;;  %v2223_v13 = vadd.f32 %v2222_v16, %v7141_v12  ;;  %1765 = vmatmul.bf16.gmra.mxu2 %v7029_v45  ;;  %v6172_v16 = vld [vmem:[%s8059_s5 + $0x134] sm:$0xf0] }
 0x24f   : > { %v1926_v14 = vpop.f32.mrf.mxu3 }
 0x250   : > { %v3073_v23 = vmax.f32 %v2223_v13, 0.0  ;;  %v1927_v35 = vadd.f32 %v1926_v14, %v6959_v27 }
 0x251   : > { %v1726_v25 = vpop.f32.mrf.mxu2  ;;  %v2097_v36 = vpop.f32.mrf.mxu0 }
 0x252   : > { %v4581_v24 = vmax.f32 %v4580_v37, %v3073_v23  ;;  %v3199_v44 = vmax.f32 %v1927_v35, 0.0  ;;  %v1727_v52 = vadd.f32 %v1726_v25, %v7123_v50  ;;  %v2098_v58 = vadd.f32 %v2097_v36, %v6951_v19  ;;  %v5991_v37 = vld [vmem:[%s8059_s5 + $0x118] sm:$0xf] }
 0x253   : > { %v5992_v13 = vor.u32 %v6172_v16, %v5991_v37 }
 0x254   : > { %v4461_v57 = vmax.f32 %v4460_v55, %v3199_v44  ;;  %v3094_v48 = vmax.f32 %v1727_v52, 0.0  ;;  %v3208_v54 = vmax.f32 %v2098_v58, 0.0  ;;  %1968 = vmatmul.bf16.gmra.mxu3 %v6796_v59  ;;  %2136 = vmatmul.bf16.gmra.mxu0 %v6796_v59  ;;  %v6168_v52 = vld [vmem:[%s8059_s5 + $0x11c] sm:$0xf] }
 0x255   : > { %v2225_v62 = vpop.f32.mrf.mxu1  ;;  %2713 = vmatpush.bf16.msra.mxu0 %v5992_v13  ;;  %v5993_v58 = vld [vmem:[%s8059_s5 + $0x138] sm:$0xf0] }
 0x256   : > { %v4380_v0 = vmax.f32 %v4379_v2, %v3094_v48  ;;  %v4530_v1 = vmax.f32 %v4529_v5, %v3208_v54  ;;  %v2226_v47 = vadd.f32 %v2225_v62, %v7141_v12  ;;  %v7196_v54 = vor.u32 %v6168_v52, %v5993_v58 }
 0x257   : > { %v1929_v55 = vpop.f32.mrf.mxu3 }
 0x258   : > { %v3081_v22 = vmax.f32 %v2226_v47, 0.0  ;;  %v1930_v6 = vadd.f32 %v1929_v55, %v6959_v27  ;;  %2264 = vmatmul.bf16.gmra.mxu1 %v6998_v49 }
 0x259   : > { %v1728_v14 = vpop.f32.mrf.mxu2  ;;  %v2099_v2 = vpop.f32.mrf.mxu0  ;;  %2881 = vmatpush.bf16.msra.mxu1 %v7196_v54 }
 0x25a   : > { %v4582_v5 = vmax.f32 %v4581_v24, %v3081_v22  ;;  %v3207_v20 = vmax.f32 %v1930_v6, 0.0  ;;  %v1729_v23 = vadd.f32 %v1728_v14, %v7123_v50  ;;  %v2100_v35 = vadd.f32 %v2099_v2, %v6951_v19 }
 0x25c   : > { %v4462_v25 = vmax.f32 %v4461_v57, %v3207_v20  ;;  %v3102_v36 = vmax.f32 %v1729_v23, 0.0  ;;  %v3216_v44 = vmax.f32 %v2100_v35, 0.0 }
 0x25d   : > { %v2227_v48 = vpop.f32.mrf.mxu1 }
 0x25e   : > { %v4381_v24 = vmax.f32 %v4380_v0, %v3102_v36  ;;  %v4531_v62 = vmax.f32 %v4530_v1, %v3216_v44  ;;  %v2228_v47 = vadd.f32 %v2227_v48, %v7141_v12  ;;  %1770 = vmatmul.bf16.gmra.mxu2 %v7045_v34 }
 0x25f   : > { %v1931_v57 = vpop.f32.mrf.mxu3 }
 0x260   : > { %v3089_v37 = vmax.f32 %v2228_v47, 0.0  ;;  %v1932_v16 = vadd.f32 %v1931_v57, %v6959_v27 }
 0x261   : > { %v1731_v55 = vpop.f32.mrf.mxu2  ;;  %v2102_v13 = vpop.f32.mrf.mxu0 }
 0x262   : > { %v4583_v22 = vmax.f32 %v4582_v5, %v3089_v37  ;;  %v3215_v6 = vmax.f32 %v1932_v16, 0.0  ;;  %v1732_v14 = vadd.f32 %v1731_v55, %v7123_v50  ;;  %v2103_v2 = vadd.f32 %v2102_v13, %v6951_v19 }
 0x264   : > { %v4463_v0 = vmax.f32 %v4462_v25, %v3215_v6  ;;  %v3110_v1 = vmax.f32 %v1732_v14, 0.0  ;;  %v3224_v20 = vmax.f32 %v2103_v2, 0.0  ;;  %1973 = vmatmul.bf16.gmra.mxu3 %v6824_v31  ;;  %2141 = vmatmul.bf16.gmra.mxu0 %v6824_v31 }
 0x265   : > { %v2230_v23 = vpop.f32.mrf.mxu1 }
 0x266   : > { %v4382_v35 = vmax.f32 %v4381_v24, %v3110_v1  ;;  %v4532_v36 = vmax.f32 %v4531_v62, %v3224_v20  ;;  %v2231_v44 = vadd.f32 %v2230_v23, %v7141_v12 }
 0x267   : > { %v1934_v52 = vpop.f32.mrf.mxu3 }
 0x268   : > { %v3097_v58 = vmax.f32 %v2231_v44, 0.0  ;;  %v1935_v5 = vadd.f32 %v1934_v52, %v6959_v27  ;;  %2269 = vmatmul.bf16.gmra.mxu1 %v7029_v45 }
 0x269   : > { %v1733_v48 = vpop.f32.mrf.mxu2  ;;  %v2104_v47 = vpop.f32.mrf.mxu0 }
 0x26a   : > { %v4584_v25 = vmax.f32 %v4583_v22, %v3097_v58  ;;  %v3223_v57 = vmax.f32 %v1935_v5, 0.0  ;;  %v1734_v37 = vadd.f32 %v1733_v48, %v7123_v50  ;;  %v2105_v16 = vadd.f32 %v2104_v47, %v6951_v19 }
 0x26c   : > { %v4464_v55 = vmax.f32 %v4463_v0, %v3223_v57  ;;  %v3118_v13 = vmax.f32 %v1734_v37, 0.0  ;;  %v3232_v24 = vmax.f32 %v2105_v16, 0.0 }
 0x26d   : > { %v2232_v62 = vpop.f32.mrf.mxu1 }
 0x26e   : > { %v4383_v6 = vmax.f32 %v4382_v35, %v3118_v13  ;;  %v4533_v14 = vmax.f32 %v4532_v36, %v3232_v24  ;;  %v2233_v2 = vadd.f32 %v2232_v62, %v7141_v12  ;;  %1775 = vmatmul.bf16.gmra.mxu2 %v7067_v32 }
 0x26f   : > { %v1936_v1 = vpop.f32.mrf.mxu3 }
 0x270   : > { %v3105_v20 = vmax.f32 %v2233_v2, 0.0  ;;  %v1937_v23 = vadd.f32 %v1936_v1, %v6959_v27 }
 0x271   : > { %v1736_v22 = vpop.f32.mrf.mxu2  ;;  %v2107_v44 = vpop.f32.mrf.mxu0 }
 0x272   : > { %v4585_v52 = vmax.f32 %v4584_v25, %v3105_v20  ;;  %v3231_v58 = vmax.f32 %v1937_v23, 0.0  ;;  %v1737_v5 = vadd.f32 %v1736_v22, %v7123_v50  ;;  %v2108_v0 = vadd.f32 %v2107_v44, %v6951_v19 }
 0x274   : > { %v4465_v48 = vmax.f32 %v4464_v55, %v3231_v58  ;;  %v3126_v47 = vmax.f32 %v1737_v5, 0.0  ;;  %v3240_v35 = vmax.f32 %v2108_v0, 0.0  ;;  %1978 = vmatmul.bf16.gmra.mxu3 %v6840_v63  ;;  %2146 = vmatmul.bf16.gmra.mxu0 %v6840_v63 }
 0x275   : > { %v2235_v36 = vpop.f32.mrf.mxu1 }
 0x276   : > { %v4384_v57 = vmax.f32 %v4383_v6, %v3126_v47  ;;  %v4534_v37 = vmax.f32 %v4533_v14, %v3240_v35  ;;  %v2236_v16 = vadd.f32 %v2235_v36, %v7141_v12  ;;  %v6159_v47 = vld [vmem:[%s8059_s5 + $0xd4] sm:$0xf] }
 0x277   : > { %v1939_v13 = vpop.f32.mrf.mxu3 }
 0x278   : > { %v3113_v24 = vmax.f32 %v2236_v16, 0.0  ;;  %v1940_v25 = vadd.f32 %v1939_v13, %v6959_v27  ;;  %2274 = vmatmul.bf16.gmra.mxu1 %v7045_v34 }
 0x279   : > { %v1738_v62 = vpop.f32.mrf.mxu2  ;;  %v2109_v2 = vpop.f32.mrf.mxu0 }
 0x27a   : > { %v4586_v55 = vmax.f32 %v4585_v52, %v3113_v24  ;;  %v3239_v1 = vmax.f32 %v1940_v25, 0.0  ;;  %v1739_v20 = vadd.f32 %v1738_v62, %v7123_v50  ;;  %v2110_v23 = vadd.f32 %v2109_v2, %v6951_v19  ;;  %v5953_v52 = vld [vmem:[%s8059_s5 + $0xf0] sm:$0xf0] }
 0x27b   : > { %v5956_v36 = vor.u32 %v6159_v47, %v5953_v52 }
 0x27c   : > { %v4466_v22 = vmax.f32 %v4465_v48, %v3239_v1  ;;  %v3134_v44 = vmax.f32 %v1739_v20, 0.0  ;;  %v3248_v6 = vmax.f32 %v2110_v23, 0.0 }
 0x27d   : > { %v2237_v14 = vpop.f32.mrf.mxu1  ;;  %2546 = vmatpush.bf16.msra.mxu3 %v5956_v36 }
 0x27e   : > { %v4385_v58 = vmax.f32 %v4384_v57, %v3134_v44  ;;  %v4535_v5 = vmax.f32 %v4534_v37, %v3248_v6  ;;  %v2238_v0 = vadd.f32 %v2237_v14, %v7141_v12  ;;  %1780 = vmatmul.bf16.gmra.mxu2 %v7091_v53 }
 0x27f   : > { %v1941_v35 = vpop.f32.mrf.mxu3 }
 0x280   : > { %v3121_v48 = vmax.f32 %v2238_v0, 0.0  ;;  %v1942_v16 = vadd.f32 %v1941_v35, %v6959_v27 }
 0x281   : > { %v1741_v13 = vpop.f32.mrf.mxu2  ;;  %v2112_v57 = vpop.f32.mrf.mxu0 }
 0x282   : > { %v4587_v37 = vmax.f32 %v4586_v55, %v3121_v48  ;;  %v3247_v24 = vmax.f32 %v1942_v16, 0.0  ;;  %v1742_v25 = vadd.f32 %v1741_v13, %v7123_v50  ;;  %v2113_v62 = vadd.f32 %v2112_v57, %v6951_v19 }
 0x284   : > { %v4467_v2 = vmax.f32 %v4466_v22, %v3247_v24  ;;  %v3142_v1 = vmax.f32 %v1742_v25, 0.0  ;;  %v3256_v20 = vmax.f32 %v2113_v62, 0.0  ;;  %1983 = vmatmul.bf16.gmra.mxu3 %v6868_v39  ;;  %2151 = vmatmul.bf16.gmra.mxu0 %v6868_v39 }
 0x285   : > { %v2240_v23 = vpop.f32.mrf.mxu1 }
 0x286   : > { %v4386_v44 = vmax.f32 %v4385_v58, %v3142_v1  ;;  %v4536_v6 = vmax.f32 %v4535_v5, %v3256_v20  ;;  %v2241_v14 = vadd.f32 %v2240_v23, %v7141_v12  ;;  %v5951_v1 = vld [vmem:[%s8059_s5 + $0xd0] sm:$0xf] }
 0x287   : > { %v1944_v0 = vpop.f32.mrf.mxu3 }
 0x288   : > { %v3129_v47 = vmax.f32 %v2241_v14, 0.0  ;;  %v1945_v55 = vadd.f32 %v1944_v0, %v6959_v27  ;;  %2279 = vmatmul.bf16.gmra.mxu1 %v7067_v32 }
 0x289   : > { %v1743_v52 = vpop.f32.mrf.mxu2  ;;  %v2114_v35 = vpop.f32.mrf.mxu0 }
 0x28a   : > { %v4588_v22 = vmax.f32 %v4587_v37, %v3129_v47  ;;  %v3255_v36 = vmax.f32 %v1945_v55, 0.0  ;;  %v1744_v48 = vadd.f32 %v1743_v52, %v7123_v50  ;;  %v2115_v16 = vadd.f32 %v2114_v35, %v6951_v19  ;;  %v6163_v37 = vld [vmem:[%s8059_s5 + $0xec] sm:$0xf0] }
 0x28b   : > { %v5952_v23 = vor.u32 %v6163_v37, %v5951_v1 }
 0x28c   : > { %v4468_v13 = vmax.f32 %v4467_v2, %v3255_v36  ;;  %v3150_v57 = vmax.f32 %v1744_v48, 0.0  ;;  %v3264_v58 = vmax.f32 %v2115_v16, 0.0 }
 0x28d   : > { %v2242_v5 = vpop.f32.mrf.mxu1  ;;  %2378 = vmatpush.bf16.msra.mxu2 %v5952_v23 }
 0x28e   : > { %v4387_v24 = vmax.f32 %v4386_v44, %v3150_v57  ;;  %v4537_v25 = vmax.f32 %v4536_v6, %v3264_v58  ;;  %v2243_v62 = vadd.f32 %v2242_v5, %v7141_v12  ;;  %1785 = vmatmul.bf16.gmra.mxu2 %v7119_v42 }
 0x28f   : > { %v1946_v20 = vpop.f32.mrf.mxu3 }
 0x290   : > { %v3137_v2 = vmax.f32 %v2243_v62, 0.0  ;;  %v1947_v14 = vadd.f32 %v1946_v20, %v6959_v27  ;;  %v6164_v62 = vld [vmem:[%s8059_s5 + $0xf4] sm:$0xf0] }
 0x291   : > { %v1746_v0 = vpop.f32.mrf.mxu2  ;;  %v2117_v44 = vpop.f32.mrf.mxu0 }
 0x292   : > { %v4589_v6 = vmax.f32 %v4588_v22, %v3137_v2  ;;  %v3263_v47 = vmax.f32 %v1947_v14, 0.0  ;;  %v1747_v55 = vadd.f32 %v1746_v0, %v7123_v50  ;;  %v2118_v52 = vadd.f32 %v2117_v44, %v6951_v19  ;;  %v5959_v22 = vld [vmem:[%s8059_s5 + $0xd8] sm:$0xf] }
 0x293   : > { %v5960_v1 = vor.u32 %v6164_v62, %v5959_v22 }
 0x294   : > { %v4469_v35 = vmax.f32 %v4468_v13, %v3263_v47  ;;  %v3158_v36 = vmax.f32 %v1747_v55, 0.0  ;;  %v3272_v48 = vmax.f32 %v2118_v52, 0.0  ;;  %1988 = vmatmul.bf16.gmra.mxu3 %v6889_v11  ;;  %2156 = vmatmul.bf16.gmra.mxu0 %v6889_v11  ;;  %v6160_v52 = vld [vmem:[%s8059_s5 + $0xdc] sm:$0xf] }
 0x295   : > { %v2245_v16 = vpop.f32.mrf.mxu1  ;;  %2714 = vmatpush.bf16.msra.mxu0 %v5960_v1 }
 0x296   : > { %v4388_v57 = vmax.f32 %v4387_v24, %v3158_v36  ;;  %v4538_v58 = vmax.f32 %v4537_v25, %v3272_v48  ;;  %v2246_v5 = vadd.f32 %v2245_v16, %v7141_v12  ;;  %v5961_v36 = vld [vmem:[%s8059_s5 + $0xf8] sm:$0xf0] }
 0x297   : > { %v1949_v13 = vpop.f32.mrf.mxu3  ;;  %v7271_v16 = vor.u32 %v6160_v52, %v5961_v36 }
 0x298   : > { %v3145_v37 = vmax.f32 %v2246_v5, 0.0  ;;  %v1950_v20 = vadd.f32 %v1949_v13, %v6959_v27  ;;  %2284 = vmatmul.bf16.gmra.mxu1 %v7091_v53 }
 0x299   : > { %v1748_v23 = vpop.f32.mrf.mxu2  ;;  %v2119_v24 = vpop.f32.mrf.mxu0  ;;  %2882 = vmatpush.bf16.msra.mxu1 %v7271_v16 }
 0x29a   : > { %v4590_v25 = vmax.f32 %v4589_v6, %v3145_v37  ;;  %v3271_v2 = vmax.f32 %v1950_v20, 0.0  ;;  %v1749_v14 = vadd.f32 %v1748_v23, %v7123_v50  ;;  %v2120_v0 = vadd.f32 %v2119_v24, %v6951_v19 }
 0x29c   : > { %v4470_v44 = vmax.f32 %v4469_v35, %v3271_v2  ;;  %v3166_v47 = vmax.f32 %v1749_v14, 0.0  ;;  %v3280_v55 = vmax.f32 %v2120_v0, 0.0 }
 0x29d   : > { %v2247_v48 = vpop.f32.mrf.mxu1 }
 0x29e   : > { %v4389_v6 = vmax.f32 %v4388_v57, %v3166_v47  ;;  %v4539_v5 = vmax.f32 %v4538_v58, %v3280_v55  ;;  %v2248_v22 = vadd.f32 %v2247_v48, %v7141_v12  ;;  %1790 = vmatmul.bf16.gmra.mxu2 %v7134_v60 }
 0x29f   : > { %v1951_v35 = vpop.f32.mrf.mxu3 }
 0x2a0   : > { %v3153_v62 = vmax.f32 %v2248_v22, 0.0  ;;  %v1952_v13 = vadd.f32 %v1951_v35, %v6959_v27 }
 0x2a1   : > { %v1751_v1 = vpop.f32.mrf.mxu2  ;;  %v2122_v37 = vpop.f32.mrf.mxu0 }
 0x2a2   : > { %v4591_v20 = vmax.f32 %v4590_v25, %v3153_v62  ;;  %v3279_v23 = vmax.f32 %v1952_v13, 0.0  ;;  %v1752_v24 = vadd.f32 %v1751_v1, %v7123_v50  ;;  %v2123_v2 = vadd.f32 %v2122_v37, %v6951_v19 }
 0x2a4   : > { %v4471_v57 = vmax.f32 %v4470_v44, %v3279_v23  ;;  %v3174_v58 = vmax.f32 %v1752_v24, 0.0  ;;  %v3288_v14 = vmax.f32 %v2123_v2, 0.0  ;;  %1993 = vmatmul.bf16.gmra.mxu3 %v6924_v46  ;;  %2161 = vmatmul.bf16.gmra.mxu0 %v6924_v46 }
 0x2a5   : > { %v2250_v0 = vpop.f32.mrf.mxu1 }
 0x2a6   : > { %v4390_v47 = vmax.f32 %v4389_v6, %v3174_v58  ;;  %v4540_v55 = vmax.f32 %v4539_v5, %v3288_v14  ;;  %v2251_v52 = vadd.f32 %v2250_v0, %v7141_v12 }
 0x2a7   : > { %v1954_v36 = vpop.f32.mrf.mxu3 }
 0x2a8   : > { %v3161_v48 = vmax.f32 %v2251_v52, 0.0  ;;  %v1955_v25 = vadd.f32 %v1954_v36, %v6959_v27  ;;  %2289 = vmatmul.bf16.gmra.mxu1 %v7119_v42 }
 0x2a9   : > { %v1753_v22 = vpop.f32.mrf.mxu2  ;;  %v2124_v35 = vpop.f32.mrf.mxu0 }
 0x2aa   : > { %v4592_v44 = vmax.f32 %v4591_v20, %v3161_v48  ;;  %v3287_v62 = vmax.f32 %v1955_v25, 0.0  ;;  %v1754_v13 = vadd.f32 %v1753_v22, %v7123_v50  ;;  %v2125_v1 = vadd.f32 %v2124_v35, %v6951_v19 }
 0x2ac   : > { %v4472_v37 = vmax.f32 %v4471_v57, %v3287_v62  ;;  %v3182_v23 = vmax.f32 %v1754_v13, 0.0  ;;  %v3296_v6 = vmax.f32 %v2125_v1, 0.0 }
 0x2ad   : > { %v2252_v5 = vpop.f32.mrf.mxu1 }
 0x2ae   : > { %v4391_v24 = vmax.f32 %v4390_v47, %v3182_v23  ;;  %v4541_v2 = vmax.f32 %v4540_v55, %v3296_v6  ;;  %v2253_v58 = vadd.f32 %v2252_v5, %v7141_v12  ;;  %1795 = vmatmul.bf16.gmra.mxu2 %v6780_v29 }
 0x2af   : > { %v1956_v14 = vpop.f32.mrf.mxu3 }
 0x2b0   : > { %v3169_v0 = vmax.f32 %v2253_v58, 0.0  ;;  %v1957_v52 = vadd.f32 %v1956_v14, %v6959_v27 }
 0x2b1   : > { %v1756_v20 = vpop.f32.mrf.mxu2  ;;  %v2127_v36 = vpop.f32.mrf.mxu0 }
 0x2b2   : > { %v4593_v48 = vmax.f32 %v4592_v44, %v3169_v0  ;;  %v3295_v25 = vmax.f32 %v1957_v52, 0.0  ;;  %v1757_v22 = vadd.f32 %v1756_v20, %v7123_v50  ;;  %v2128_v57 = vadd.f32 %v2127_v36, %v6951_v19 }
 0x2b4   : > { %v4473_v35 = vmax.f32 %v4472_v37, %v3295_v25  ;;  %v3190_v62 = vmax.f32 %v1757_v22, 0.0  ;;  %v3304_v47 = vmax.f32 %v2128_v57, 0.0  ;;  %1998 = vmatmul.bf16.gmra.mxu3 %v6939_v10  ;;  %2166 = vmatmul.bf16.gmra.mxu0 %v6939_v10 }
 0x2b5   : > { %v2255_v55 = vpop.f32.mrf.mxu1 }
 0x2b6   : > { %v4392_v13 = vmax.f32 %v4391_v24, %v3190_v62  ;;  %v4542_v1 = vmax.f32 %v4541_v2, %v3304_v47  ;;  %v2256_v23 = vadd.f32 %v2255_v55, %v7141_v12  ;;  %v6151_v47 = vld [vmem:[%s8059_s5 + $0x94] sm:$0xf] }
 0x2b7   : > { %v1959_v6 = vpop.f32.mrf.mxu3 }
 0x2b8   : > { %v3177_v5 = vmax.f32 %v2256_v23, 0.0  ;;  %v1960_v44 = vadd.f32 %v1959_v6, %v6959_v27  ;;  %2294 = vmatmul.bf16.gmra.mxu1 %v7134_v60 }
 0x2b9   : > { %v1758_v58 = vpop.f32.mrf.mxu2  ;;  %v2129_v14 = vpop.f32.mrf.mxu0 }
 0x2ba   : > { %v4594_v37 = vmax.f32 %v4593_v48, %v3177_v5  ;;  %v3303_v0 = vmax.f32 %v1960_v44, 0.0  ;;  %v1759_v52 = vadd.f32 %v1758_v58, %v7123_v50  ;;  %v2130_v20 = vadd.f32 %v2129_v14, %v6951_v19  ;;  %v5921_v48 = vld [vmem:[%s8059_s5 + $0xb0] sm:$0xf0] }
 0x2bb   : > { %v5924_v23 = vor.u32 %v6151_v47, %v5921_v48 }
 0x2bc   : > { %v4474_v36 = vmax.f32 %v4473_v35, %v3303_v0  ;;  %v3198_v25 = vmax.f32 %v1759_v52, 0.0  ;;  %v3312_v24 = vmax.f32 %v2130_v20, 0.0 }
 0x2bd   : > { %v2257_v2 = vpop.f32.mrf.mxu1  ;;  %2547 = vmatpush.bf16.msra.mxu3 %v5924_v23 }
 0x2be   : > { %v4393_v22 = vmax.f32 %v4392_v13, %v3198_v25  ;;  %v4543_v57 = vmax.f32 %v4542_v1, %v3312_v24  ;;  %v2258_v62 = vadd.f32 %v2257_v2, %v7141_v12  ;;  %1800 = vmatmul.bf16.gmra.mxu2 %v6796_v59 }
 0x2bf   : > { %v1961_v55 = vpop.f32.mrf.mxu3 }
 0x2c0   : > { %v3185_v35 = vmax.f32 %v2258_v62, 0.0  ;;  %v1962_v6 = vadd.f32 %v1961_v55, %v6959_v27 }
 0x2c1   : > { %v1761_v5 = vpop.f32.mrf.mxu2  ;;  %v2132_v13 = vpop.f32.mrf.mxu0 }
 0x2c2   : > { %v4595_v1 = vmax.f32 %v4594_v37, %v3185_v35  ;;  %v3311_v44 = vmax.f32 %v1962_v6, 0.0  ;;  %v1762_v58 = vadd.f32 %v1761_v5, %v7123_v50  ;;  %v2133_v14 = vadd.f32 %v2132_v13, %v6951_v19 }
 0x2c4   : > { %v4475_v0 = vmax.f32 %v4474_v36, %v3311_v44  ;;  %v3206_v52 = vmax.f32 %v1762_v58, 0.0  ;;  %v3320_v20 = vmax.f32 %v2133_v14, 0.0  ;;  %2003 = vmatmul.bf16.gmra.mxu3 %v6965_v43  ;;  %2171 = vmatmul.bf16.gmra.mxu0 %v6965_v43 }
 0x2c5   : > { %v2260_v25 = vpop.f32.mrf.mxu1 }
 0x2c6   : > { %v4394_v24 = vmax.f32 %v4393_v22, %v3206_v52  ;;  %v4544_v2 = vmax.f32 %v4543_v57, %v3320_v20  ;;  %v2261_v62 = vadd.f32 %v2260_v25, %v7141_v12  ;;  %v5919_v20 = vld [vmem:[%s8059_s5 + $0x90] sm:$0xf] }
 0x2c7   : > { %v1964_v47 = vpop.f32.mrf.mxu3 }
 0x2c8   : > { %v3193_v48 = vmax.f32 %v2261_v62, 0.0  ;;  %v1965_v37 = vadd.f32 %v1964_v47, %v6959_v27  ;;  %2299 = vmatmul.bf16.gmra.mxu1 %v6780_v29 }
 0x2c9   : > { %v1763_v55 = vpop.f32.mrf.mxu2  ;;  %v2134_v23 = vpop.f32.mrf.mxu0 }
 0x2ca   : > { %v4596_v36 = vmax.f32 %v4595_v1, %v3193_v48  ;;  %v3319_v35 = vmax.f32 %v1965_v37, 0.0  ;;  %v1764_v6 = vadd.f32 %v1763_v55, %v7123_v50  ;;  %v2135_v5 = vadd.f32 %v2134_v23, %v6951_v19  ;;  %v6155_v1 = vld [vmem:[%s8059_s5 + $0xac] sm:$0xf0] }
 0x2cb   : > { %v5920_v62 = vor.u32 %v6155_v1, %v5919_v20  ;;  %v6156_v20 = vld [vmem:[%s8059_s5 + $0xb4] sm:$0xf0] }
 0x2cc   : > { %v4476_v13 = vmax.f32 %v4475_v0, %v3319_v35  ;;  %v3214_v44 = vmax.f32 %v1764_v6, 0.0  ;;  %v3328_v22 = vmax.f32 %v2135_v5, 0.0 }
 0x2cd   : > { %v2262_v57 = vpop.f32.mrf.mxu1  ;;  %2379 = vmatpush.bf16.msra.mxu2 %v5920_v62 }
 0x2ce   : > { %v4395_v58 = vmax.f32 %v4394_v24, %v3214_v44  ;;  %v4545_v14 = vmax.f32 %v4544_v2, %v3328_v22  ;;  %v2263_v52 = vadd.f32 %v2262_v57, %v7141_v12  ;;  %1805 = vmatmul.bf16.gmra.mxu2 %v6824_v31 }
 0x2cf   : > { %v1966_v25 = vpop.f32.mrf.mxu3 }
 0x2d0   : > { %v3201_v0 = vmax.f32 %v2263_v52, 0.0  ;;  %v1967_v47 = vadd.f32 %v1966_v25, %v6959_v27 }
 0x2d1   : > { %v1766_v48 = vpop.f32.mrf.mxu2  ;;  %v2137_v24 = vpop.f32.mrf.mxu0 }
 0x2d2   : > { %v4597_v2 = vmax.f32 %v4596_v36, %v3201_v0  ;;  %v3327_v37 = vmax.f32 %v1967_v47, 0.0  ;;  %v1767_v55 = vadd.f32 %v1766_v48, %v7123_v50  ;;  %v2138_v23 = vadd.f32 %v2137_v24, %v6951_v19  ;;  %v5927_v36 = vld [vmem:[%s8059_s5 + $0x98] sm:$0xf] }
 0x2d3   : > { %v5928_v1 = vor.u32 %v6156_v20, %v5927_v36 }
 0x2d4   : > { %v4477_v35 = vmax.f32 %v4476_v13, %v3327_v37  ;;  %v3222_v6 = vmax.f32 %v1767_v55, 0.0  ;;  %v3336_v5 = vmax.f32 %v2138_v23, 0.0  ;;  %2008 = vmatmul.bf16.gmra.mxu3 %v6987_v30  ;;  %2176 = vmatmul.bf16.gmra.mxu0 %v6987_v30 }
 0x2d5   : > { %v2265_v44 = vpop.f32.mrf.mxu1  ;;  %2715 = vmatpush.bf16.msra.mxu0 %v5928_v1 }
 0x2d6   : > { %v4396_v22 = vmax.f32 %v4395_v58, %v3222_v6  ;;  %v4546_v57 = vmax.f32 %v4545_v14, %v3336_v5  ;;  %v2266_v52 = vadd.f32 %v2265_v44, %v7141_v12  ;;  %v6152_v6 = vld [vmem:[%s8059_s5 + $0x9c] sm:$0xf] }
 0x2d7   : > { %v1969_v13 = vpop.f32.mrf.mxu3  ;;  %v5929_v5 = vld [vmem:[%s8059_s5 + $0xb8] sm:$0xf0] }
 0x2d8   : > { %v3209_v25 = vmax.f32 %v2266_v52, 0.0  ;;  %v1970_v62 = vadd.f32 %v1969_v13, %v6959_v27  ;;  %2304 = vmatmul.bf16.gmra.mxu1 %v6796_v59  ;;  %v7346_v52 = vor.u32 %v6152_v6, %v5929_v5 }
 0x2d9   : > { %v1768_v0 = vpop.f32.mrf.mxu2  ;;  %v2139_v58 = vpop.f32.mrf.mxu0 }
 0x2da   : > { %v4598_v14 = vmax.f32 %v4597_v2, %v3209_v25  ;;  %v3335_v47 = vmax.f32 %v1970_v62, 0.0  ;;  %v1769_v48 = vadd.f32 %v1768_v0, %v7123_v50  ;;  %v2140_v24 = vadd.f32 %v2139_v58, %v6951_v19  ;;  %2883 = vmatpush.bf16.msra.mxu1 %v7346_v52 }
 0x2dc   : > { %v4478_v37 = vmax.f32 %v4477_v35, %v3335_v47  ;;  %v3230_v55 = vmax.f32 %v1769_v48, 0.0  ;;  %v3344_v23 = vmax.f32 %v2140_v24, 0.0 }
 0x2dd   : > { %v2267_v44 = vpop.f32.mrf.mxu1 }
 0x2de   : > { %v4397_v2 = vmax.f32 %v4396_v22, %v3230_v55  ;;  %v4547_v36 = vmax.f32 %v4546_v57, %v3344_v23  ;;  %v2268_v20 = vadd.f32 %v2267_v44, %v7141_v12  ;;  %1810 = vmatmul.bf16.gmra.mxu2 %v6840_v63 }
 0x2df   : > { %v1971_v35 = vpop.f32.mrf.mxu3 }
 0x2e0   : > { %v3217_v13 = vmax.f32 %v2268_v20, 0.0  ;;  %v1972_v1 = vadd.f32 %v1971_v35, %v6959_v27 }
 0x2e1   : > { %v1771_v25 = vpop.f32.mrf.mxu2  ;;  %v2142_v62 = vpop.f32.mrf.mxu0 }
 0x2e2   : > { %v4599_v0 = vmax.f32 %v4598_v14, %v3217_v13  ;;  %v3343_v58 = vmax.f32 %v1972_v1, 0.0  ;;  %v1772_v47 = vadd.f32 %v1771_v25, %v7123_v50  ;;  %v2143_v48 = vadd.f32 %v2142_v62, %v6951_v19 }
 0x2e4   : > { %v4479_v22 = vmax.f32 %v4478_v37, %v3343_v58  ;;  %v3238_v57 = vmax.f32 %v1772_v47, 0.0  ;;  %v3352_v24 = vmax.f32 %v2143_v48, 0.0  ;;  %2013 = vmatmul.bf16.gmra.mxu3 %v7023_v28  ;;  %2181 = vmatmul.bf16.gmra.mxu0 %v7023_v28 }
 0x2e5   : > { %v2270_v55 = vpop.f32.mrf.mxu1 }
 0x2e6   : > { %v4398_v23 = vmax.f32 %v4397_v2, %v3238_v57  ;;  %v4548_v6 = vmax.f32 %v4547_v36, %v3352_v24  ;;  %v2271_v5 = vadd.f32 %v2270_v55, %v7141_v12 }
 0x2e7   : > { %v1974_v44 = vpop.f32.mrf.mxu3 }
 0x2e8   : > { %v3225_v20 = vmax.f32 %v2271_v5, 0.0  ;;  %v1975_v14 = vadd.f32 %v1974_v44, %v6959_v27  ;;  %2309 = vmatmul.bf16.gmra.mxu1 %v6824_v31 }
 0x2e9   : > { %v1773_v35 = vpop.f32.mrf.mxu2  ;;  %v2144_v13 = vpop.f32.mrf.mxu0 }
 0x2ea   : > { %v4600_v37 = vmax.f32 %v4599_v0, %v3225_v20  ;;  %v3351_v1 = vmax.f32 %v1975_v14, 0.0  ;;  %v1774_v25 = vadd.f32 %v1773_v35, %v7123_v50  ;;  %v2145_v62 = vadd.f32 %v2144_v13, %v6951_v19 }
 0x2ec   : > { %v4480_v58 = vmax.f32 %v4479_v22, %v3351_v1  ;;  %v3246_v47 = vmax.f32 %v1774_v25, 0.0  ;;  %v3360_v2 = vmax.f32 %v2145_v62, 0.0 }
 0x2ed   : > { %v2272_v36 = vpop.f32.mrf.mxu1 }
 0x2ee   : > { %v4399_v48 = vmax.f32 %v4398_v23, %v3246_v47  ;;  %v4549_v57 = vmax.f32 %v4548_v6, %v3360_v2  ;;  %v2273_v24 = vadd.f32 %v2272_v36, %v7141_v12  ;;  %1815 = vmatmul.bf16.gmra.mxu2 %v6868_v39 }
 0x2ef   : > { %v1976_v55 = vpop.f32.mrf.mxu3 }
 0x2f0   : > { %v3233_v5 = vmax.f32 %v2273_v24, 0.0  ;;  %v1977_v44 = vadd.f32 %v1976_v55, %v6959_v27 }
 0x2f1   : > { %v1776_v0 = vpop.f32.mrf.mxu2  ;;  %v2147_v20 = vpop.f32.mrf.mxu0 }
 0x2f2   : > { %v4601_v14 = vmax.f32 %v4600_v37, %v3233_v5  ;;  %v3359_v35 = vmax.f32 %v1977_v44, 0.0  ;;  %v1777_v13 = vadd.f32 %v1776_v0, %v7123_v50  ;;  %v2148_v22 = vadd.f32 %v2147_v20, %v6951_v19 }
 0x2f4   : > { %v4481_v1 = vmax.f32 %v4480_v58, %v3359_v35  ;;  %v3254_v25 = vmax.f32 %v1777_v13, 0.0  ;;  %v3368_v23 = vmax.f32 %v2148_v22, 0.0  ;;  %2018 = vmatmul.bf16.gmra.mxu3 %v7040_v15  ;;  %2186 = vmatmul.bf16.gmra.mxu0 %v7040_v15 }
 0x2f5   : > { %v2275_v6 = vpop.f32.mrf.mxu1 }
 0x2f6   : > { %v4400_v62 = vmax.f32 %v4399_v48, %v3254_v25  ;;  %v4550_v47 = vmax.f32 %v4549_v57, %v3368_v23  ;;  %v2276_v2 = vadd.f32 %v2275_v6, %v7141_v12  ;;  %v6143_v6 = vld [vmem:[%s8059_s5 + $0x54] sm:$0xf] }
 0x2f7   : > { %v1979_v36 = vpop.f32.mrf.mxu3 }
 0x2f8   : > { %v3241_v24 = vmax.f32 %v2276_v2, 0.0  ;;  %v1980_v37 = vadd.f32 %v1979_v36, %v6959_v27  ;;  %2314 = vmatmul.bf16.gmra.mxu1 %v6840_v63 }
 0x2f9   : > { %v1778_v55 = vpop.f32.mrf.mxu2  ;;  %v2149_v5 = vpop.f32.mrf.mxu0 }
 0x2fa   : > { %v4602_v58 = vmax.f32 %v4601_v14, %v3241_v24  ;;  %v3367_v44 = vmax.f32 %v1980_v37, 0.0  ;;  %v1779_v0 = vadd.f32 %v1778_v55, %v7123_v50  ;;  %v2150_v20 = vadd.f32 %v2149_v5, %v6951_v19  ;;  %v5889_v14 = vld [vmem:[%s8059_s5 + $0x70] sm:$0xf0] }
 0x2fb   : > { %v5892_v36 = vor.u32 %v6143_v6, %v5889_v14 }
 0x2fc   : > { %v4482_v35 = vmax.f32 %v4481_v1, %v3367_v44  ;;  %v3262_v13 = vmax.f32 %v1779_v0, 0.0  ;;  %v3376_v48 = vmax.f32 %v2150_v20, 0.0 }
 0x2fd   : > { %v2277_v57 = vpop.f32.mrf.mxu1  ;;  %2548 = vmatpush.bf16.msra.mxu3 %v5892_v36 }
 0x2fe   : > { %v4401_v22 = vmax.f32 %v4400_v62, %v3262_v13  ;;  %v4551_v25 = vmax.f32 %v4550_v47, %v3376_v48  ;;  %v2278_v23 = vadd.f32 %v2277_v57, %v7141_v12  ;;  %1820 = vmatmul.bf16.gmra.mxu2 %v6889_v11 }
 0x2ff   : > { %v1981_v2 = vpop.f32.mrf.mxu3 }
 0x300   : > { %v3249_v1 = vmax.f32 %v2278_v23, 0.0  ;;  %v1982_v24 = vadd.f32 %v1981_v2, %v6959_v27 }
 0x301   : > { %v1781_v37 = vpop.f32.mrf.mxu2  ;;  %v2152_v62 = vpop.f32.mrf.mxu0 }
 0x302   : > { %v4603_v47 = vmax.f32 %v4602_v58, %v3249_v1  ;;  %v3375_v55 = vmax.f32 %v1982_v24, 0.0  ;;  %v1782_v5 = vadd.f32 %v1781_v37, %v7123_v50  ;;  %v2153_v44 = vadd.f32 %v2152_v62, %v6951_v19 }
 0x304   : > { %v4483_v0 = vmax.f32 %v4482_v35, %v3375_v55  ;;  %v3270_v20 = vmax.f32 %v1782_v5, 0.0  ;;  %v3384_v13 = vmax.f32 %v2153_v44, 0.0  ;;  %2023 = vmatmul.bf16.gmra.mxu3 %v7056_v7  ;;  %2191 = vmatmul.bf16.gmra.mxu0 %v7056_v7 }
 0x305   : > { %v2280_v48 = vpop.f32.mrf.mxu1 }
 0x306   : > { %v4402_v57 = vmax.f32 %v4401_v22, %v3270_v20  ;;  %v4552_v23 = vmax.f32 %v4551_v25, %v3384_v13  ;;  %v2281_v6 = vadd.f32 %v2280_v48, %v7141_v12  ;;  %v5895_v22 = vld [vmem:[%s8059_s5 + $0x58] sm:$0xf] }
 0x307   : > { %v1984_v14 = vpop.f32.mrf.mxu3  ;;  %v6148_v25 = vld [vmem:[%s8059_s5 + $0x74] sm:$0xf0] }
 0x308   : > { %v3257_v2 = vmax.f32 %v2281_v6, 0.0  ;;  %v1985_v58 = vadd.f32 %v1984_v14, %v6959_v27  ;;  %2319 = vmatmul.bf16.gmra.mxu1 %v6868_v39  ;;  %v5896_v55 = vor.u32 %v6148_v25, %v5895_v22  ;;  %v5887_v14 = vld [vmem:[%s8059_s5 + $0x50] sm:$0xf] }
 0x309   : > { %v1783_v36 = vpop.f32.mrf.mxu2  ;;  %v2154_v1 = vpop.f32.mrf.mxu0 }
 0x30a   : > { %v4604_v35 = vmax.f32 %v4603_v47, %v3257_v2  ;;  %v3383_v24 = vmax.f32 %v1985_v58, 0.0  ;;  %v1784_v37 = vadd.f32 %v1783_v36, %v7123_v50  ;;  %v2155_v62 = vadd.f32 %v2154_v1, %v6951_v19  ;;  %2716 = vmatpush.bf16.msra.mxu0 %v5896_v55  ;;  %v6147_v2 = vld [vmem:[%s8059_s5 + $0x6c] sm:$0xf0]  ;;  %v6140_v1 = vld [vmem:[%s8059_s5 + $0x34] sm:$0xf0] }
 0x30b   : > { %v5888_v36 = vor.u32 %v6147_v2, %v5887_v14 }
 0x30c   : > { %v4484_v5 = vmax.f32 %v4483_v0, %v3383_v24  ;;  %v3278_v44 = vmax.f32 %v1784_v37, 0.0  ;;  %v3392_v20 = vmax.f32 %v2155_v62, 0.0  ;;  %v6135_v0 = vld [vmem:[%s8059_s5 + $0x14] sm:$0xf] }
 0x30d   : > { %v2282_v13 = vpop.f32.mrf.mxu1  ;;  %2380 = vmatpush.bf16.msra.mxu2 %v5888_v36 }
 0x30e   : > { %v4403_v47 = vmax.f32 %v4402_v57, %v3278_v44  ;;  %v4553_v48 = vmax.f32 %v4552_v23, %v3392_v20  ;;  %v2283_v6 = vadd.f32 %v2282_v13, %v7141_v12  ;;  %1825 = vmatmul.bf16.gmra.mxu2 %v6924_v46  ;;  %v5857_v57 = vld [vmem:[%s8059_s5 + $0x30] sm:$0xf0]  ;;  %v5863_v23 = vld [vmem:[%s8059_s5 + $0x18] sm:$0xf] }
 0x30f   : > { %v1986_v58 = vpop.f32.mrf.mxu3  ;;  %v5860_v62 = vor.u32 %v6135_v0, %v5857_v57  ;;  %v5864_v22 = vor.u32 %v6140_v1, %v5863_v23 }
 0x310   : > { %v3265_v24 = vmax.f32 %v2283_v6, 0.0  ;;  %v1987_v37 = vadd.f32 %v1986_v58, %v6959_v27 }
 0x311   : > { %v1786_v25 = vpop.f32.mrf.mxu2  ;;  %v2157_v55 = vpop.f32.mrf.mxu0  ;;  %2549 = vmatpush.bf16.msra.mxu3 %v5860_v62  ;;  %2717 = vmatpush.bf16.msra.mxu0 %v5864_v22 }
 0x312   : > { %v4605_v44 = vmax.f32 %v4604_v35, %v3265_v24  ;;  %v3391_v20 = vmax.f32 %v1987_v37, 0.0  ;;  %v1787_v13 = vadd.f32 %v1786_v25, %v7123_v50  ;;  %v2158_v14 = vadd.f32 %v2157_v55, %v6951_v19  ;;  %v6144_v55 = vld [vmem:[%s8059_s5 + $0x5c] sm:$0xf] }
 0x314   : > { %v4485_v2 = vmax.f32 %v4484_v5, %v3391_v20  ;;  %v3286_v39 = vmax.f32 %v1787_v13, 0.0  ;;  %v3400_v6 = vmax.f32 %v2158_v14, 0.0  ;;  %2028 = vmatmul.bf16.gmra.mxu3 %v7078_v8  ;;  %2196 = vmatmul.bf16.gmra.mxu0 %v7078_v8 }
 0x315   : > { %6202 = vmatpush.bf16.msrb.mxu3 %v6920_v40  ;;  %v2285_v0 = vpop.f32.mrf.mxu1  ;;  %v6271_v40 = vld [vmem:[%s8058_s4] ss:$0 sm:$0xff] }
 0x316   : > { %v4404_v58 = vmax.f32 %v4403_v47, %v3286_v39  ;;  %v4554_v36 = vmax.f32 %v4553_v48, %v3400_v6  ;;  %v2286_v35 = vadd.f32 %v2285_v0, %v7141_v12  ;;  %v1202_v5 = vadd.f32 %v6271_v40, %v7089_v33  ;;  %v5897_v33 = vld [vmem:[%s8059_s5 + $0x78] sm:$0xf0] }
 0x317   : > { %v1989_v57 = vpop.f32.mrf.mxu3  ;;  %v5900_v13 = vor.u32 %v6144_v55, %v5897_v33 }
 0x318   : > { %v3273_v23 = vmax.f32 %v2286_v35, 0.0  ;;  %v1990_v1 = vadd.f32 %v1989_v57, %v6959_v27  ;;  %2324 = vmatmul.bf16.gmra.mxu1 %v6889_v11  ;;  %v1267_v20 = vmax.f32 %v1202_v5, 0.0 }
 0x319   : > { %6203 = vmatpush.bf16.msrb.mxu3 %v7021_v26  ;;  %v1788_v24 = vpop.f32.mrf.mxu2  ;;  %v2159_v37 = vpop.f32.mrf.mxu0  ;;  %2884 = vmatpush.bf16.msra.mxu1 %v5900_v13 }
 0x31a   : > { %v4606_v39 = vmax.f32 %v4605_v44, %v3273_v23  ;;  %v3399_v47 = vmax.f32 %v1990_v1, 0.0  ;;  %v1789_v48 = vadd.f32 %v1788_v24, %v7123_v50  ;;  %v2160_v62 = vadd.f32 %v2159_v37, %v6951_v19 }
 0x31b   : > { %v7444_v57 = vpack.c.bf16 %v1267_v20, %v1267_v20 }
 0x31c   : > { %v4486_v26 = vmax.f32 %v4485_v2, %v3399_v47  ;;  %v3294_v22 = vmax.f32 %v1789_v48, 0.0  ;;  %v3408_v25 = vmax.f32 %v2160_v62, 0.0 }
 0x31d   : > { %6204 = vmatpush.bf16.msrb.mxu3 %v7114_v17  ;;  %v2287_v44 = vpop.f32.mrf.mxu1 }
 0x31e   : > { %v4405_v14 = vmax.f32 %v4404_v58, %v3294_v22  ;;  %v4555_v6 = vmax.f32 %v4554_v36, %v3408_v25  ;;  %v2288_v0 = vadd.f32 %v2287_v44, %v7141_v12  ;;  %1830 = vmatmul.bf16.gmra.mxu2 %v6939_v10 }
 0x31f   : > { %v1991_v17 = vpop.f32.mrf.mxu3 }
 0x320   : > { %v3281_v2 = vmax.f32 %v2288_v0, 0.0  ;;  %v1992_v35 = vadd.f32 %v1991_v17, %v6959_v27 }
 0x321   : > { %6205 = vmatpush.bf16.msrb.mxu3 %v7196_v54  ;;  %v1791_v23 = vpop.f32.mrf.mxu2  ;;  %v2162_v1 = vpop.f32.mrf.mxu0 }
 0x322   : > { %v4607_v40 = vmax.f32 %v4606_v39, %v3281_v2  ;;  %v3407_v5 = vmax.f32 %v1992_v35, 0.0  ;;  %v1792_v58 = vadd.f32 %v1791_v23, %v7123_v50  ;;  %v2163_v36 = vadd.f32 %v2162_v1, %v6951_v19 }
 0x324   : > { %v4487_v24 = vmax.f32 %v4486_v26, %v3407_v5  ;;  %v3302_v37 = vmax.f32 %v1792_v58, 0.0  ;;  %v3416_v47 = vmax.f32 %v2163_v36, 0.0  ;;  %2033 = vmatmul.bf16.gmra.mxu3 %v7444_v57  ;;  %2201 = vmatmul.bf16.gmra.mxu0 %v7444_v57 }
 0x325   : > { %6206 = vmatpush.bf16.msrb.mxu3 %v7271_v16  ;;  %v2290_v54 = vpop.f32.mrf.mxu1 }
 0x326   : > { %v4406_v48 = vmax.f32 %v4405_v14, %v3302_v37  ;;  %v4556_v62 = vmax.f32 %v4555_v6, %v3416_v47  ;;  %v2291_v22 = vadd.f32 %v2290_v54, %v7141_v12 }
 0x327   : > { %v1994_v39 = vpop.f32.mrf.mxu3 }
 0x328   : > { %v3289_v25 = vmax.f32 %v2291_v22, 0.0  ;;  %v1995_v55 = vadd.f32 %v1994_v39, %v6959_v27  ;;  %2329 = vmatmul.bf16.gmra.mxu1 %v6924_v46 }
 0x329   : > { %6207 = vmatpush.bf16.msrb.mxu3 %v7346_v52  ;;  %v1793_v16 = vpop.f32.mrf.mxu2  ;;  %v2164_v26 = vpop.f32.mrf.mxu0 }
 0x32a   : > { %v4608_v33 = vmax.f32 %v4607_v40, %v3289_v25  ;;  %v3415_v20 = vmax.f32 %v1995_v55, 0.0  ;;  %v1794_v44 = vadd.f32 %v1793_v16, %v7123_v50  ;;  %v2165_v0 = vadd.f32 %v2164_v26, %v6951_v19 }
 0x32c   : > { %v4488_v14 = vmax.f32 %v4487_v24, %v3415_v20  ;;  %v3310_v6 = vmax.f32 %v1794_v44, 0.0  ;;  %v3424_v17 = vmax.f32 %v2165_v0, 0.0 }
 0x32d   : > { %6208 = vmatpush.bf16.msrb.mxu3 %v5900_v13  ;;  %v2292_v2 = vpop.f32.mrf.mxu1 }
 0x32e   : > { %v4407_v35 = vmax.f32 %v4406_v48, %v3310_v6  ;;  %v4557_v52 = vmax.f32 %v4556_v62, %v3424_v17  ;;  %v2293_v23 = vadd.f32 %v2292_v2, %v7141_v12  ;;  %1835 = vmatmul.bf16.gmra.mxu2 %v6965_v43 }
 0x32f   : > { %v1996_v1 = vpop.f32.mrf.mxu3 }
 0x330   : > { %v3297_v5 = vmax.f32 %v2293_v23, 0.0  ;;  %v1997_v40 = vadd.f32 %v1996_v1, %v6959_v27 }
 0x331   : > { %v1796_v58 = vpop.f32.mrf.mxu2  ;;  %v2167_v36 = vpop.f32.mrf.mxu0 }
 0x332   : > { %v4609_v37 = vmax.f32 %v4608_v33, %v3297_v5  ;;  %v3423_v47 = vmax.f32 %v1997_v40, 0.0  ;;  %v1797_v13 = vadd.f32 %v1796_v58, %v7123_v50  ;;  %v2168_v24 = vadd.f32 %v2167_v36, %v6951_v19 }
 0x334   : > { %v4489_v54 = vmax.f32 %v4488_v14, %v3423_v47  ;;  %v3318_v22 = vmax.f32 %v1797_v13, 0.0  ;;  %v3432_v48 = vmax.f32 %v2168_v24, 0.0  ;;  %2550 = vmatmul.bf16.vlgmr.msra.gmra.mxu3 %v6757_v3  ;;  %2718 = vmatmul.bf16.vlgmr.msra.gmra.mxu0 %v6757_v3 }
 0x335   : > { %v2295_v62 = vpop.f32.mrf.mxu1 }
 0x336   : > { %v4408_v39 = vmax.f32 %v4407_v35, %v3318_v22  ;;  %v4558_v25 = vmax.f32 %v4557_v52, %v3432_v48  ;;  %v2296_v55 = vadd.f32 %v2295_v62, %v7141_v12 }
 0x337   : > { %v1999_v16 = vpop.f32.mrf.mxu3 }
 0x338   : > { %v3305_v26 = vmax.f32 %v2296_v55, 0.0  ;;  %v2000_v33 = vadd.f32 %v1999_v16, %v6959_v27  ;;  %2334 = vmatmul.bf16.gmra.mxu1 %v6939_v10 }
 0x339   : > { %v1798_v20 = vpop.f32.mrf.mxu2  ;;  %v2169_v44 = vpop.f32.mrf.mxu0 }
 0x33a   : > { %v4610_v0 = vmax.f32 %v4609_v37, %v3305_v26  ;;  %v3431_v14 = vmax.f32 %v2000_v33, 0.0  ;;  %v1799_v6 = vadd.f32 %v1798_v20, %v7123_v50  ;;  %v2170_v17 = vadd.f32 %v2169_v44, %v6951_v19 }
 0x33c   : > { %v4490_v2 = vmax.f32 %v4489_v54, %v3431_v14  ;;  %v3326_v23 = vmax.f32 %v1799_v6, 0.0  ;;  %v3440_v35 = vmax.f32 %v2170_v17, 0.0 }
 0x33d   : > { %v2297_v52 = vpop.f32.mrf.mxu1 }
 0x33e   : > { %v4409_v1 = vmax.f32 %v4408_v39, %v3326_v23  ;;  %v4559_v5 = vmax.f32 %v4558_v25, %v3440_v35  ;;  %v2298_v40 = vadd.f32 %v2297_v52, %v7141_v12  ;;  %1840 = vmatmul.bf16.gmra.mxu2 %v6987_v30 }
 0x33f   : > { %v2001_v58 = vpop.f32.mrf.mxu3 }
 0x340   : > { %v3313_v36 = vmax.f32 %v2298_v40, 0.0  ;;  %v2002_v47 = vadd.f32 %v2001_v58, %v6959_v27 }
 0x341   : > { %v1801_v37 = vpop.f32.mrf.mxu2  ;;  %v2172_v13 = vpop.f32.mrf.mxu0 }
 0x342   : > { %v4611_v24 = vmax.f32 %v4610_v0, %v3313_v36  ;;  %v3439_v22 = vmax.f32 %v2002_v47, 0.0  ;;  %v1802_v48 = vadd.f32 %v1801_v37, %v7123_v50  ;;  %v2173_v54 = vadd.f32 %v2172_v13, %v6951_v19  ;;  %v5855_v37 = vld [vmem:[%s8059_s5 + $0x10] sm:$0xf] }
 0x343   : > { %v6139_v13 = vld [vmem:[%s8059_s5 + $0x2c] sm:$0xf0] }
 0x344   : > { %v4491_v62 = vmax.f32 %v4490_v2, %v3439_v22  ;;  %v3334_v55 = vmax.f32 %v1802_v48, 0.0  ;;  %v3448_v39 = vmax.f32 %v2173_v54, 0.0  ;;  %2555 = vmatmul.bf16.gmra.mxu3 %v6785_v38  ;;  %2723 = vmatmul.bf16.gmra.mxu0 %v6785_v38  ;;  %v5856_v22 = vor.u32 %v6139_v13, %v5855_v37 }
 0x345   : > { %v2300_v25 = vpop.f32.mrf.mxu1 }
 0x346   : > { %v4410_v16 = vmax.f32 %v4409_v1, %v3334_v55  ;;  %v4560_v26 = vmax.f32 %v4559_v5, %v3448_v39  ;;  %v2301_v33 = vadd.f32 %v2300_v25, %v7141_v12  ;;  %2381 = vmatpush.bf16.msra.mxu2 %v5856_v22  ;;  %v5865_v22 = vld [vmem:[%s8059_s5 + $0x38] sm:$0xf0] }
 0x347   : > { %v2004_v20 = vpop.f32.mrf.mxu3 }
 0x348   : > { %v3321_v44 = vmax.f32 %v2301_v33, 0.0  ;;  %v2005_v0 = vadd.f32 %v2004_v20, %v6959_v27  ;;  %2339 = vmatmul.bf16.gmra.mxu1 %v6965_v43 }
 0x349   : > { %v1803_v14 = vpop.f32.mrf.mxu2  ;;  %v2174_v6 = vpop.f32.mrf.mxu0 }
 0x34a   : > { %v4612_v17 = vmax.f32 %v4611_v24, %v3321_v44  ;;  %v3447_v2 = vmax.f32 %v2005_v0, 0.0  ;;  %v1804_v23 = vadd.f32 %v1803_v14, %v7123_v50  ;;  %v2175_v35 = vadd.f32 %v2174_v6, %v6951_v19 }
 0x34c   : > { %v4492_v52 = vmax.f32 %v4491_v62, %v3447_v2  ;;  %v3342_v40 = vmax.f32 %v1804_v23, 0.0  ;;  %v3456_v1 = vmax.f32 %v2175_v35, 0.0 }
 0x34d   : > { %v2302_v5 = vpop.f32.mrf.mxu1 }
 0x34e   : > { %v4411_v58 = vmax.f32 %v4410_v16, %v3342_v40  ;;  %v4561_v36 = vmax.f32 %v4560_v26, %v3456_v1  ;;  %v2303_v47 = vadd.f32 %v2302_v5, %v7141_v12  ;;  %1845 = vmatmul.bf16.gmra.mxu2 %v7023_v28 }
 0x34f   : > { %v2006_v24 = vpop.f32.mrf.mxu3 }
 0x350   : > { %v3329_v48 = vmax.f32 %v2303_v47, 0.0  ;;  %v2007_v54 = vadd.f32 %v2006_v24, %v6959_v27 }
 0x351   : > { %v1806_v62 = vpop.f32.mrf.mxu2  ;;  %v2177_v55 = vpop.f32.mrf.mxu0 }
 0x352   : > { %v4613_v39 = vmax.f32 %v4612_v17, %v3329_v48  ;;  %v3455_v25 = vmax.f32 %v2007_v54, 0.0  ;;  %v1807_v16 = vadd.f32 %v1806_v62, %v7123_v50  ;;  %v2178_v26 = vadd.f32 %v2177_v55, %v6951_v19 }
 0x354   : > { %v4493_v33 = vmax.f32 %v4492_v52, %v3455_v25  ;;  %v3350_v20 = vmax.f32 %v1807_v16, 0.0  ;;  %v3464_v44 = vmax.f32 %v2178_v26, 0.0  ;;  %2560 = vmatmul.bf16.gmra.mxu3 %v6801_v4  ;;  %2728 = vmatmul.bf16.gmra.mxu0 %v6801_v4 }
 0x355   : > { %v2305_v0 = vpop.f32.mrf.mxu1 }
 0x356   : > { %v4412_v14 = vmax.f32 %v4411_v58, %v3350_v20  ;;  %v4562_v6 = vmax.f32 %v4561_v36, %v3464_v44  ;;  %v2306_v2 = vadd.f32 %v2305_v0, %v7141_v12  ;;  %v6136_v36 = vld [vmem:[%s8059_s5 + $0x1c] sm:$0xf] }
 0x357   : > { %v2009_v23 = vpop.f32.mrf.mxu3  ;;  %v5868_v54 = vor.u32 %v6136_v36, %v5865_v22 }
 0x358   : > { %v3337_v35 = vmax.f32 %v2306_v2, 0.0  ;;  %v2010_v17 = vadd.f32 %v2009_v23, %v6959_v27  ;;  %2344 = vmatmul.bf16.gmra.mxu1 %v6987_v30 }
 0x359   : > { %v1808_v40 = vpop.f32.mrf.mxu2  ;;  %v2179_v1 = vpop.f32.mrf.mxu0  ;;  %2885 = vmatpush.bf16.msra.mxu1 %v5868_v54  ;;  %6209 = vmatpush.bf16.msrb.mxu3 %v5868_v54 }
 0x35a   : > { %v4614_v52 = vmax.f32 %v4613_v39, %v3337_v35  ;;  %v3463_v5 = vmax.f32 %v2010_v17, 0.0  ;;  %v1809_v47 = vadd.f32 %v1808_v40, %v7123_v50  ;;  %v2180_v37 = vadd.f32 %v2179_v1, %v6951_v19 }
 0x35c   : > { %v4494_v13 = vmax.f32 %v4493_v33, %v3463_v5  ;;  %v3358_v24 = vmax.f32 %v1809_v47, 0.0  ;;  %v3472_v58 = vmax.f32 %v2180_v37, 0.0 }
 0x35d   : > { %v2307_v48 = vpop.f32.mrf.mxu1 }
 0x35e   : > { %v4413_v62 = vmax.f32 %v4412_v14, %v3358_v24  ;;  %v4563_v55 = vmax.f32 %v4562_v6, %v3472_v58  ;;  %v2308_v39 = vadd.f32 %v2307_v48, %v7141_v12  ;;  %1850 = vmatmul.bf16.gmra.mxu2 %v7040_v15 }
 0x35f   : > { %v2011_v25 = vpop.f32.mrf.mxu3 }
 0x360   : > { %v3345_v16 = vmax.f32 %v2308_v39, 0.0  ;;  %v2012_v26 = vadd.f32 %v2011_v25, %v6959_v27 }
 0x361   : > { %v1811_v33 = vpop.f32.mrf.mxu2  ;;  %v2182_v20 = vpop.f32.mrf.mxu0 }
 0x362   : > { %v4615_v44 = vmax.f32 %v4614_v52, %v3345_v16  ;;  %v3471_v0 = vmax.f32 %v2012_v26, 0.0  ;;  %v1812_v2 = vadd.f32 %v1811_v33, %v7123_v50  ;;  %v2183_v23 = vadd.f32 %v2182_v20, %v6951_v19 }
 0x364   : > { %v4495_v14 = vmax.f32 %v4494_v13, %v3471_v0  ;;  %v3366_v6 = vmax.f32 %v1812_v2, 0.0  ;;  %v3480_v35 = vmax.f32 %v2183_v23, 0.0  ;;  %2565 = vmatmul.bf16.gmra.mxu3 %v6829_v41  ;;  %2733 = vmatmul.bf16.gmra.mxu0 %v6829_v41 }
 0x365   : > { %v2310_v17 = vpop.f32.mrf.mxu1 }
 0x366   : > { %v4414_v40 = vmax.f32 %v4413_v62, %v3366_v6  ;;  %v4564_v1 = vmax.f32 %v4563_v55, %v3480_v35  ;;  %v2311_v5 = vadd.f32 %v2310_v17, %v7141_v12 }
 0x367   : > { %v2014_v47 = vpop.f32.mrf.mxu3 }
 0x368   : > { %v3353_v37 = vmax.f32 %v2311_v5, 0.0  ;;  %v2015_v52 = vadd.f32 %v2014_v47, %v6959_v27  ;;  %2349 = vmatmul.bf16.gmra.mxu1 %v7023_v28 }
 0x369   : > { %v1813_v24 = vpop.f32.mrf.mxu2  ;;  %v2184_v58 = vpop.f32.mrf.mxu0 }
 0x36a   : > { %v4616_v13 = vmax.f32 %v4615_v44, %v3353_v37  ;;  %v3479_v36 = vmax.f32 %v2015_v52, 0.0  ;;  %v1814_v22 = vadd.f32 %v1813_v24, %v7123_v50  ;;  %v2185_v48 = vadd.f32 %v2184_v58, %v6951_v19 }
 0x36c   : > { %v4496_v54 = vmax.f32 %v4495_v14, %v3479_v36  ;;  %v3374_v39 = vmax.f32 %v1814_v22, 0.0  ;;  %v3488_v62 = vmax.f32 %v2185_v48, 0.0 }
 0x36d   : > { %v2312_v55 = vpop.f32.mrf.mxu1 }
 0x36e   : > { %v4415_v25 = vmax.f32 %v4414_v40, %v3374_v39  ;;  %v4565_v16 = vmax.f32 %v4564_v1, %v3488_v62  ;;  %v2313_v26 = vadd.f32 %v2312_v55, %v7141_v12  ;;  %1855 = vmatmul.bf16.gmra.mxu2 %v7056_v7 }
 0x36f   : > { %v2016_v33 = vpop.f32.mrf.mxu3 }
 0x370   : > { %v3361_v20 = vmax.f32 %v2313_v26, 0.0  ;;  %v2017_v0 = vadd.f32 %v2016_v33, %v6959_v27 }
 0x371   : > { %v1816_v44 = vpop.f32.mrf.mxu2  ;;  %v2187_v2 = vpop.f32.mrf.mxu0 }
 0x372   : > { %v4617_v23 = vmax.f32 %v4616_v13, %v3361_v20  ;;  %v3487_v6 = vmax.f32 %v2017_v0, 0.0  ;;  %v1817_v35 = vadd.f32 %v1816_v44, %v7123_v50  ;;  %v2188_v14 = vadd.f32 %v2187_v2, %v6951_v19 }
 0x374   : > { %v4497_v17 = vmax.f32 %v4496_v54, %v3487_v6  ;;  %v3382_v5 = vmax.f32 %v1817_v35, 0.0  ;;  %v3496_v40 = vmax.f32 %v2188_v14, 0.0  ;;  %2570 = vmatmul.bf16.gmra.mxu3 %v6845_v9  ;;  %2738 = vmatmul.bf16.gmra.mxu0 %v6845_v9 }
 0x375   : > { %v2315_v1 = vpop.f32.mrf.mxu1 }
 0x376   : > { %v4416_v47 = vmax.f32 %v4415_v25, %v3382_v5  ;;  %v4566_v37 = vmax.f32 %v4565_v16, %v3496_v40  ;;  %v2316_v52 = vadd.f32 %v2315_v1, %v7141_v12 }
 0x377   : > { %v2019_v24 = vpop.f32.mrf.mxu3 }
 0x378   : > { %v3369_v58 = vmax.f32 %v2316_v52, 0.0  ;;  %v2020_v13 = vadd.f32 %v2019_v24, %v6959_v27  ;;  %2354 = vmatmul.bf16.gmra.mxu1 %v7040_v15 }
 0x379   : > { %v1818_v36 = vpop.f32.mrf.mxu2  ;;  %v2189_v22 = vpop.f32.mrf.mxu0 }
 0x37a   : > { %v4618_v48 = vmax.f32 %v4617_v23, %v3369_v58  ;;  %v3495_v54 = vmax.f32 %v2020_v13, 0.0  ;;  %v1819_v39 = vadd.f32 %v1818_v36, %v7123_v50  ;;  %v2190_v62 = vadd.f32 %v2189_v22, %v6951_v19 }
 0x37c   : > { %v4498_v55 = vmax.f32 %v4497_v17, %v3495_v54  ;;  %v3390_v26 = vmax.f32 %v1819_v39, 0.0  ;;  %v3504_v25 = vmax.f32 %v2190_v62, 0.0 }
 0x37d   : > { %v2317_v16 = vpop.f32.mrf.mxu1 }
 0x37e   : > { %v4417_v33 = vmax.f32 %v4416_v47, %v3390_v26  ;;  %v4567_v20 = vmax.f32 %v4566_v37, %v3504_v25  ;;  %v2318_v0 = vadd.f32 %v2317_v16, %v7141_v12  ;;  %1860 = vmatmul.bf16.gmra.mxu2 %v7078_v8 }
 0x37f   : > { %v2021_v44 = vpop.f32.mrf.mxu3 }
 0x380   : > { %v3377_v2 = vmax.f32 %v2318_v0, 0.0  ;;  %v2022_v6 = vadd.f32 %v2021_v44, %v6959_v27 }
 0x381   : > { %v1821_v23 = vpop.f32.mrf.mxu2  ;;  %v2192_v35 = vpop.f32.mrf.mxu0 }
 0x382   : > { %v4619_v14 = vmax.f32 %v4618_v48, %v3377_v2  ;;  %v3503_v5 = vmax.f32 %v2022_v6, 0.0  ;;  %v1822_v40 = vadd.f32 %v1821_v23, %v7123_v50  ;;  %v2193_v17 = vadd.f32 %v2192_v35, %v6951_v19 }
 0x384   : > { %v4499_v1 = vmax.f32 %v4498_v55, %v3503_v5  ;;  %v3398_v52 = vmax.f32 %v1822_v40, 0.0  ;;  %v3512_v47 = vmax.f32 %v2193_v17, 0.0  ;;  %2575 = vmatmul.bf16.gmra.mxu3 %v6879_v51  ;;  %2743 = vmatmul.bf16.gmra.mxu0 %v6879_v51 }
 0x385   : > { %v2320_v37 = vpop.f32.mrf.mxu1 }
 0x386   : > { %v4418_v24 = vmax.f32 %v4417_v33, %v3398_v52  ;;  %v4568_v58 = vmax.f32 %v4567_v20, %v3512_v47  ;;  %v2321_v13 = vadd.f32 %v2320_v37, %v7141_v12 }
 0x387   : > { %v2024_v36 = vpop.f32.mrf.mxu3 }
 0x388   : > { %v3385_v22 = vmax.f32 %v2321_v13, 0.0  ;;  %v2025_v48 = vadd.f32 %v2024_v36, %v6959_v27  ;;  %2359 = vmatmul.bf16.gmra.mxu1 %v7056_v7 }
 0x389   : > { %v1823_v54 = vpop.f32.mrf.mxu2  ;;  %v2194_v39 = vpop.f32.mrf.mxu0 }
 0x38a   : > { %v4620_v62 = vmax.f32 %v4619_v14, %v3385_v22  ;;  %v3511_v55 = vmax.f32 %v2025_v48, 0.0  ;;  %v1824_v26 = vadd.f32 %v1823_v54, %v7123_v50  ;;  %v2195_v25 = vadd.f32 %v2194_v39, %v6951_v19 }
 0x38b   : > { %v3553_v39 = vlaneseq }
 0x38c   : > { %v4500_v16 = vmax.f32 %v4499_v1, %v3511_v55  ;;  %v3406_v0 = vmax.f32 %v1824_v26, 0.0  ;;  %v3520_v33 = vmax.f32 %v2195_v25, 0.0 }
 0x38d   : > { %v2322_v20 = vpop.f32.mrf.mxu1 }
 0x38e   : > { %v4419_v44 = vmax.f32 %v4418_v24, %v3406_v0  ;;  %v4569_v2 = vmax.f32 %v4568_v58, %v3520_v33  ;;  %v2323_v6 = vadd.f32 %v2322_v20, %v7141_v12  ;;  %1865 = vmatmul.bf16.gmra.mxu2 %v7444_v57 }
 0x38f   : > { %v2026_v23 = vpop.f32.mrf.mxu3 }
 0x390   : > { %v3393_v35 = vmax.f32 %v2323_v6, 0.0  ;;  %v2027_v5 = vadd.f32 %v2026_v23, %v6959_v27  ;;  %v3554_v6 = vshrl.u32 %v3553_v39, 7 }
 0x391   : > { %v1826_v14 = vpop.f32.mrf.mxu2  ;;  %v2197_v40 = vpop.f32.mrf.mxu0 }
 0x392   : > { %v4621_v17 = vmax.f32 %v4620_v62, %v3393_v35  ;;  %v3519_v52 = vmax.f32 %v2027_v5, 0.0  ;;  %v1827_v47 = vadd.f32 %v1826_v14, %v7123_v50  ;;  %v2198_v1 = vadd.f32 %v2197_v40, %v6951_v19 }
 0x394   : > { %v4501_v37 = vmax.f32 %v4500_v16, %v3519_v52  ;;  %v3414_v13 = vmax.f32 %v1827_v47, 0.0  ;;  %v3528_v24 = vmax.f32 %v2198_v1, 0.0  ;;  %2580 = vmatmul.bf16.gmra.mxu3 %v6900_v21  ;;  %2748 = vmatmul.bf16.gmra.mxu0 %v6900_v21  ;;  %v7555_v47 = vadd.s32 496, %v3554_v6 }
 0x395   : > { %v2325_v58 = vpop.f32.mrf.mxu1 }
 0x396   : > { %v4420_v36 = vmax.f32 %v4419_v44, %v3414_v13  ;;  %v4570_v22 = vmax.f32 %v4569_v2, %v3528_v24  ;;  %v2326_v48 = vadd.f32 %v2325_v58, %v7141_v12  ;;  %vm3744_vm2 = vcmp.lt.s32.totalorder %v7555_v47, 500 }
 0x397   : > { %v2029_v54 = vpop.f32.mrf.mxu3 }
 0x398   : > { %v3401_v62 = vmax.f32 %v2326_v48, 0.0  ;;  %v2030_v55 = vadd.f32 %v2029_v54, %v6959_v27  ;;  %2364 = vmatmul.bf16.gmra.mxu1 %v7078_v8 }
 0x399   : > { %v1828_v26 = vpop.f32.mrf.mxu2  ;;  %v2199_v25 = vpop.f32.mrf.mxu0 }
 0x39a   : > { %v4622_v16 = vmax.f32 %v4621_v17, %v3401_v62  ;;  %v3527_v0 = vmax.f32 %v2030_v55, 0.0  ;;  %v1829_v33 = vadd.f32 %v1828_v26, %v7123_v50  ;;  %v2200_v20 = vadd.f32 %v2199_v25, %v6951_v19 }
 0x39c   : > { %v4502_v44 = vmax.f32 %v4501_v37, %v3527_v0  ;;  %v3422_v2 = vmax.f32 %v1829_v33, 0.0  ;;  %v3536_v23 = vmax.f32 %v2200_v20, 0.0 }
 0x39d   : > { %v2327_v35 = vpop.f32.mrf.mxu1 }
 0x39e   : > { %v4421_v5 = vmax.f32 %v4420_v36, %v3422_v2  ;;  %v4571_v14 = vmax.f32 %v4570_v22, %v3536_v23  ;;  %v2328_v40 = vadd.f32 %v2327_v35, %v7141_v12  ;;  %2382 = vmatmul.bf16.vlgmr.msra.gmra.mxu2 %v6757_v3 }
 0x39f   : > { %v2031_v52 = vpop.f32.mrf.mxu3 }
 0x3a0   : > { %v3409_v17 = vmax.f32 %v2328_v40, 0.0  ;;  %v2032_v1 = vadd.f32 %v2031_v52, %v6959_v27 }
 0x3a1   : > { %v1831_v13 = vpop.f32.mrf.mxu2  ;;  %v2202_v24 = vpop.f32.mrf.mxu0 }
 0x3a2   : > { %v4623_v58 = vmax.f32 %v4622_v16, %v3409_v17  ;;  %v3535_v48 = vmax.f32 %v2032_v1, 0.0  ;;  %v1832_v37 = vadd.f32 %v1831_v13, %v7123_v50  ;;  %v2203_v54 = vadd.f32 %v2202_v24, %v6951_v19 }
 0x3a4   : > { %v4503_v36 = vmax.f32 %v4502_v44, %v3535_v48  ;;  %v3430_v22 = vmax.f32 %v1832_v37, 0.0  ;;  %v3544_v39 = vmax.f32 %v2203_v54, 0.0  ;;  %2585 = vmatmul.bf16.gmra.mxu3 %v6931_v56  ;;  %2753 = vmatmul.bf16.gmra.mxu0 %v6931_v56  ;;  %v7581_v54 = vld [vmem:[%s8060_s6] sm:$0xff] }
 0x3a5   : > { %v2330_v62 = vpop.f32.mrf.mxu1 }
 0x3a6   : > { %v4422_v55 = vmax.f32 %v4421_v5, %v3430_v22  ;;  %v4369_v26 = vsel %vm3744_vm2, %v3544_v39, -inf  ;;  %v2331_v25 = vadd.f32 %v2330_v62, %v7141_v12 }
 0x3a7   : > { %v7566_v16 = vmax.f32 %v4571_v14, %v4369_v26  ;;  %v2034_v0 = vpop.f32.mrf.mxu3 }
 0x3a8   : > { %v3417_v19 = vmax.f32 %v2331_v25, 0.0  ;;  %v2035_v33 = vadd.f32 %v2034_v0, %v6959_v27  ;;  %2369 = vmatmul.bf16.gmra.mxu1 %v7444_v57  ;;  %v7592_v0 = vperm.slane %v7581_v54, 5 }
 0x3a9   : > { %v1833_v20 = vpop.f32.mrf.mxu2  ;;  %v2204_v6 = vpop.f32.mrf.mxu0 }
 0x3aa   : > { %v4624_v44 = vmax.f32 %v4623_v58, %v3417_v19  ;;  %v3543_v2 = vmax.f32 %v2035_v33, 0.0  ;;  %v1834_v23 = vadd.f32 %v1833_v20, %v7123_v50 }
 0x3ac   : > { %v4368_v35 = vsel %vm3744_vm2, %v3543_v2, -inf  ;;  %v3438_v5 = vmax.f32 %v1834_v23, 0.0 }
 0x3ad   : > { %v7573_v40 = vmax.f32 %v4503_v36, %v4368_v35  ;;  %v2332_v14 = vpop.f32.mrf.mxu1  ;;  %v7584_v36 = vperm.slane %v7581_v54, 6 }
 0x3ae   : > { %v4423_v52 = vmax.f32 %v4422_v55, %v3438_v5  ;;  %v2333_v17 = vadd.f32 %v2332_v14, %v7141_v12  ;;  %2387 = vmatmul.bf16.gmra.mxu2 %v6785_v38 }
 0x3af   : > { %v2036_v27 = vpop.f32.mrf.mxu3 }
 0x3b0   : > { %v3425_v1 = vmax.f32 %v2333_v17, 0.0 }
 0x3b1   : > { %v1836_v13 = vpop.f32.mrf.mxu2  ;;  %v2719_v24 = vpop.f32.mrf.mxu0 }
 0x3b2   : > { %v4625_v58 = vmax.f32 %v4624_v44, %v3425_v1  ;;  %v1837_v48 = vadd.f32 %v1836_v13, %v7123_v50  ;;  %v2720_v26 = vadd.f32 %v2719_v24, %v7584_v36 }
 0x3b4   : > { %v3446_v37 = vmax.f32 %v1837_v48, 0.0  ;;  %2590 = vmatmul.bf16.gmra.mxu3 %v6948_v18  ;;  %2758 = vmatmul.bf16.gmra.mxu0 %v6948_v18  ;;  %v3052_v2 = vmax.f32 %v2720_v26, 0.0 }
 0x3b5   : > { %v2335_v22 = vpop.f32.mrf.mxu1 }
 0x3b6   : > { %v4424_v39 = vmax.f32 %v4423_v52, %v3446_v37  ;;  %v2336_v62 = vadd.f32 %v2335_v22, %v7141_v12 }
 0x3b7   : > { %v2551_v55 = vpop.f32.mrf.mxu3 }
 0x3b8   : > { %v3433_v25 = vmax.f32 %v2336_v62, 0.0  ;;  %2886 = vmatmul.bf16.vlgmr.msra.gmra.mxu1 %v6757_v3  ;;  %v2552_v5 = vadd.f32 %v2551_v55, %v7592_v0 }
 0x3b9   : > { %v1838_v19 = vpop.f32.mrf.mxu2  ;;  %v2721_v33 = vpop.f32.mrf.mxu0 }
 0x3ba   : > { %v4626_v20 = vmax.f32 %v4625_v58, %v3433_v25  ;;  %v1839_v6 = vadd.f32 %v1838_v19, %v7123_v50  ;;  %v2722_v44 = vadd.f32 %v2721_v33, %v7584_v36  ;;  %v3051_v24 = vmax.f32 %v2552_v5, 0.0 }
 0x3bc   : > { %v3454_v23 = vmax.f32 %v1839_v6, 0.0  ;;  %v3060_v35 = vmax.f32 %v2722_v44, 0.0 }
 0x3bd   : > { %v2337_v14 = vpop.f32.mrf.mxu1 }
 0x3be   : > { %v4425_v52 = vmax.f32 %v4424_v39, %v3454_v23  ;;  %v4783_v17 = vmax.f32 %v3052_v2, %v3060_v35  ;;  %v2338_v3 = vadd.f32 %v2337_v14, %v7141_v12  ;;  %2392 = vmatmul.bf16.gmra.mxu2 %v6801_v4 }
 0x3bf   : > { %v2553_v27 = vpop.f32.mrf.mxu3 }
 0x3c0   : > { %v3441_v1 = vmax.f32 %v2338_v3, 0.0  ;;  %v2554_v13 = vadd.f32 %v2553_v27, %v7592_v0 }
 0x3c1   : > { %v1841_v58 = vpop.f32.mrf.mxu2  ;;  %v2724_v48 = vpop.f32.mrf.mxu0 }
 0x3c2   : > { %v4627_v37 = vmax.f32 %v4626_v20, %v3441_v1  ;;  %v3059_v22 = vmax.f32 %v2554_v13, 0.0  ;;  %v1842_v62 = vadd.f32 %v1841_v58, %v7123_v50  ;;  %v2725_v55 = vadd.f32 %v2724_v48, %v7584_v36 }
 0x3c4   : > { %v4715_v26 = vmax.f32 %v3051_v24, %v3059_v22  ;;  %v3462_v39 = vmax.f32 %v1842_v62, 0.0  ;;  %v3068_v25 = vmax.f32 %v2725_v55, 0.0  ;;  %2595 = vmatmul.bf16.gmra.mxu3 %v6976_v61  ;;  %2763 = vmatmul.bf16.gmra.mxu0 %v6976_v61 }
 0x3c5   : > { %v2340_v19 = vpop.f32.mrf.mxu1 }
 0x3c6   : > { %v4426_v33 = vmax.f32 %v4425_v52, %v3462_v39  ;;  %v4784_v6 = vmax.f32 %v4783_v17, %v3068_v25  ;;  %v2341_v44 = vadd.f32 %v2340_v19, %v7141_v12 }
 0x3c7   : > { %v2556_v2 = vpop.f32.mrf.mxu3 }
 0x3c8   : > { %v3449_v23 = vmax.f32 %v2341_v44, 0.0  ;;  %v2557_v20 = vadd.f32 %v2556_v2, %v7592_v0  ;;  %2891 = vmatmul.bf16.gmra.mxu1 %v6785_v38 }
 0x3c9   : > { %v1843_v35 = vpop.f32.mrf.mxu2  ;;  %v2726_v5 = vpop.f32.mrf.mxu0 }
 0x3ca   : > { %v4628_v14 = vmax.f32 %v4627_v37, %v3449_v23  ;;  %v3067_v3 = vmax.f32 %v2557_v20, 0.0  ;;  %v1844_v27 = vadd.f32 %v1843_v35, %v7123_v50  ;;  %v2727_v1 = vadd.f32 %v2726_v5, %v7584_v36 }
 0x3cc   : > { %v4716_v13 = vmax.f32 %v4715_v26, %v3067_v3  ;;  %v3470_v24 = vmax.f32 %v1844_v27, 0.0  ;;  %v3076_v52 = vmax.f32 %v2727_v1, 0.0 }
 0x3cd   : > { %v2342_v17 = vpop.f32.mrf.mxu1 }
 0x3ce   : > { %v4427_v58 = vmax.f32 %v4426_v33, %v3470_v24  ;;  %v4785_v48 = vmax.f32 %v4784_v6, %v3076_v52  ;;  %v2343_v22 = vadd.f32 %v2342_v17, %v7141_v12  ;;  %2397 = vmatmul.bf16.gmra.mxu2 %v6829_v41 }
 0x3cf   : > { %v2558_v62 = vpop.f32.mrf.mxu3 }
 0x3d0   : > { %v3457_v38 = vmax.f32 %v2343_v22, 0.0  ;;  %v2559_v55 = vadd.f32 %v2558_v62, %v7592_v0 }
 0x3d1   : > { %v1846_v37 = vpop.f32.mrf.mxu2  ;;  %v2729_v39 = vpop.f32.mrf.mxu0 }
 0x3d2   : > { %v4629_v25 = vmax.f32 %v4628_v14, %v3457_v38  ;;  %v3075_v19 = vmax.f32 %v2559_v55, 0.0  ;;  %v1847_v44 = vadd.f32 %v1846_v37, %v7123_v50  ;;  %v2730_v26 = vadd.f32 %v2729_v39, %v7584_v36 }
 0x3d4   : > { %v4717_v2 = vmax.f32 %v4716_v13, %v3075_v19  ;;  %v3478_v23 = vmax.f32 %v1847_v44, 0.0  ;;  %v3084_v33 = vmax.f32 %v2730_v26, 0.0  ;;  %2600 = vmatmul.bf16.gmra.mxu3 %v6998_v49  ;;  %2768 = vmatmul.bf16.gmra.mxu0 %v6998_v49 }
 0x3d5   : > { %v2345_v6 = vpop.f32.mrf.mxu1 }
 0x3d6   : > { %v4428_v20 = vmax.f32 %v4427_v58, %v3478_v23  ;;  %v4786_v35 = vmax.f32 %v4785_v48, %v3084_v33  ;;  %v2346_v5 = vadd.f32 %v2345_v6, %v7141_v12 }
 0x3d7   : > { %v2561_v3 = vpop.f32.mrf.mxu3 }
 0x3d8   : > { %v3465_v27 = vmax.f32 %v2346_v5, 0.0  ;;  %v2562_v14 = vadd.f32 %v2561_v3, %v7592_v0  ;;  %2896 = vmatmul.bf16.gmra.mxu1 %v6801_v4 }
 0x3d9   : > { %v1848_v1 = vpop.f32.mrf.mxu2  ;;  %v2731_v24 = vpop.f32.mrf.mxu0 }
 0x3da   : > { %v4630_v13 = vmax.f32 %v4629_v25, %v3465_v27  ;;  %v3083_v52 = vmax.f32 %v2562_v14, 0.0  ;;  %v1849_v17 = vadd.f32 %v1848_v1, %v7123_v50  ;;  %v2732_v22 = vadd.f32 %v2731_v24, %v7584_v36 }
 0x3dc   : > { %v4718_v62 = vmax.f32 %v4717_v2, %v3083_v52  ;;  %v3486_v38 = vmax.f32 %v1849_v17, 0.0  ;;  %v3092_v58 = vmax.f32 %v2732_v22, 0.0 }
 0x3dd   : > { %v2347_v48 = vpop.f32.mrf.mxu1 }
 0x3de   : > { %v4429_v55 = vmax.f32 %v4428_v20, %v3486_v38  ;;  %v4787_v37 = vmax.f32 %v4786_v35, %v3092_v58  ;;  %v2348_v39 = vadd.f32 %v2347_v48, %v7141_v12  ;;  %2402 = vmatmul.bf16.gmra.mxu2 %v6845_v9 }
 0x3df   : > { %v2563_v19 = vpop.f32.mrf.mxu3 }
 0x3e0   : > { %v3473_v4 = vmax.f32 %v2348_v39, 0.0  ;;  %v2564_v44 = vadd.f32 %v2563_v19, %v7592_v0 }
 0x3e1   : > { %v1851_v25 = vpop.f32.mrf.mxu2  ;;  %v2734_v26 = vpop.f32.mrf.mxu0 }
 0x3e2   : > { %v4631_v23 = vmax.f32 %v4630_v13, %v3473_v4  ;;  %v3091_v33 = vmax.f32 %v2564_v44, 0.0  ;;  %v1852_v6 = vadd.f32 %v1851_v25, %v7123_v50  ;;  %v2735_v2 = vadd.f32 %v2734_v26, %v7584_v36 }
 0x3e4   : > { %v4719_v5 = vmax.f32 %v4718_v62, %v3091_v33  ;;  %v3494_v3 = vmax.f32 %v1852_v6, 0.0  ;;  %v3100_v20 = vmax.f32 %v2735_v2, 0.0  ;;  %2605 = vmatmul.bf16.gmra.mxu3 %v7029_v45  ;;  %2773 = vmatmul.bf16.gmra.mxu0 %v7029_v45 }
 0x3e5   : > { %v2350_v35 = vpop.f32.mrf.mxu1 }
 0x3e6   : > { %v4430_v27 = vmax.f32 %v4429_v55, %v3494_v3  ;;  %v4788_v14 = vmax.f32 %v4787_v37, %v3100_v20  ;;  %v2351_v1 = vadd.f32 %v2350_v35, %v7141_v12 }
 0x3e7   : > { %v2566_v24 = vpop.f32.mrf.mxu3 }
 0x3e8   : > { %v3481_v52 = vmax.f32 %v2351_v1, 0.0  ;;  %v2567_v13 = vadd.f32 %v2566_v24, %v7592_v0  ;;  %2901 = vmatmul.bf16.gmra.mxu1 %v6829_v41 }
 0x3e9   : > { %v1853_v17 = vpop.f32.mrf.mxu2  ;;  %v2736_v22 = vpop.f32.mrf.mxu0 }
 0x3ea   : > { %v4632_v62 = vmax.f32 %v4631_v23, %v3481_v52  ;;  %v3099_v38 = vmax.f32 %v2567_v13, 0.0  ;;  %v1854_v58 = vadd.f32 %v1853_v17, %v7123_v50  ;;  %v2737_v48 = vadd.f32 %v2736_v22, %v7584_v36 }
 0x3ec   : > { %v4720_v39 = vmax.f32 %v4719_v5, %v3099_v38  ;;  %v3502_v19 = vmax.f32 %v1854_v58, 0.0  ;;  %v3108_v55 = vmax.f32 %v2737_v48, 0.0 }
 0x3ed   : > { %v2352_v37 = vpop.f32.mrf.mxu1 }
 0x3ee   : > { %v4431_v4 = vmax.f32 %v4430_v27, %v3502_v19  ;;  %v4789_v44 = vmax.f32 %v4788_v14, %v3108_v55  ;;  %v2353_v25 = vadd.f32 %v2352_v37, %v7141_v12  ;;  %2407 = vmatmul.bf16.gmra.mxu2 %v6879_v51 }
 0x3ef   : > { %v2568_v26 = vpop.f32.mrf.mxu3 }
 0x3f0   : > { %v3489_v41 = vmax.f32 %v2353_v25, 0.0  ;;  %v2569_v33 = vadd.f32 %v2568_v26, %v7592_v0 }
 0x3f1   : > { %v1856_v23 = vpop.f32.mrf.mxu2  ;;  %v2739_v6 = vpop.f32.mrf.mxu0 }
 0x3f2   : > { %v4633_v2 = vmax.f32 %v4632_v62, %v3489_v41  ;;  %v3107_v3 = vmax.f32 %v2569_v33, 0.0  ;;  %v1857_v20 = vadd.f32 %v1856_v23, %v7123_v50  ;;  %v2740_v5 = vadd.f32 %v2739_v6, %v7584_v36 }
 0x3f4   : > { %v4721_v35 = vmax.f32 %v4720_v39, %v3107_v3  ;;  %v3510_v1 = vmax.f32 %v1857_v20, 0.0  ;;  %v3116_v27 = vmax.f32 %v2740_v5, 0.0  ;;  %2610 = vmatmul.bf16.gmra.mxu3 %v7045_v34  ;;  %2778 = vmatmul.bf16.gmra.mxu0 %v7045_v34 }
 0x3f5   : > { %v2355_v14 = vpop.f32.mrf.mxu1 }
 0x3f6   : > { %v4432_v24 = vmax.f32 %v4431_v4, %v3510_v1  ;;  %v4790_v52 = vmax.f32 %v4789_v44, %v3116_v27  ;;  %v2356_v13 = vadd.f32 %v2355_v14, %v7141_v12 }
 0x3f7   : > { %v2571_v17 = vpop.f32.mrf.mxu3 }
 0x3f8   : > { %v3497_v22 = vmax.f32 %v2356_v13, 0.0  ;;  %v2572_v62 = vadd.f32 %v2571_v17, %v7592_v0  ;;  %2906 = vmatmul.bf16.gmra.mxu1 %v6845_v9 }
 0x3f9   : > { %v1858_v38 = vpop.f32.mrf.mxu2  ;;  %v2741_v58 = vpop.f32.mrf.mxu0 }
 0x3fa   : > { %v4634_v48 = vmax.f32 %v4633_v2, %v3497_v22  ;;  %v3115_v39 = vmax.f32 %v2572_v62, 0.0  ;;  %v1859_v19 = vadd.f32 %v1858_v38, %v7123_v50  ;;  %v2742_v55 = vadd.f32 %v2741_v58, %v7584_v36 }
 0x3fc   : > { %v4722_v37 = vmax.f32 %v4721_v35, %v3115_v39  ;;  %v3518_v25 = vmax.f32 %v1859_v19, 0.0  ;;  %v3124_v4 = vmax.f32 %v2742_v55, 0.0 }
 0x3fd   : > { %v2357_v44 = vpop.f32.mrf.mxu1 }
 0x3fe   : > { %v4433_v26 = vmax.f32 %v4432_v24, %v3518_v25  ;;  %v4791_v41 = vmax.f32 %v4790_v52, %v3124_v4  ;;  %v2358_v33 = vadd.f32 %v2357_v44, %v7141_v12  ;;  %2412 = vmatmul.bf16.gmra.mxu2 %v6900_v21  ;;  %v4505_v4 = vrot.slane %v7573_v40, 4 }
 0x3ff   : > { %v2573_v23 = vpop.f32.mrf.mxu3 }
 0x400   : > { %v3505_v9 = vmax.f32 %v2358_v33, 0.0  ;;  %v2574_v6 = vadd.f32 %v2573_v23, %v7592_v0 }
 0x401   : > { %v1861_v2 = vpop.f32.mrf.mxu2  ;;  %v2744_v3 = vpop.f32.mrf.mxu0 }
 0x402   : > { %v4635_v20 = vmax.f32 %v4634_v48, %v3505_v9  ;;  %v3123_v5 = vmax.f32 %v2574_v6, 0.0  ;;  %v1862_v1 = vadd.f32 %v1861_v2, %v7123_v50  ;;  %v2745_v35 = vadd.f32 %v2744_v3, %v7584_v36 }
 0x404   : > { %v4723_v27 = vmax.f32 %v4722_v37, %v3123_v5  ;;  %v3526_v14 = vmax.f32 %v1862_v1, 0.0  ;;  %v3132_v24 = vmax.f32 %v2745_v35, 0.0  ;;  %2615 = vmatmul.bf16.gmra.mxu3 %v7067_v32  ;;  %2783 = vmatmul.bf16.gmra.mxu0 %v7067_v32 }
 0x405   : > { %v2360_v52 = vpop.f32.mrf.mxu1 }
 0x406   : > { %v4434_v13 = vmax.f32 %v4433_v26, %v3526_v14  ;;  %v4792_v17 = vmax.f32 %v4791_v41, %v3132_v24  ;;  %v2361_v22 = vadd.f32 %v2360_v52, %v7141_v12 }
 0x407   : > { %v2576_v62 = vpop.f32.mrf.mxu3 }
 0x408   : > { %v3513_v38 = vmax.f32 %v2361_v22, 0.0  ;;  %v2577_v58 = vadd.f32 %v2576_v62, %v7592_v0  ;;  %2911 = vmatmul.bf16.gmra.mxu1 %v6879_v51  ;;  %v4506_v51 = vmax.f32 %v7573_v40, %v4505_v4 }
 0x409   : > { %v1863_v48 = vpop.f32.mrf.mxu2  ;;  %v2746_v39 = vpop.f32.mrf.mxu0 }
 0x40a   : > { %v4636_v19 = vmax.f32 %v4635_v20, %v3513_v38  ;;  %v3131_v55 = vmax.f32 %v2577_v58, 0.0  ;;  %v1864_v37 = vadd.f32 %v1863_v48, %v7123_v50  ;;  %v2747_v25 = vadd.f32 %v2746_v39, %v7584_v36 }
 0x40b   : > { %v4507_v52 = vrot.slane %v4506_v51, 2 }
 0x40c   : > { %v4724_v44 = vmax.f32 %v4723_v27, %v3131_v55  ;;  %v3534_v26 = vmax.f32 %v1864_v37, 0.0  ;;  %v3140_v41 = vmax.f32 %v2747_v25, 0.0 }
 0x40d   : > { %v2362_v33 = vpop.f32.mrf.mxu1  ;;  %v4508_v48 = vmax.f32 %v4506_v51, %v4507_v52 }
 0x40e   : > { %v4435_v23 = vmax.f32 %v4434_v13, %v3534_v26  ;;  %v4793_v9 = vmax.f32 %v4792_v17, %v3140_v41  ;;  %v2363_v6 = vadd.f32 %v2362_v33, %v7141_v12  ;;  %2417 = vmatmul.bf16.gmra.mxu2 %v6931_v56 }
 0x40f   : > { %v2578_v2 = vpop.f32.mrf.mxu3  ;;  %v4509_v33 = vrot.slane %v4508_v48, 1 }
 0x410   : > { %v3521_v3 = vmax.f32 %v2363_v6, 0.0  ;;  %v2579_v20 = vadd.f32 %v2578_v2, %v7592_v0 }
 0x411   : > { %v1866_v5 = vpop.f32.mrf.mxu2  ;;  %v2749_v1 = vpop.f32.mrf.mxu0 }
 0x412   : > { %v4637_v35 = vmax.f32 %v4636_v19, %v3521_v3  ;;  %v3139_v14 = vmax.f32 %v2579_v20, 0.0  ;;  %v1867_v27 = vadd.f32 %v1866_v5, %v7123_v50  ;;  %v2750_v24 = vadd.f32 %v2749_v1, %v7584_v36 }
 0x413   : > { %v4510_v5 = vmax.f32 %v4508_v48, %v4509_v33  ;;  %v7678_v48 = vperm.slane %v7581_v54, 4 }
 0x414   : > { %v4725_v13 = vmax.f32 %v4724_v44, %v3139_v14  ;;  %v3542_v17 = vmax.f32 %v1867_v27, 0.0  ;;  %v3148_v22 = vmax.f32 %v2750_v24, 0.0  ;;  %2620 = vmatmul.bf16.gmra.mxu3 %v7091_v53  ;;  %2788 = vmatmul.bf16.gmra.mxu0 %v7091_v53  ;;  %v4573_v27 = vrot.slane %v7566_v16, 4 }
 0x415   : > { %v2365_v40 = vpop.f32.mrf.mxu1 }
 0x416   : > { %v4367_v62 = vsel %vm3744_vm2, %v3542_v17, -inf  ;;  %v4794_v38 = vmax.f32 %v4793_v9, %v3148_v22  ;;  %v2366_v58 = vadd.f32 %v2365_v40, %v7141_v12 }
 0x417   : > { %v4436_v39 = vmax.f32 %v4435_v23, %v4367_v62  ;;  %v2581_v50 = vpop.f32.mrf.mxu3  ;;  %v4928_v62 = vrot.slane %v4510_v5, 7 }
 0x418   : > { %v3529_v19 = vmax.f32 %v2366_v58, 0.0  ;;  %v2582_v55 = vadd.f32 %v2581_v50, %v7592_v0  ;;  %2916 = vmatmul.bf16.gmra.mxu1 %v6900_v21  ;;  %v4574_v50 = vmax.f32 %v7566_v16, %v4573_v27 }
 0x419   : > { %v4437_v37 = vrot.slane %v4436_v39, 4  ;;  %v1868_v25 = vpop.f32.mrf.mxu2  ;;  %v2751_v4 = vpop.f32.mrf.mxu0 }
 0x41a   : > { %v4638_v44 = vmax.f32 %v4637_v35, %v3529_v19  ;;  %v3147_v26 = vmax.f32 %v2582_v55, 0.0  ;;  %v2752_v41 = vadd.f32 %v2751_v4, %v7584_v36  ;;  %v4575_v33 = vrot.slane %v4574_v50, 2 }
 0x41b   : > { %v4438_v6 = vmax.f32 %v4436_v39, %v4437_v37 }
 0x41c   : > { %v4726_v9 = vmax.f32 %v4725_v13, %v3147_v26  ;;  %v3156_v2 = vmax.f32 %v2752_v41, 0.0 }
 0x41d   : > { %v4439_v3 = vrot.slane %v4438_v6, 2  ;;  %v2367_v51 = vpop.f32.mrf.mxu1 }
 0x41e   : > { %v4795_v23 = vmax.f32 %v4794_v38, %v3156_v2  ;;  %v2368_v20 = vadd.f32 %v2367_v51, %v7141_v12  ;;  %2422 = vmatmul.bf16.gmra.mxu2 %v6948_v18 }
 0x41f   : > { %v4440_v21 = vmax.f32 %v4438_v6, %v4439_v3  ;;  %v2583_v1 = vpop.f32.mrf.mxu3 }
 0x420   : > { %v3537_v14 = vmax.f32 %v2368_v20, 0.0  ;;  %v2584_v35 = vadd.f32 %v2583_v1, %v7592_v0  ;;  %v4576_v1 = vmax.f32 %v4574_v50, %v4575_v33 }
 0x421   : > { %v4441_v24 = vrot.slane %v4440_v21, 1  ;;  %v2383_v52 = vpop.f32.mrf.mxu2  ;;  %v2754_v17 = vpop.f32.mrf.mxu0 }
 0x422   : > { %v4639_v13 = vmax.f32 %v4638_v44, %v3537_v14  ;;  %v3155_v22 = vmax.f32 %v2584_v35, 0.0  ;;  %v2755_v40 = vadd.f32 %v2754_v17, %v7584_v36  ;;  %v2384_v44 = vadd.f32 %v2383_v52, %v7678_v48 }
 0x423   : > { %v4442_v38 = vmax.f32 %v4440_v21, %v4441_v24 }
 0x424   : > { %v4727_v58 = vmax.f32 %v4726_v9, %v3155_v22  ;;  %v3164_v39 = vmax.f32 %v2755_v40, 0.0  ;;  %2625 = vmatmul.bf16.gmra.mxu3 %v7119_v42  ;;  %2793 = vmatmul.bf16.gmra.mxu0 %v7119_v42  ;;  %v4577_v22 = vrot.slane %v4576_v1, 1 }
 0x425   : > { %v2370_v19 = vpop.f32.mrf.mxu1  ;;  %v7683_v55 = vsel %vm4935_vm3, %v4442_v38, %v4928_v62 }
 0x426   : > { %v4796_v37 = vmax.f32 %v4795_v23, %v3164_v39  ;;  %v2371_v25 = vadd.f32 %v2370_v19, %v7141_v12  ;;  %v3050_v23 = vmax.f32 %v2384_v44, 0.0 }
 0x427   : > { %v2586_v4 = vpop.f32.mrf.mxu3 }
 0x428   : > { %v3545_v26 = vmax.f32 %v2371_v25, 0.0  ;;  %v2587_v41 = vadd.f32 %v2586_v4, %v7592_v0  ;;  %2921 = vmatmul.bf16.gmra.mxu1 %v6931_v56 }
 0x429   : > { %v2385_v6 = vpop.f32.mrf.mxu2  ;;  %v2756_v9 = vpop.f32.mrf.mxu0 }
 0x42a   : > { %v4370_v16 = vsel %vm3744_vm2, %v3545_v26, -inf  ;;  %v3163_v2 = vmax.f32 %v2587_v41, 0.0  ;;  %v2386_v3 = vadd.f32 %v2385_v6, %v7678_v48  ;;  %v2757_v51 = vadd.f32 %v2756_v9, %v7584_v36 }
 0x42b   : > { %v4640_v12 = vmax.f32 %v4639_v13, %v4370_v16  ;;  %v7700_v9 = vperm.slane %v7581_v54, 7 }
 0x42c   : > { %v4728_v20 = vmax.f32 %v4727_v58, %v3163_v2  ;;  %v3058_v5 = vmax.f32 %v2386_v3, 0.0  ;;  %v3172_v21 = vmax.f32 %v2757_v51, 0.0 }
 0x42d   : > { %v4641_v14 = vrot.slane %v4640_v12, 4  ;;  %v2372_v35 = vpop.f32.mrf.mxu1 }
 0x42e   : > { %v4647_v56 = vmax.f32 %v3050_v23, %v3058_v5  ;;  %v4797_v27 = vmax.f32 %v4796_v37, %v3172_v21  ;;  %2427 = vmatmul.bf16.gmra.mxu2 %v6976_v61  ;;  %v4578_v37 = vmax.f32 %v4576_v1, %v4577_v22 }
 0x42f   : > { %v4642_v24 = vmax.f32 %v4640_v12, %v4641_v14  ;;  %v2588_v52 = vpop.f32.mrf.mxu3 }
 0x430   : > { %v2589_v17 = vadd.f32 %v2588_v52, %v7592_v0  ;;  %v4929_v3 = vrot.slane %v4578_v37, 6 }
 0x431   : > { %v4643_v40 = vrot.slane %v4642_v24, 2  ;;  %v2388_v62 = vpop.f32.mrf.mxu2  ;;  %v2759_v38 = vpop.f32.mrf.mxu0 }
 0x432   : > { %v3171_v13 = vmax.f32 %v2589_v17, 0.0  ;;  %v2389_v58 = vadd.f32 %v2388_v62, %v7678_v48  ;;  %v2760_v39 = vadd.f32 %v2759_v38, %v7584_v36 }
 0x433   : > { %v4644_v50 = vmax.f32 %v4642_v24, %v4643_v40 }
 0x434   : > { %v4729_v19 = vmax.f32 %v4728_v20, %v3171_v13  ;;  %v3066_v25 = vmax.f32 %v2389_v58, 0.0  ;;  %v3180_v4 = vmax.f32 %v2760_v39, 0.0  ;;  %2630 = vmatmul.bf16.gmra.mxu3 %v7134_v60  ;;  %2798 = vmatmul.bf16.gmra.mxu0 %v7134_v60 }
 0x435   : > { %v4645_v44 = vrot.slane %v4644_v50, 1  ;;  %v2887_v26 = vpop.f32.mrf.mxu1 }
 0x436   : > { %v4648_v41 = vmax.f32 %v4647_v56, %v3066_v25  ;;  %v4798_v33 = vmax.f32 %v4797_v27, %v3180_v4  ;;  %v2888_v1 = vadd.f32 %v2887_v26, %v7700_v9 }
 0x437   : > { %v4646_v6 = vmax.f32 %v4644_v50, %v4645_v44  ;;  %v2591_v16 = vpop.f32.mrf.mxu3 }
 0x438   : > { %v2592_v2 = vadd.f32 %v2591_v16, %v7592_v0  ;;  %2926 = vmatmul.bf16.gmra.mxu1 %v6948_v18  ;;  %v3053_v40 = vmax.f32 %v2888_v1, 0.0 }
 0x439   : > { %v4930_v51 = vrot.slane %v4646_v6, 5  ;;  %v2390_v12 = vpop.f32.mrf.mxu2  ;;  %v2761_v23 = vpop.f32.mrf.mxu0 }
 0x43a   : > { %v3179_v20 = vmax.f32 %v2592_v2, 0.0  ;;  %v2391_v5 = vadd.f32 %v2390_v12, %v7678_v48  ;;  %v2762_v21 = vadd.f32 %v2761_v23, %v7584_v36 }
 0x43b   : > { %v4938_v54 = vsel %vm4937_vm4, %v4929_v3, %v4930_v51 }
 0x43c   : > { %v4730_v14 = vmax.f32 %v4729_v19, %v3179_v20  ;;  %v3074_v35 = vmax.f32 %v2391_v5, 0.0  ;;  %v3188_v56 = vmax.f32 %v2762_v21, 0.0  ;;  %v7708_v27 = vsel %vm4939_vm5, %v7683_v55, %v4938_v54 }
 0x43d   : > { %v2889_v18 = vpop.f32.mrf.mxu1 }
 0x43e   : > { %v4649_v24 = vmax.f32 %v4648_v41, %v3074_v35  ;;  %v4799_v52 = vmax.f32 %v4798_v33, %v3188_v56  ;;  %v2890_v17 = vadd.f32 %v2889_v18, %v7700_v9  ;;  %2432 = vmatmul.bf16.gmra.mxu2 %v6998_v49 }
 0x43f   : > { %v2593_v22 = vpop.f32.mrf.mxu3 }
 0x440   : > { %v3061_v62 = vmax.f32 %v2890_v17, 0.0  ;;  %v2594_v38 = vadd.f32 %v2593_v22, %v7592_v0 }
 0x441   : > { %v2393_v13 = vpop.f32.mrf.mxu2  ;;  %v2764_v58 = vpop.f32.mrf.mxu0 }
 0x442   : > { %v4851_v39 = vmax.f32 %v3053_v40, %v3061_v62  ;;  %v3187_v50 = vmax.f32 %v2594_v38, 0.0  ;;  %v2394_v19 = vadd.f32 %v2393_v13, %v7678_v48  ;;  %v2765_v55 = vadd.f32 %v2764_v58, %v7584_v36 }
 0x444   : > { %v4731_v25 = vmax.f32 %v4730_v14, %v3187_v50  ;;  %v3082_v4 = vmax.f32 %v2394_v19, 0.0  ;;  %v3196_v37 = vmax.f32 %v2765_v55, 0.0  ;;  %2635 = vmatmul.bf16.gmra.mxu3 %v6780_v29  ;;  %2803 = vmatmul.bf16.gmra.mxu0 %v6780_v29 }
 0x445   : > { %v2892_v44 = vpop.f32.mrf.mxu1 }
 0x446   : > { %v4650_v26 = vmax.f32 %v4649_v24, %v3082_v4  ;;  %v4800_v41 = vmax.f32 %v4799_v52, %v3196_v37  ;;  %v2893_v33 = vadd.f32 %v2892_v44, %v7700_v9 }
 0x447   : > { %v2596_v6 = vpop.f32.mrf.mxu3 }
 0x448   : > { %v3069_v16 = vmax.f32 %v2893_v33, 0.0  ;;  %v2597_v2 = vadd.f32 %v2596_v6, %v7592_v0  ;;  %2931 = vmatmul.bf16.gmra.mxu1 %v6976_v61 }
 0x449   : > { %v2395_v3 = vpop.f32.mrf.mxu2  ;;  %v2766_v51 = vpop.f32.mrf.mxu0 }
 0x44a   : > { %v4852_v12 = vmax.f32 %v4851_v39, %v3069_v16  ;;  %v3195_v23 = vmax.f32 %v2597_v2, 0.0  ;;  %v2396_v20 = vadd.f32 %v2395_v3, %v7678_v48  ;;  %v2767_v5 = vadd.f32 %v2766_v51, %v7584_v36 }
 0x44c   : > { %v4732_v21 = vmax.f32 %v4731_v25, %v3195_v23  ;;  %v3090_v1 = vmax.f32 %v2396_v20, 0.0  ;;  %v3204_v54 = vmax.f32 %v2767_v5, 0.0 }
 0x44d   : > { %v2894_v14 = vpop.f32.mrf.mxu1 }
 0x44e   : > { %v4651_v35 = vmax.f32 %v4650_v26, %v3090_v1  ;;  %v4801_v56 = vmax.f32 %v4800_v41, %v3204_v54  ;;  %v2895_v18 = vadd.f32 %v2894_v14, %v7700_v9  ;;  %2437 = vmatmul.bf16.gmra.mxu2 %v7029_v45 }
 0x44f   : > { %v2598_v24 = vpop.f32.mrf.mxu3 }
 0x450   : > { %v3077_v61 = vmax.f32 %v2895_v18, 0.0  ;;  %v2599_v52 = vadd.f32 %v2598_v24, %v7592_v0 }
 0x451   : > { %v2398_v17 = vpop.f32.mrf.mxu2  ;;  %v2769_v22 = vpop.f32.mrf.mxu0 }
 0x452   : > { %v4853_v40 = vmax.f32 %v4852_v12, %v3077_v61  ;;  %v3203_v62 = vmax.f32 %v2599_v52, 0.0  ;;  %v2399_v38 = vadd.f32 %v2398_v17, %v7678_v48  ;;  %v2770_v13 = vadd.f32 %v2769_v22, %v7584_v36 }
 0x454   : > { %v4733_v58 = vmax.f32 %v4732_v21, %v3203_v62  ;;  %v3098_v39 = vmax.f32 %v2399_v38, 0.0  ;;  %v3212_v50 = vmax.f32 %v2770_v13, 0.0  ;;  %2640 = vmatmul.bf16.gmra.mxu3 %v6796_v59  ;;  %2808 = vmatmul.bf16.gmra.mxu0 %v6796_v59 }
 0x455   : > { %v2897_v19 = vpop.f32.mrf.mxu1 }
 0x456   : > { %v4652_v55 = vmax.f32 %v4651_v35, %v3098_v39  ;;  %v4802_v25 = vmax.f32 %v4801_v56, %v3212_v50  ;;  %v2898_v4 = vadd.f32 %v2897_v19, %v7700_v9 }
 0x457   : > { %v2601_v37 = vpop.f32.mrf.mxu3 }
 0x458   : > { %v3085_v44 = vmax.f32 %v2898_v4, 0.0  ;;  %v2602_v26 = vadd.f32 %v2601_v37, %v7592_v0  ;;  %2936 = vmatmul.bf16.gmra.mxu1 %v6998_v49 }
 0x459   : > { %v2400_v41 = vpop.f32.mrf.mxu2  ;;  %v2771_v33 = vpop.f32.mrf.mxu0 }
 0x45a   : > { %v4854_v6 = vmax.f32 %v4853_v40, %v3085_v44  ;;  %v3211_v16 = vmax.f32 %v2602_v26, 0.0  ;;  %v2401_v2 = vadd.f32 %v2400_v41, %v7678_v48  ;;  %v2772_v3 = vadd.f32 %v2771_v33, %v7584_v36 }
 0x45c   : > { %v4734_v51 = vmax.f32 %v4733_v58, %v3211_v16  ;;  %v3106_v12 = vmax.f32 %v2401_v2, 0.0  ;;  %v3220_v23 = vmax.f32 %v2772_v3, 0.0 }
 0x45d   : > { %v2899_v20 = vpop.f32.mrf.mxu1 }
 0x45e   : > { %v4653_v5 = vmax.f32 %v4652_v55, %v3106_v12  ;;  %v4803_v21 = vmax.f32 %v4802_v25, %v3220_v23  ;;  %v2900_v1 = vadd.f32 %v2899_v20, %v7700_v9  ;;  %2442 = vmatmul.bf16.gmra.mxu2 %v7045_v34 }
 0x45f   : > { %v2603_v54 = vpop.f32.mrf.mxu3 }
 0x460   : > { %v3093_v49 = vmax.f32 %v2900_v1, 0.0  ;;  %v2604_v14 = vadd.f32 %v2603_v54, %v7592_v0 }
 0x461   : > { %v2403_v35 = vpop.f32.mrf.mxu2  ;;  %v2774_v56 = vpop.f32.mrf.mxu0 }
 0x462   : > { %v4855_v18 = vmax.f32 %v4854_v6, %v3093_v49  ;;  %v3219_v24 = vmax.f32 %v2604_v14, 0.0  ;;  %v2404_v61 = vadd.f32 %v2403_v35, %v7678_v48  ;;  %v2775_v52 = vadd.f32 %v2774_v56, %v7584_v36 }
 0x464   : > { %v4735_v17 = vmax.f32 %v4734_v51, %v3219_v24  ;;  %v3114_v22 = vmax.f32 %v2404_v61, 0.0  ;;  %v3228_v40 = vmax.f32 %v2775_v52, 0.0  ;;  %2645 = vmatmul.bf16.gmra.mxu3 %v6824_v31  ;;  %2813 = vmatmul.bf16.gmra.mxu0 %v6824_v31 }
 0x465   : > { %v2902_v62 = vpop.f32.mrf.mxu1 }
 0x466   : > { %v4654_v38 = vmax.f32 %v4653_v5, %v3114_v22  ;;  %v4804_v13 = vmax.f32 %v4803_v21, %v3228_v40  ;;  %v2903_v58 = vadd.f32 %v2902_v62, %v7700_v9 }
 0x467   : > { %v2606_v39 = vpop.f32.mrf.mxu3 }
 0x468   : > { %v3101_v50 = vmax.f32 %v2903_v58, 0.0  ;;  %v2607_v19 = vadd.f32 %v2606_v39, %v7592_v0  ;;  %2941 = vmatmul.bf16.gmra.mxu1 %v7029_v45 }
 0x469   : > { %v2405_v55 = vpop.f32.mrf.mxu2  ;;  %v2776_v25 = vpop.f32.mrf.mxu0 }
 0x46a   : > { %v4856_v4 = vmax.f32 %v4855_v18, %v3101_v50  ;;  %v3227_v37 = vmax.f32 %v2607_v19, 0.0  ;;  %v2406_v44 = vadd.f32 %v2405_v55, %v7678_v48  ;;  %v2777_v26 = vadd.f32 %v2776_v25, %v7584_v36 }
 0x46c   : > { %v4736_v41 = vmax.f32 %v4735_v17, %v3227_v37  ;;  %v3122_v33 = vmax.f32 %v2406_v44, 0.0  ;;  %v3236_v6 = vmax.f32 %v2777_v26, 0.0 }
 0x46d   : > { %v2904_v16 = vpop.f32.mrf.mxu1 }
 0x46e   : > { %v4655_v2 = vmax.f32 %v4654_v38, %v3122_v33  ;;  %v4805_v3 = vmax.f32 %v4804_v13, %v3236_v6  ;;  %v2905_v51 = vadd.f32 %v2904_v16, %v7700_v9  ;;  %2447 = vmatmul.bf16.gmra.mxu2 %v7067_v32 }
 0x46f   : > { %v2608_v12 = vpop.f32.mrf.mxu3 }
 0x470   : > { %v3109_v45 = vmax.f32 %v2905_v51, 0.0  ;;  %v2609_v23 = vadd.f32 %v2608_v12, %v7592_v0 }
 0x471   : > { %v2408_v20 = vpop.f32.mrf.mxu2  ;;  %v2779_v5 = vpop.f32.mrf.mxu0 }
 0x472   : > { %v4857_v21 = vmax.f32 %v4856_v4, %v3109_v45  ;;  %v3235_v1 = vmax.f32 %v2609_v23, 0.0  ;;  %v2409_v54 = vadd.f32 %v2408_v20, %v7678_v48  ;;  %v2780_v49 = vadd.f32 %v2779_v5, %v7584_v36  ;;  %v8067_v5 = vld [vmem:[#allocation5_spill] sm:$0xff] }
 0x474   : > { %v4737_v14 = vmax.f32 %v4736_v41, %v3235_v1  ;;  %v3130_v35 = vmax.f32 %v2409_v54, 0.0  ;;  %v3244_v56 = vmax.f32 %v2780_v49, 0.0  ;;  %2650 = vmatmul.bf16.gmra.mxu3 %v6840_v63  ;;  %2818 = vmatmul.bf16.gmra.mxu0 %v6840_v63 }
 0x475   : > { %v2907_v18 = vpop.f32.mrf.mxu1 }
 0x476   : > { %v4656_v24 = vmax.f32 %v4655_v2, %v3130_v35  ;;  %v4806_v61 = vmax.f32 %v4805_v3, %v3244_v56  ;;  %v2908_v52 = vadd.f32 %v2907_v18, %v7700_v9 }
 0x477   : > { %v2611_v17 = vpop.f32.mrf.mxu3 }
 0x478   : > { %v3117_v22 = vmax.f32 %v2908_v52, 0.0  ;;  %v2612_v40 = vadd.f32 %v2611_v17, %v7592_v0  ;;  %2946 = vmatmul.bf16.gmra.mxu1 %v7045_v34 }
 0x479   : > { %v2410_v62 = vpop.f32.mrf.mxu2  ;;  %v2781_v38 = vpop.f32.mrf.mxu0 }
 0x47a   : > { %v4858_v13 = vmax.f32 %v4857_v21, %v3117_v22  ;;  %v3243_v58 = vmax.f32 %v2612_v40, 0.0  ;;  %v2411_v39 = vadd.f32 %v2410_v62, %v7678_v48  ;;  %v2782_v50 = vadd.f32 %v2781_v38, %v7584_v36 }
 0x47c   : > { %v4738_v19 = vmax.f32 %v4737_v14, %v3243_v58  ;;  %v3138_v55 = vmax.f32 %v2411_v39, 0.0  ;;  %v3252_v25 = vmax.f32 %v2782_v50, 0.0 }
 0x47d   : > { %v2909_v4 = vpop.f32.mrf.mxu1 }
 0x47e   : > { %v4657_v37 = vmax.f32 %v4656_v24, %v3138_v55  ;;  %v4807_v44 = vmax.f32 %v4806_v61, %v3252_v25  ;;  %v2910_v26 = vadd.f32 %v2909_v4, %v7700_v9  ;;  %2452 = vmatmul.bf16.gmra.mxu2 %v7091_v53 }
 0x47f   : > { %v2613_v41 = vpop.f32.mrf.mxu3 }
 0x480   : > { %v3125_v34 = vmax.f32 %v2910_v26, 0.0  ;;  %v2614_v33 = vadd.f32 %v2613_v41, %v7592_v0 }
 0x481   : > { %v2413_v6 = vpop.f32.mrf.mxu2  ;;  %v2784_v16 = vpop.f32.mrf.mxu0 }
 0x482   : > { %v4859_v2 = vmax.f32 %v4858_v13, %v3125_v34  ;;  %v3251_v3 = vmax.f32 %v2614_v33, 0.0  ;;  %v2414_v51 = vadd.f32 %v2413_v6, %v7678_v48  ;;  %v2785_v12 = vadd.f32 %v2784_v16, %v7584_v36 }
 0x484   : > { %v4739_v45 = vmax.f32 %v4738_v19, %v3251_v3  ;;  %v3146_v23 = vmax.f32 %v2414_v51, 0.0  ;;  %v3260_v20 = vmax.f32 %v2785_v12, 0.0  ;;  %2655 = vmatmul.bf16.gmra.mxu3 %v8067_v5  ;;  %2823 = vmatmul.bf16.gmra.mxu0 %v8067_v5 }
 0x485   : > { %v2912_v21 = vpop.f32.mrf.mxu1 }
 0x486   : > { %v4658_v1 = vmax.f32 %v4657_v37, %v3146_v23  ;;  %v4808_v54 = vmax.f32 %v4807_v44, %v3260_v20  ;;  %v2913_v49 = vadd.f32 %v2912_v21, %v7700_v9 }
 0x487   : > { %v2616_v14 = vpop.f32.mrf.mxu3 }
 0x488   : > { %v3133_v35 = vmax.f32 %v2913_v49, 0.0  ;;  %v2617_v56 = vadd.f32 %v2616_v14, %v7592_v0  ;;  %2951 = vmatmul.bf16.gmra.mxu1 %v7067_v32 }
 0x489   : > { %v2415_v18 = vpop.f32.mrf.mxu2  ;;  %v2786_v24 = vpop.f32.mrf.mxu0 }
 0x48a   : > { %v4860_v61 = vmax.f32 %v4859_v2, %v3133_v35  ;;  %v3259_v52 = vmax.f32 %v2617_v56, 0.0  ;;  %v2416_v17 = vadd.f32 %v2415_v18, %v7678_v48  ;;  %v2787_v22 = vadd.f32 %v2786_v24, %v7584_v36 }
 0x48c   : > { %v4740_v40 = vmax.f32 %v4739_v45, %v3259_v52  ;;  %v3154_v62 = vmax.f32 %v2416_v17, 0.0  ;;  %v3268_v38 = vmax.f32 %v2787_v22, 0.0 }
 0x48d   : > { %v2914_v13 = vpop.f32.mrf.mxu1 }
 0x48e   : > { %v4659_v58 = vmax.f32 %v4658_v1, %v3154_v62  ;;  %v4809_v39 = vmax.f32 %v4808_v54, %v3268_v38  ;;  %v2915_v50 = vadd.f32 %v2914_v13, %v7700_v9  ;;  %2457 = vmatmul.bf16.gmra.mxu2 %v7119_v42 }
 0x48f   : > { %v2618_v19 = vpop.f32.mrf.mxu3 }
 0x490   : > { %v3141_v32 = vmax.f32 %v2915_v50, 0.0  ;;  %v2619_v55 = vadd.f32 %v2618_v19, %v7592_v0 }
 0x491   : > { %v2418_v25 = vpop.f32.mrf.mxu2  ;;  %v2789_v4 = vpop.f32.mrf.mxu0 }
 0x492   : > { %v4861_v37 = vmax.f32 %v4860_v61, %v3141_v32  ;;  %v3267_v44 = vmax.f32 %v2619_v55, 0.0  ;;  %v2419_v26 = vadd.f32 %v2418_v25, %v7678_v48  ;;  %v2790_v41 = vadd.f32 %v2789_v4, %v7584_v36 }
 0x494   : > { %v4741_v34 = vmax.f32 %v4740_v40, %v3267_v44  ;;  %v3162_v33 = vmax.f32 %v2419_v26, 0.0  ;;  %v3276_v6 = vmax.f32 %v2790_v41, 0.0  ;;  %2660 = vmatmul.bf16.gmra.mxu3 %v6889_v11  ;;  %2828 = vmatmul.bf16.gmra.mxu0 %v6889_v11 }
 0x495   : > { %v2917_v16 = vpop.f32.mrf.mxu1 }
 0x496   : > { %v4660_v2 = vmax.f32 %v4659_v58, %v3162_v33  ;;  %v4810_v3 = vmax.f32 %v4809_v39, %v3276_v6  ;;  %v2918_v51 = vadd.f32 %v2917_v16, %v7700_v9 }
 0x497   : > { %v2621_v12 = vpop.f32.mrf.mxu3 }
 0x498   : > { %v3149_v45 = vmax.f32 %v2918_v51, 0.0  ;;  %v2622_v23 = vadd.f32 %v2621_v12, %v7592_v0  ;;  %2956 = vmatmul.bf16.gmra.mxu1 %v7091_v53 }
 0x499   : > { %v2420_v20 = vpop.f32.mrf.mxu2  ;;  %v2791_v21 = vpop.f32.mrf.mxu0 }
 0x49a   : > { %v4862_v1 = vmax.f32 %v4861_v37, %v3149_v45  ;;  %v3275_v54 = vmax.f32 %v2622_v23, 0.0  ;;  %v2421_v49 = vadd.f32 %v2420_v20, %v7678_v48  ;;  %v2792_v14 = vadd.f32 %v2791_v21, %v7584_v36 }
 0x49c   : > { %v4742_v35 = vmax.f32 %v4741_v34, %v3275_v54  ;;  %v3170_v56 = vmax.f32 %v2421_v49, 0.0  ;;  %v3284_v18 = vmax.f32 %v2792_v14, 0.0 }
 0x49d   : > { %v2919_v24 = vpop.f32.mrf.mxu1 }
 0x49e   : > { %v4661_v61 = vmax.f32 %v4660_v2, %v3170_v56  ;;  %v4811_v52 = vmax.f32 %v4810_v3, %v3284_v18  ;;  %v2920_v17 = vadd.f32 %v2919_v24, %v7700_v9  ;;  %2462 = vmatmul.bf16.gmra.mxu2 %v7134_v60 }
 0x49f   : > { %v2623_v22 = vpop.f32.mrf.mxu3 }
 0x4a0   : > { %v3157_v53 = vmax.f32 %v2920_v17, 0.0  ;;  %v2624_v40 = vadd.f32 %v2623_v22, %v7592_v0 }
 0x4a1   : > { %v2423_v62 = vpop.f32.mrf.mxu2  ;;  %v2794_v38 = vpop.f32.mrf.mxu0 }
 0x4a2   : > { %v4863_v13 = vmax.f32 %v4862_v1, %v3157_v53  ;;  %v3283_v58 = vmax.f32 %v2624_v40, 0.0  ;;  %v2424_v39 = vadd.f32 %v2423_v62, %v7678_v48  ;;  %v2795_v50 = vadd.f32 %v2794_v38, %v7584_v36 }
 0x4a4   : > { %v4743_v19 = vmax.f32 %v4742_v35, %v3283_v58  ;;  %v3178_v32 = vmax.f32 %v2424_v39, 0.0  ;;  %v3292_v55 = vmax.f32 %v2795_v50, 0.0  ;;  %2665 = vmatmul.bf16.gmra.mxu3 %v6924_v46  ;;  %2833 = vmatmul.bf16.gmra.mxu0 %v6924_v46 }
 0x4a5   : > { %v2922_v25 = vpop.f32.mrf.mxu1 }
 0x4a6   : > { %v4662_v4 = vmax.f32 %v4661_v61, %v3178_v32  ;;  %v4812_v37 = vmax.f32 %v4811_v52, %v3292_v55  ;;  %v2923_v44 = vadd.f32 %v2922_v25, %v7700_v9 }
 0x4a7   : > { %v2626_v26 = vpop.f32.mrf.mxu3 }
 0x4a8   : > { %v3165_v41 = vmax.f32 %v2923_v44, 0.0  ;;  %v2627_v34 = vadd.f32 %v2626_v26, %v7592_v0  ;;  %2961 = vmatmul.bf16.gmra.mxu1 %v7119_v42 }
 0x4a9   : > { %v2425_v33 = vpop.f32.mrf.mxu2  ;;  %v2796_v6 = vpop.f32.mrf.mxu0 }
 0x4aa   : > { %v4864_v16 = vmax.f32 %v4863_v13, %v3165_v41  ;;  %v3291_v2 = vmax.f32 %v2627_v34, 0.0  ;;  %v2426_v3 = vadd.f32 %v2425_v33, %v7678_v48  ;;  %v2797_v51 = vadd.f32 %v2796_v6, %v7584_v36 }
 0x4ac   : > { %v4744_v12 = vmax.f32 %v4743_v19, %v3291_v2  ;;  %v3186_v45 = vmax.f32 %v2426_v3, 0.0  ;;  %v3300_v23 = vmax.f32 %v2797_v51, 0.0 }
 0x4ad   : > { %v2924_v20 = vpop.f32.mrf.mxu1 }
 0x4ae   : > { %v4663_v21 = vmax.f32 %v4662_v4, %v3186_v45  ;;  %v4813_v1 = vmax.f32 %v4812_v37, %v3300_v23  ;;  %v2925_v54 = vadd.f32 %v2924_v20, %v7700_v9  ;;  %2467 = vmatmul.bf16.gmra.mxu2 %v6780_v29 }
 0x4af   : > { %v2628_v49 = vpop.f32.mrf.mxu3 }
 0x4b0   : > { %v3173_v42 = vmax.f32 %v2925_v54, 0.0  ;;  %v2629_v14 = vadd.f32 %v2628_v49, %v7592_v0 }
 0x4b1   : > { %v2428_v35 = vpop.f32.mrf.mxu2  ;;  %v2799_v56 = vpop.f32.mrf.mxu0 }
 0x4b2   : > { %v4865_v18 = vmax.f32 %v4864_v16, %v3173_v42  ;;  %v3299_v24 = vmax.f32 %v2629_v14, 0.0  ;;  %v2429_v61 = vadd.f32 %v2428_v35, %v7678_v48  ;;  %v2800_v52 = vadd.f32 %v2799_v56, %v7584_v36 }
 0x4b4   : > { %v4745_v17 = vmax.f32 %v4744_v12, %v3299_v24  ;;  %v3194_v22 = vmax.f32 %v2429_v61, 0.0  ;;  %v3308_v53 = vmax.f32 %v2800_v52, 0.0  ;;  %2670 = vmatmul.bf16.gmra.mxu3 %v6939_v10  ;;  %2838 = vmatmul.bf16.gmra.mxu0 %v6939_v10 }
 0x4b5   : > { %v2927_v40 = vpop.f32.mrf.mxu1 }
 0x4b6   : > { %v4664_v62 = vmax.f32 %v4663_v21, %v3194_v22  ;;  %v4814_v38 = vmax.f32 %v4813_v1, %v3308_v53  ;;  %v2928_v13 = vadd.f32 %v2927_v40, %v7700_v9 }
 0x4b7   : > { %v2631_v58 = vpop.f32.mrf.mxu3 }
 0x4b8   : > { %v3181_v39 = vmax.f32 %v2928_v13, 0.0  ;;  %v2632_v50 = vadd.f32 %v2631_v58, %v7592_v0  ;;  %2966 = vmatmul.bf16.gmra.mxu1 %v7134_v60 }
 0x4b9   : > { %v2430_v19 = vpop.f32.mrf.mxu2  ;;  %v2801_v32 = vpop.f32.mrf.mxu0 }
 0x4ba   : > { %v4866_v55 = vmax.f32 %v4865_v18, %v3181_v39  ;;  %v3307_v25 = vmax.f32 %v2632_v50, 0.0  ;;  %v2431_v4 = vadd.f32 %v2430_v19, %v7678_v48  ;;  %v2802_v37 = vadd.f32 %v2801_v32, %v7584_v36 }
 0x4bc   : > { %v4746_v44 = vmax.f32 %v4745_v17, %v3307_v25  ;;  %v3202_v26 = vmax.f32 %v2431_v4, 0.0  ;;  %v3316_v41 = vmax.f32 %v2802_v37, 0.0 }
 0x4bd   : > { %v2929_v34 = vpop.f32.mrf.mxu1 }
 0x4be   : > { %v4665_v33 = vmax.f32 %v4664_v62, %v3202_v26  ;;  %v4815_v6 = vmax.f32 %v4814_v38, %v3316_v41  ;;  %v2930_v16 = vadd.f32 %v2929_v34, %v7700_v9  ;;  %2472 = vmatmul.bf16.gmra.mxu2 %v6796_v59 }
 0x4bf   : > { %v2633_v2 = vpop.f32.mrf.mxu3 }
 0x4c0   : > { %v3189_v60 = vmax.f32 %v2930_v16, 0.0  ;;  %v2634_v3 = vadd.f32 %v2633_v2, %v7592_v0 }
 0x4c1   : > { %v2433_v51 = vpop.f32.mrf.mxu2  ;;  %v2804_v12 = vpop.f32.mrf.mxu0 }
 0x4c2   : > { %v4867_v45 = vmax.f32 %v4866_v55, %v3189_v60  ;;  %v3315_v23 = vmax.f32 %v2634_v3, 0.0  ;;  %v2434_v20 = vadd.f32 %v2433_v51, %v7678_v48  ;;  %v2805_v21 = vadd.f32 %v2804_v12, %v7584_v36 }
 0x4c4   : > { %v4747_v1 = vmax.f32 %v4746_v44, %v3315_v23  ;;  %v3210_v54 = vmax.f32 %v2434_v20, 0.0  ;;  %v3324_v49 = vmax.f32 %v2805_v21, 0.0  ;;  %2675 = vmatmul.bf16.gmra.mxu3 %v6965_v43  ;;  %2843 = vmatmul.bf16.gmra.mxu0 %v6965_v43 }
 0x4c5   : > { %v2932_v42 = vpop.f32.mrf.mxu1 }
 0x4c6   : > { %v4666_v14 = vmax.f32 %v4665_v33, %v3210_v54  ;;  %v4816_v35 = vmax.f32 %v4815_v6, %v3324_v49  ;;  %v2933_v56 = vadd.f32 %v2932_v42, %v7700_v9 }
 0x4c7   : > { %v2636_v18 = vpop.f32.mrf.mxu3 }
 0x4c8   : > { %v3197_v24 = vmax.f32 %v2933_v56, 0.0  ;;  %v2637_v61 = vadd.f32 %v2636_v18, %v7592_v0  ;;  %2971 = vmatmul.bf16.gmra.mxu1 %v6780_v29 }
 0x4c9   : > { %v2435_v52 = vpop.f32.mrf.mxu2  ;;  %v2806_v17 = vpop.f32.mrf.mxu0 }
 0x4ca   : > { %v4868_v22 = vmax.f32 %v4867_v45, %v3197_v24  ;;  %v3323_v53 = vmax.f32 %v2637_v61, 0.0  ;;  %v2436_v40 = vadd.f32 %v2435_v52, %v7678_v48  ;;  %v2807_v62 = vadd.f32 %v2806_v17, %v7584_v36 }
 0x4cc   : > { %v4748_v38 = vmax.f32 %v4747_v1, %v3323_v53  ;;  %v3218_v13 = vmax.f32 %v2436_v40, 0.0  ;;  %v3332_v58 = vmax.f32 %v2807_v62, 0.0 }
 0x4cd   : > { %v2934_v39 = vpop.f32.mrf.mxu1 }
 0x4ce   : > { %v4667_v50 = vmax.f32 %v4666_v14, %v3218_v13  ;;  %v4817_v19 = vmax.f32 %v4816_v35, %v3332_v58  ;;  %v2935_v32 = vadd.f32 %v2934_v39, %v7700_v9  ;;  %2477 = vmatmul.bf16.gmra.mxu2 %v6824_v31 }
 0x4cf   : > { %v2638_v55 = vpop.f32.mrf.mxu3 }
 0x4d0   : > { %v3205_v29 = vmax.f32 %v2935_v32, 0.0  ;;  %v2639_v25 = vadd.f32 %v2638_v55, %v7592_v0 }
 0x4d1   : > { %v2438_v4 = vpop.f32.mrf.mxu2  ;;  %v2809_v37 = vpop.f32.mrf.mxu0 }
 0x4d2   : > { %v4869_v44 = vmax.f32 %v4868_v22, %v3205_v29  ;;  %v3331_v26 = vmax.f32 %v2639_v25, 0.0  ;;  %v2439_v41 = vadd.f32 %v2438_v4, %v7678_v48  ;;  %v2810_v34 = vadd.f32 %v2809_v37, %v7584_v36 }
 0x4d4   : > { %v4749_v33 = vmax.f32 %v4748_v38, %v3331_v26  ;;  %v3226_v6 = vmax.f32 %v2439_v41, 0.0  ;;  %v3340_v16 = vmax.f32 %v2810_v34, 0.0  ;;  %2680 = vmatmul.bf16.gmra.mxu3 %v6987_v30  ;;  %2848 = vmatmul.bf16.gmra.mxu0 %v6987_v30 }
 0x4d5   : > { %v2937_v2 = vpop.f32.mrf.mxu1 }
 0x4d6   : > { %v4668_v60 = vmax.f32 %v4667_v50, %v3226_v6  ;;  %v4818_v3 = vmax.f32 %v4817_v19, %v3340_v16  ;;  %v2938_v51 = vadd.f32 %v2937_v2, %v7700_v9 }
 0x4d7   : > { %v2641_v12 = vpop.f32.mrf.mxu3 }
 0x4d8   : > { %v3213_v45 = vmax.f32 %v2938_v51, 0.0  ;;  %v2642_v23 = vadd.f32 %v2641_v12, %v7592_v0  ;;  %2976 = vmatmul.bf16.gmra.mxu1 %v6796_v59 }
 0x4d9   : > { %v2440_v20 = vpop.f32.mrf.mxu2  ;;  %v2811_v21 = vpop.f32.mrf.mxu0 }
 0x4da   : > { %v4870_v1 = vmax.f32 %v4869_v44, %v3213_v45  ;;  %v3339_v54 = vmax.f32 %v2642_v23, 0.0  ;;  %v2441_v49 = vadd.f32 %v2440_v20, %v7678_v48  ;;  %v2812_v42 = vadd.f32 %v2811_v21, %v7584_v36 }
 0x4dc   : > { %v4750_v14 = vmax.f32 %v4749_v33, %v3339_v54  ;;  %v3234_v35 = vmax.f32 %v2441_v49, 0.0  ;;  %v3348_v56 = vmax.f32 %v2812_v42, 0.0 }
 0x4dd   : > { %v2939_v18 = vpop.f32.mrf.mxu1 }
 0x4de   : > { %v4669_v24 = vmax.f32 %v4668_v60, %v3234_v35  ;;  %v4819_v61 = vmax.f32 %v4818_v3, %v3348_v56  ;;  %v2940_v52 = vadd.f32 %v2939_v18, %v7700_v9  ;;  %2482 = vmatmul.bf16.gmra.mxu2 %v6840_v63 }
 0x4df   : > { %v2643_v17 = vpop.f32.mrf.mxu3 }
 0x4e0   : > { %v3221_v59 = vmax.f32 %v2940_v52, 0.0  ;;  %v2644_v22 = vadd.f32 %v2643_v17, %v7592_v0 }
 0x4e1   : > { %v2443_v53 = vpop.f32.mrf.mxu2  ;;  %v2814_v40 = vpop.f32.mrf.mxu0 }
 0x4e2   : > { %v4871_v62 = vmax.f32 %v4870_v1, %v3221_v59  ;;  %v3347_v38 = vmax.f32 %v2644_v22, 0.0  ;;  %v2444_v13 = vadd.f32 %v2443_v53, %v7678_v48  ;;  %v2815_v58 = vadd.f32 %v2814_v40, %v7584_v36 }
 0x4e4   : > { %v4751_v39 = vmax.f32 %v4750_v14, %v3347_v38  ;;  %v3242_v50 = vmax.f32 %v2444_v13, 0.0  ;;  %v3356_v19 = vmax.f32 %v2815_v58, 0.0  ;;  %2685 = vmatmul.bf16.gmra.mxu3 %v7023_v28  ;;  %2853 = vmatmul.bf16.gmra.mxu0 %v7023_v28 }
 0x4e5   : > { %v2942_v32 = vpop.f32.mrf.mxu1 }
 0x4e6   : > { %v4670_v55 = vmax.f32 %v4669_v24, %v3242_v50  ;;  %v4820_v29 = vmax.f32 %v4819_v61, %v3356_v19  ;;  %v2943_v25 = vadd.f32 %v2942_v32, %v7700_v9 }
 0x4e7   : > { %v2646_v4 = vpop.f32.mrf.mxu3 }
 0x4e8   : > { %v3229_v37 = vmax.f32 %v2943_v25, 0.0  ;;  %v2647_v44 = vadd.f32 %v2646_v4, %v7592_v0  ;;  %2981 = vmatmul.bf16.gmra.mxu1 %v6824_v31 }
 0x4e9   : > { %v2445_v26 = vpop.f32.mrf.mxu2  ;;  %v2816_v41 = vpop.f32.mrf.mxu0 }
 0x4ea   : > { %v4872_v34 = vmax.f32 %v4871_v62, %v3229_v37  ;;  %v3355_v33 = vmax.f32 %v2647_v44, 0.0  ;;  %v2446_v6 = vadd.f32 %v2445_v26, %v7678_v48  ;;  %v2817_v16 = vadd.f32 %v2816_v41, %v7584_v36 }
 0x4ec   : > { %v4752_v2 = vmax.f32 %v4751_v39, %v3355_v33  ;;  %v3250_v60 = vmax.f32 %v2446_v6, 0.0  ;;  %v3364_v3 = vmax.f32 %v2817_v16, 0.0 }
 0x4ed   : > { %v2944_v51 = vpop.f32.mrf.mxu1 }
 0x4ee   : > { %v4671_v12 = vmax.f32 %v4670_v55, %v3250_v60  ;;  %v4821_v45 = vmax.f32 %v4820_v29, %v3364_v3  ;;  %v2945_v23 = vadd.f32 %v2944_v51, %v7700_v9  ;;  %2487 = vmatmul.bf16.gmra.mxu2 %v8067_v5 }
 0x4ef   : > { %v2648_v20 = vpop.f32.mrf.mxu3 }
 0x4f0   : > { %v3237_v31 = vmax.f32 %v2945_v23, 0.0  ;;  %v2649_v21 = vadd.f32 %v2648_v20, %v7592_v0 }
 0x4f1   : > { %v2448_v1 = vpop.f32.mrf.mxu2  ;;  %v2819_v54 = vpop.f32.mrf.mxu0 }
 0x4f2   : > { %v4873_v49 = vmax.f32 %v4872_v34, %v3237_v31  ;;  %v3363_v42 = vmax.f32 %v2649_v21, 0.0  ;;  %v2449_v14 = vadd.f32 %v2448_v1, %v7678_v48  ;;  %v2820_v35 = vadd.f32 %v2819_v54, %v7584_v36 }
 0x4f4   : > { %v4753_v56 = vmax.f32 %v4752_v2, %v3363_v42  ;;  %v3258_v18 = vmax.f32 %v2449_v14, 0.0  ;;  %v3372_v24 = vmax.f32 %v2820_v35, 0.0  ;;  %2690 = vmatmul.bf16.gmra.mxu3 %v7040_v15  ;;  %2858 = vmatmul.bf16.gmra.mxu0 %v7040_v15 }
 0x4f5   : > { %v2947_v61 = vpop.f32.mrf.mxu1 }
 0x4f6   : > { %v4672_v52 = vmax.f32 %v4671_v12, %v3258_v18  ;;  %v4822_v17 = vmax.f32 %v4821_v45, %v3372_v24  ;;  %v2948_v59 = vadd.f32 %v2947_v61, %v7700_v9 }
 0x4f7   : > { %v2651_v22 = vpop.f32.mrf.mxu3 }
 0x4f8   : > { %v3245_v53 = vmax.f32 %v2948_v59, 0.0  ;;  %v2652_v40 = vadd.f32 %v2651_v22, %v7592_v0  ;;  %2986 = vmatmul.bf16.gmra.mxu1 %v6840_v63 }
 0x4f9   : > { %v2450_v62 = vpop.f32.mrf.mxu2  ;;  %v2821_v38 = vpop.f32.mrf.mxu0 }
 0x4fa   : > { %v4874_v13 = vmax.f32 %v4873_v49, %v3245_v53  ;;  %v3371_v58 = vmax.f32 %v2652_v40, 0.0  ;;  %v2451_v39 = vadd.f32 %v2450_v62, %v7678_v48  ;;  %v2822_v50 = vadd.f32 %v2821_v38, %v7584_v36 }
 0x4fc   : > { %v4754_v19 = vmax.f32 %v4753_v56, %v3371_v58  ;;  %v3266_v32 = vmax.f32 %v2451_v39, 0.0  ;;  %v3380_v55 = vmax.f32 %v2822_v50, 0.0 }
 0x4fd   : > { %v2949_v29 = vpop.f32.mrf.mxu1 }
 0x4fe   : > { %v4673_v25 = vmax.f32 %v4672_v52, %v3266_v32  ;;  %v4823_v4 = vmax.f32 %v4822_v17, %v3380_v55  ;;  %v2950_v37 = vadd.f32 %v2949_v29, %v7700_v9  ;;  %2492 = vmatmul.bf16.gmra.mxu2 %v6889_v11 }
 0x4ff   : > { %v2653_v44 = vpop.f32.mrf.mxu3 }
 0x500   : > { %v3253_v63 = vmax.f32 %v2950_v37, 0.0  ;;  %v2654_v26 = vadd.f32 %v2653_v44, %v7592_v0 }
 0x501   : > { %v2453_v41 = vpop.f32.mrf.mxu2  ;;  %v2824_v34 = vpop.f32.mrf.mxu0 }
 0x502   : > { %v4875_v33 = vmax.f32 %v4874_v13, %v3253_v63  ;;  %v3379_v6 = vmax.f32 %v2654_v26, 0.0  ;;  %v2454_v16 = vadd.f32 %v2453_v41, %v7678_v48  ;;  %v2825_v2 = vadd.f32 %v2824_v34, %v7584_v36 }
 0x504   : > { %v4755_v60 = vmax.f32 %v4754_v19, %v3379_v6  ;;  %v3274_v3 = vmax.f32 %v2454_v16, 0.0  ;;  %v3388_v51 = vmax.f32 %v2825_v2, 0.0  ;;  %2695 = vmatmul.bf16.gmra.mxu3 %v7056_v7  ;;  %2863 = vmatmul.bf16.gmra.mxu0 %v7056_v7 }
 0x505   : > { %v2952_v12 = vpop.f32.mrf.mxu1 }
 0x506   : > { %v4674_v45 = vmax.f32 %v4673_v25, %v3274_v3  ;;  %v4824_v23 = vmax.f32 %v4823_v4, %v3388_v51  ;;  %v2953_v20 = vadd.f32 %v2952_v12, %v7700_v9 }
 0x507   : > { %v2656_v31 = vpop.f32.mrf.mxu3 }
 0x508   : > { %v3261_v21 = vmax.f32 %v2953_v20, 0.0  ;;  %v2657_v1 = vadd.f32 %v2656_v31, %v7592_v0  ;;  %2991 = vmatmul.bf16.gmra.mxu1 %v8067_v5 }
 0x509   : > { %v2455_v54 = vpop.f32.mrf.mxu2  ;;  %v2826_v49 = vpop.f32.mrf.mxu0 }
 0x50a   : > { %v4876_v42 = vmax.f32 %v4875_v33, %v3261_v21  ;;  %v3387_v14 = vmax.f32 %v2657_v1, 0.0  ;;  %v2456_v35 = vadd.f32 %v2455_v54, %v7678_v48  ;;  %v2827_v56 = vadd.f32 %v2826_v49, %v7584_v36 }
 0x50c   : > { %v4756_v18 = vmax.f32 %v4755_v60, %v3387_v14  ;;  %v3282_v24 = vmax.f32 %v2456_v35, 0.0  ;;  %v3396_v61 = vmax.f32 %v2827_v56, 0.0 }
 0x50d   : > { %v2954_v52 = vpop.f32.mrf.mxu1 }
 0x50e   : > { %v4675_v17 = vmax.f32 %v4674_v45, %v3282_v24  ;;  %v4825_v59 = vmax.f32 %v4824_v23, %v3396_v61  ;;  %v2955_v22 = vadd.f32 %v2954_v52, %v7700_v9  ;;  %2497 = vmatmul.bf16.gmra.mxu2 %v6924_v46 }
 0x50f   : > { %v2658_v53 = vpop.f32.mrf.mxu3 }
 0x510   : > { %v3269_v5 = vmax.f32 %v2955_v22, 0.0  ;;  %v2659_v40 = vadd.f32 %v2658_v53, %v7592_v0 }
 0x511   : > { %v2458_v62 = vpop.f32.mrf.mxu2  ;;  %v2829_v38 = vpop.f32.mrf.mxu0 }
 0x512   : > { %v4877_v13 = vmax.f32 %v4876_v42, %v3269_v5  ;;  %v3395_v58 = vmax.f32 %v2659_v40, 0.0  ;;  %v2459_v39 = vadd.f32 %v2458_v62, %v7678_v48  ;;  %v2830_v50 = vadd.f32 %v2829_v38, %v7584_v36 }
 0x514   : > { %v4757_v19 = vmax.f32 %v4756_v18, %v3395_v58  ;;  %v3290_v32 = vmax.f32 %v2459_v39, 0.0  ;;  %v3404_v55 = vmax.f32 %v2830_v50, 0.0  ;;  %2700 = vmatmul.bf16.gmra.mxu3 %v7078_v8  ;;  %2868 = vmatmul.bf16.gmra.mxu0 %v7078_v8 }
 0x515   : > { %v2957_v29 = vpop.f32.mrf.mxu1 }
 0x516   : > { %v4676_v25 = vmax.f32 %v4675_v17, %v3290_v32  ;;  %v4826_v4 = vmax.f32 %v4825_v59, %v3404_v55  ;;  %v2958_v37 = vadd.f32 %v2957_v29, %v7700_v9 }
 0x517   : > { %v2661_v44 = vpop.f32.mrf.mxu3 }
 0x518   : > { %v3277_v63 = vmax.f32 %v2958_v37, 0.0  ;;  %v2662_v26 = vadd.f32 %v2661_v44, %v7592_v0  ;;  %2996 = vmatmul.bf16.gmra.mxu1 %v6889_v11 }
 0x519   : > { %v2460_v41 = vpop.f32.mrf.mxu2  ;;  %v2831_v34 = vpop.f32.mrf.mxu0 }
 0x51a   : > { %v4878_v33 = vmax.f32 %v4877_v13, %v3277_v63  ;;  %v3403_v6 = vmax.f32 %v2662_v26, 0.0  ;;  %v2461_v16 = vadd.f32 %v2460_v41, %v7678_v48  ;;  %v2832_v2 = vadd.f32 %v2831_v34, %v7584_v36 }
 0x51c   : > { %v4758_v60 = vmax.f32 %v4757_v19, %v3403_v6  ;;  %v3298_v3 = vmax.f32 %v2461_v16, 0.0  ;;  %v3412_v51 = vmax.f32 %v2832_v2, 0.0 }
 0x51d   : > { %v2959_v12 = vpop.f32.mrf.mxu1 }
 0x51e   : > { %v4677_v45 = vmax.f32 %v4676_v25, %v3298_v3  ;;  %v4827_v23 = vmax.f32 %v4826_v4, %v3412_v51  ;;  %v2960_v20 = vadd.f32 %v2959_v12, %v7700_v9  ;;  %2502 = vmatmul.bf16.gmra.mxu2 %v6939_v10 }
 0x51f   : > { %v2663_v31 = vpop.f32.mrf.mxu3 }
 0x520   : > { %v3285_v11 = vmax.f32 %v2960_v20, 0.0  ;;  %v2664_v21 = vadd.f32 %v2663_v31, %v7592_v0 }
 0x521   : > { %v2463_v1 = vpop.f32.mrf.mxu2  ;;  %v2834_v54 = vpop.f32.mrf.mxu0 }
 0x522   : > { %v4879_v49 = vmax.f32 %v4878_v33, %v3285_v11  ;;  %v3411_v42 = vmax.f32 %v2664_v21, 0.0  ;;  %v2464_v14 = vadd.f32 %v2463_v1, %v7678_v48  ;;  %v2835_v35 = vadd.f32 %v2834_v54, %v7584_v36 }
 0x524   : > { %v4759_v56 = vmax.f32 %v4758_v60, %v3411_v42  ;;  %v3306_v18 = vmax.f32 %v2464_v14, 0.0  ;;  %v3420_v24 = vmax.f32 %v2835_v35, 0.0  ;;  %2705 = vmatmul.bf16.gmra.mxu3 %v7444_v57  ;;  %2873 = vmatmul.bf16.gmra.mxu0 %v7444_v57 }
 0x525   : > { %v2962_v61 = vpop.f32.mrf.mxu1 }
 0x526   : > { %v4678_v52 = vmax.f32 %v4677_v45, %v3306_v18  ;;  %v4828_v17 = vmax.f32 %v4827_v23, %v3420_v24  ;;  %v2963_v59 = vadd.f32 %v2962_v61, %v7700_v9 }
 0x527   : > { %v2666_v22 = vpop.f32.mrf.mxu3 }
 0x528   : > { %v3293_v53 = vmax.f32 %v2963_v59, 0.0  ;;  %v2667_v5 = vadd.f32 %v2666_v22, %v7592_v0  ;;  %3001 = vmatmul.bf16.gmra.mxu1 %v6924_v46 }
 0x529   : > { %v2465_v40 = vpop.f32.mrf.mxu2  ;;  %v2836_v62 = vpop.f32.mrf.mxu0 }
 0x52a   : > { %v4880_v38 = vmax.f32 %v4879_v49, %v3293_v53  ;;  %v3419_v13 = vmax.f32 %v2667_v5, 0.0  ;;  %v2466_v58 = vadd.f32 %v2465_v40, %v7678_v48  ;;  %v2837_v39 = vadd.f32 %v2836_v62, %v7584_v36 }
 0x52c   : > { %v4760_v50 = vmax.f32 %v4759_v56, %v3419_v13  ;;  %v3314_v19 = vmax.f32 %v2466_v58, 0.0  ;;  %v3428_v32 = vmax.f32 %v2837_v39, 0.0 }
 0x52d   : > { %v2964_v55 = vpop.f32.mrf.mxu1 }
 0x52e   : > { %v4679_v29 = vmax.f32 %v4678_v52, %v3314_v19  ;;  %v4829_v25 = vmax.f32 %v4828_v17, %v3428_v32  ;;  %v2965_v4 = vadd.f32 %v2964_v55, %v7700_v9  ;;  %2507 = vmatmul.bf16.gmra.mxu2 %v6965_v43 }
 0x52f   : > { %v2668_v37 = vpop.f32.mrf.mxu3 }
 0x530   : > { %v3301_v46 = vmax.f32 %v2965_v4, 0.0  ;;  %v2669_v44 = vadd.f32 %v2668_v37, %v7592_v0 }
 0x531   : > { %v2468_v63 = vpop.f32.mrf.mxu2  ;;  %v2839_v26 = vpop.f32.mrf.mxu0 }
 0x532   : > { %v4881_v41 = vmax.f32 %v4880_v38, %v3301_v46  ;;  %v3427_v34 = vmax.f32 %v2669_v44, 0.0  ;;  %v2469_v33 = vadd.f32 %v2468_v63, %v7678_v48  ;;  %v2840_v6 = vadd.f32 %v2839_v26, %v7584_v36 }
 0x534   : > { %v4761_v16 = vmax.f32 %v4760_v50, %v3427_v34  ;;  %v3322_v2 = vmax.f32 %v2469_v33, 0.0  ;;  %v3436_v60 = vmax.f32 %v2840_v6, 0.0  ;;  %3041 = vmatmul.bf16.vlgmr.msrb.gmra.mxu3 %v7444_v57 }
 0x535   : > { %v2967_v3 = vpop.f32.mrf.mxu1 }
 0x536   : > { %v4680_v51 = vmax.f32 %v4679_v29, %v3322_v2  ;;  %v4830_v12 = vmax.f32 %v4829_v25, %v3436_v60  ;;  %v2968_v45 = vadd.f32 %v2967_v3, %v7700_v9 }
 0x537   : > { %v2671_v23 = vpop.f32.mrf.mxu3 }
 0x538   : > { %v3309_v20 = vmax.f32 %v2968_v45, 0.0  ;;  %v2672_v31 = vadd.f32 %v2671_v23, %v7592_v0  ;;  %3006 = vmatmul.bf16.gmra.mxu1 %v6939_v10 }
 0x539   : > { %v2470_v11 = vpop.f32.mrf.mxu2  ;;  %v2841_v21 = vpop.f32.mrf.mxu0 }
 0x53a   : > { %v4882_v1 = vmax.f32 %v4881_v41, %v3309_v20  ;;  %v3435_v54 = vmax.f32 %v2672_v31, 0.0  ;;  %v2471_v49 = vadd.f32 %v2470_v11, %v7678_v48  ;;  %v2842_v42 = vadd.f32 %v2841_v21, %v7584_v36 }
 0x53c   : > { %v4762_v14 = vmax.f32 %v4761_v16, %v3435_v54  ;;  %v3330_v35 = vmax.f32 %v2471_v49, 0.0  ;;  %v3444_v56 = vmax.f32 %v2842_v42, 0.0 }
 0x53d   : > { %v2969_v18 = vpop.f32.mrf.mxu1 }
 0x53e   : > { %v4681_v24 = vmax.f32 %v4680_v51, %v3330_v35  ;;  %v4831_v61 = vmax.f32 %v4830_v12, %v3444_v56  ;;  %v2970_v52 = vadd.f32 %v2969_v18, %v7700_v9  ;;  %2512 = vmatmul.bf16.gmra.mxu2 %v6987_v30 }
 0x53f   : > { %v2673_v17 = vpop.f32.mrf.mxu3 }
 0x540   : > { %v3317_v10 = vmax.f32 %v2970_v52, 0.0  ;;  %v2674_v59 = vadd.f32 %v2673_v17, %v7592_v0 }
 0x541   : > { %v2473_v22 = vpop.f32.mrf.mxu2  ;;  %v2844_v53 = vpop.f32.mrf.mxu0 }
 0x542   : > { %v4883_v5 = vmax.f32 %v4882_v1, %v3317_v10  ;;  %v3443_v40 = vmax.f32 %v2674_v59, 0.0  ;;  %v2474_v62 = vadd.f32 %v2473_v22, %v7678_v48  ;;  %v2845_v38 = vadd.f32 %v2844_v53, %v7584_v36 }
 0x544   : > { %v4763_v13 = vmax.f32 %v4762_v14, %v3443_v40  ;;  %v3338_v58 = vmax.f32 %v2474_v62, 0.0  ;;  %v3452_v39 = vmax.f32 %v2845_v38, 0.0 }
 0x545   : > { %v2972_v50 = vpop.f32.mrf.mxu1 }
 0x546   : > { %v4682_v19 = vmax.f32 %v4681_v24, %v3338_v58  ;;  %v4832_v32 = vmax.f32 %v4831_v61, %v3452_v39  ;;  %v2973_v55 = vadd.f32 %v2972_v50, %v7700_v9 }
 0x547   : > { %v2676_v29 = vpop.f32.mrf.mxu3 }
 0x548   : > { %v3325_v25 = vmax.f32 %v2973_v55, 0.0  ;;  %v2677_v4 = vadd.f32 %v2676_v29, %v7592_v0  ;;  %3011 = vmatmul.bf16.gmra.mxu1 %v6965_v43 }
 0x549   : > { %v2475_v37 = vpop.f32.mrf.mxu2  ;;  %v2846_v46 = vpop.f32.mrf.mxu0 }
 0x54a   : > { %v4884_v44 = vmax.f32 %v4883_v5, %v3325_v25  ;;  %v3451_v63 = vmax.f32 %v2677_v4, 0.0  ;;  %v2476_v26 = vadd.f32 %v2475_v37, %v7678_v48  ;;  %v2847_v41 = vadd.f32 %v2846_v46, %v7584_v36 }
 0x54c   : > { %v4764_v34 = vmax.f32 %v4763_v13, %v3451_v63  ;;  %v3346_v33 = vmax.f32 %v2476_v26, 0.0  ;;  %v3460_v6 = vmax.f32 %v2847_v41, 0.0 }
 0x54d   : > { %v2974_v16 = vpop.f32.mrf.mxu1 }
 0x54e   : > { %v4683_v2 = vmax.f32 %v4682_v19, %v3346_v33  ;;  %v4833_v60 = vmax.f32 %v4832_v32, %v3460_v6  ;;  %v2975_v3 = vadd.f32 %v2974_v16, %v7700_v9  ;;  %2517 = vmatmul.bf16.gmra.mxu2 %v7023_v28 }
 0x54f   : > { %v2678_v51 = vpop.f32.mrf.mxu3 }
 0x550   : > { %v3333_v43 = vmax.f32 %v2975_v3, 0.0  ;;  %v2679_v12 = vadd.f32 %v2678_v51, %v7592_v0 }
 0x551   : > { %v2478_v45 = vpop.f32.mrf.mxu2  ;;  %v2849_v23 = vpop.f32.mrf.mxu0 }
 0x552   : > { %v4885_v20 = vmax.f32 %v4884_v44, %v3333_v43  ;;  %v3459_v31 = vmax.f32 %v2679_v12, 0.0  ;;  %v2479_v11 = vadd.f32 %v2478_v45, %v7678_v48  ;;  %v2850_v21 = vadd.f32 %v2849_v23, %v7584_v36 }
 0x554   : > { %v4765_v1 = vmax.f32 %v4764_v34, %v3459_v31  ;;  %v3354_v54 = vmax.f32 %v2479_v11, 0.0  ;;  %v3468_v49 = vmax.f32 %v2850_v21, 0.0 }
 0x555   : > { %v2977_v42 = vpop.f32.mrf.mxu1 }
 0x556   : > { %v4684_v14 = vmax.f32 %v4683_v2, %v3354_v54  ;;  %v4834_v35 = vmax.f32 %v4833_v60, %v3468_v49  ;;  %v2978_v56 = vadd.f32 %v2977_v42, %v7700_v9 }
 0x557   : > { %v2681_v18 = vpop.f32.mrf.mxu3 }
 0x558   : > { %v3341_v24 = vmax.f32 %v2978_v56, 0.0  ;;  %v2682_v61 = vadd.f32 %v2681_v18, %v7592_v0  ;;  %3016 = vmatmul.bf16.gmra.mxu1 %v6987_v30 }
 0x559   : > { %v2480_v52 = vpop.f32.mrf.mxu2  ;;  %v2851_v17 = vpop.f32.mrf.mxu0 }
 0x55a   : > { %v4886_v10 = vmax.f32 %v4885_v20, %v3341_v24  ;;  %v3467_v59 = vmax.f32 %v2682_v61, 0.0  ;;  %v2481_v22 = vadd.f32 %v2480_v52, %v7678_v48  ;;  %v2852_v53 = vadd.f32 %v2851_v17, %v7584_v36 }
 0x55c   : > { %v4766_v5 = vmax.f32 %v4765_v1, %v3467_v59  ;;  %v3362_v40 = vmax.f32 %v2481_v22, 0.0  ;;  %v3476_v62 = vmax.f32 %v2852_v53, 0.0 }
 0x55d   : > { %v2979_v38 = vpop.f32.mrf.mxu1 }
 0x55e   : > { %v4685_v13 = vmax.f32 %v4684_v14, %v3362_v40  ;;  %v4835_v58 = vmax.f32 %v4834_v35, %v3476_v62  ;;  %v2980_v39 = vadd.f32 %v2979_v38, %v7700_v9  ;;  %2522 = vmatmul.bf16.gmra.mxu2 %v7040_v15 }
 0x55f   : > { %v2683_v50 = vpop.f32.mrf.mxu3 }
 0x560   : > { %v3349_v30 = vmax.f32 %v2980_v39, 0.0  ;;  %v2684_v19 = vadd.f32 %v2683_v50, %v7592_v0 }
 0x561   : > { %v2483_v32 = vpop.f32.mrf.mxu2  ;;  %v2854_v55 = vpop.f32.mrf.mxu0 }
 0x562   : > { %v4887_v29 = vmax.f32 %v4886_v10, %v3349_v30  ;;  %v3475_v25 = vmax.f32 %v2684_v19, 0.0  ;;  %v2484_v4 = vadd.f32 %v2483_v32, %v7678_v48  ;;  %v2855_v37 = vadd.f32 %v2854_v55, %v7584_v36 }
 0x564   : > { %v4767_v46 = vmax.f32 %v4766_v5, %v3475_v25  ;;  %v3370_v44 = vmax.f32 %v2484_v4, 0.0  ;;  %v3484_v63 = vmax.f32 %v2855_v37, 0.0 }
 0x565   : > { %v2982_v26 = vpop.f32.mrf.mxu1 }
 0x566   : > { %v4686_v41 = vmax.f32 %v4685_v13, %v3370_v44  ;;  %v4836_v34 = vmax.f32 %v4835_v58, %v3484_v63  ;;  %v2983_v33 = vadd.f32 %v2982_v26, %v7700_v9 }
 0x567   : > { %v2686_v6 = vpop.f32.mrf.mxu3 }
 0x568   : > { %v3357_v16 = vmax.f32 %v2983_v33, 0.0  ;;  %v2687_v2 = vadd.f32 %v2686_v6, %v7592_v0  ;;  %3021 = vmatmul.bf16.gmra.mxu1 %v7023_v28 }
 0x569   : > { %v2485_v60 = vpop.f32.mrf.mxu2  ;;  %v2856_v3 = vpop.f32.mrf.mxu0 }
 0x56a   : > { %v4888_v51 = vmax.f32 %v4887_v29, %v3357_v16  ;;  %v3483_v43 = vmax.f32 %v2687_v2, 0.0  ;;  %v2486_v12 = vadd.f32 %v2485_v60, %v7678_v48  ;;  %v2857_v45 = vadd.f32 %v2856_v3, %v7584_v36 }
 0x56c   : > { %v4768_v23 = vmax.f32 %v4767_v46, %v3483_v43  ;;  %v3378_v20 = vmax.f32 %v2486_v12, 0.0  ;;  %v3492_v31 = vmax.f32 %v2857_v45, 0.0 }
 0x56d   : > { %v2984_v11 = vpop.f32.mrf.mxu1 }
 0x56e   : > { %v4687_v21 = vmax.f32 %v4686_v41, %v3378_v20  ;;  %v4837_v1 = vmax.f32 %v4836_v34, %v3492_v31  ;;  %v2985_v54 = vadd.f32 %v2984_v11, %v7700_v9  ;;  %2527 = vmatmul.bf16.gmra.mxu2 %v7056_v7 }
 0x56f   : > { %v2688_v49 = vpop.f32.mrf.mxu3 }
 0x570   : > { %v3365_v28 = vmax.f32 %v2985_v54, 0.0  ;;  %v2689_v42 = vadd.f32 %v2688_v49, %v7592_v0 }
 0x571   : > { %v2488_v14 = vpop.f32.mrf.mxu2  ;;  %v2859_v35 = vpop.f32.mrf.mxu0 }
 0x572   : > { %v4889_v56 = vmax.f32 %v4888_v51, %v3365_v28  ;;  %v3491_v18 = vmax.f32 %v2689_v42, 0.0  ;;  %v2489_v24 = vadd.f32 %v2488_v14, %v7678_v48  ;;  %v2860_v61 = vadd.f32 %v2859_v35, %v7584_v36 }
 0x574   : > { %v4769_v52 = vmax.f32 %v4768_v23, %v3491_v18  ;;  %v3386_v17 = vmax.f32 %v2489_v24, 0.0  ;;  %v3500_v10 = vmax.f32 %v2860_v61, 0.0 }
 0x575   : > { %v2987_v59 = vpop.f32.mrf.mxu1 }
 0x576   : > { %v4688_v22 = vmax.f32 %v4687_v21, %v3386_v17  ;;  %v4838_v53 = vmax.f32 %v4837_v1, %v3500_v10  ;;  %v2988_v5 = vadd.f32 %v2987_v59, %v7700_v9 }
 0x577   : > { %v2691_v40 = vpop.f32.mrf.mxu3 }
 0x578   : > { %v3373_v62 = vmax.f32 %v2988_v5, 0.0  ;;  %v2692_v38 = vadd.f32 %v2691_v40, %v7592_v0  ;;  %3026 = vmatmul.bf16.gmra.mxu1 %v7040_v15 }
 0x579   : > { %v2490_v13 = vpop.f32.mrf.mxu2  ;;  %v2861_v58 = vpop.f32.mrf.mxu0 }
 0x57a   : > { %v4890_v39 = vmax.f32 %v4889_v56, %v3373_v62  ;;  %v3499_v50 = vmax.f32 %v2692_v38, 0.0  ;;  %v2491_v30 = vadd.f32 %v2490_v13, %v7678_v48  ;;  %v2862_v19 = vadd.f32 %v2861_v58, %v7584_v36 }
 0x57c   : > { %v4770_v32 = vmax.f32 %v4769_v52, %v3499_v50  ;;  %v3394_v55 = vmax.f32 %v2491_v30, 0.0  ;;  %v3508_v29 = vmax.f32 %v2862_v19, 0.0 }
 0x57d   : > { %v2989_v25 = vpop.f32.mrf.mxu1 }
 0x57e   : > { %v4689_v4 = vmax.f32 %v4688_v22, %v3394_v55  ;;  %v4839_v37 = vmax.f32 %v4838_v53, %v3508_v29  ;;  %v2990_v46 = vadd.f32 %v2989_v25, %v7700_v9  ;;  %2532 = vmatmul.bf16.gmra.mxu2 %v7078_v8 }
 0x57f   : > { %v2693_v44 = vpop.f32.mrf.mxu3 }
 0x580   : > { %v3381_v15 = vmax.f32 %v2990_v46, 0.0  ;;  %v2694_v63 = vadd.f32 %v2693_v44, %v7592_v0 }
 0x581   : > { %v2493_v26 = vpop.f32.mrf.mxu2  ;;  %v2864_v41 = vpop.f32.mrf.mxu0 }
 0x582   : > { %v4891_v34 = vmax.f32 %v4890_v39, %v3381_v15  ;;  %v3507_v33 = vmax.f32 %v2694_v63, 0.0  ;;  %v2494_v6 = vadd.f32 %v2493_v26, %v7678_v48  ;;  %v2865_v16 = vadd.f32 %v2864_v41, %v7584_v36 }
 0x584   : > { %v4771_v2 = vmax.f32 %v4770_v32, %v3507_v33  ;;  %v3402_v60 = vmax.f32 %v2494_v6, 0.0  ;;  %v3516_v3 = vmax.f32 %v2865_v16, 0.0 }
 0x585   : > { %v2992_v51 = vpop.f32.mrf.mxu1 }
 0x586   : > { %v4690_v43 = vmax.f32 %v4689_v4, %v3402_v60  ;;  %v4840_v12 = vmax.f32 %v4839_v37, %v3516_v3  ;;  %v2993_v45 = vadd.f32 %v2992_v51, %v7700_v9 }
 0x587   : > { %v2696_v23 = vpop.f32.mrf.mxu3 }
 0x588   : > { %v3389_v20 = vmax.f32 %v2993_v45, 0.0  ;;  %v2697_v31 = vadd.f32 %v2696_v23, %v7592_v0  ;;  %3031 = vmatmul.bf16.gmra.mxu1 %v7056_v7 }
 0x589   : > { %v2495_v11 = vpop.f32.mrf.mxu2  ;;  %v2866_v21 = vpop.f32.mrf.mxu0 }
 0x58a   : > { %v4892_v1 = vmax.f32 %v4891_v34, %v3389_v20  ;;  %v3515_v54 = vmax.f32 %v2697_v31, 0.0  ;;  %v2496_v49 = vadd.f32 %v2495_v11, %v7678_v48  ;;  %v2867_v28 = vadd.f32 %v2866_v21, %v7584_v36 }
 0x58c   : > { %v4772_v42 = vmax.f32 %v4771_v2, %v3515_v54  ;;  %v3410_v14 = vmax.f32 %v2496_v49, 0.0  ;;  %v3524_v35 = vmax.f32 %v2867_v28, 0.0 }
 0x58d   : > { %v2994_v56 = vpop.f32.mrf.mxu1 }
 0x58e   : > { %v4691_v18 = vmax.f32 %v4690_v43, %v3410_v14  ;;  %v4841_v24 = vmax.f32 %v4840_v12, %v3524_v35  ;;  %v2995_v61 = vadd.f32 %v2994_v56, %v7700_v9  ;;  %2537 = vmatmul.bf16.gmra.mxu2 %v7444_v57 }
 0x58f   : > { %v2698_v52 = vpop.f32.mrf.mxu3 }
 0x590   : > { %v3397_v7 = vmax.f32 %v2995_v61, 0.0  ;;  %v2699_v17 = vadd.f32 %v2698_v52, %v7592_v0 }
 0x591   : > { %v2498_v10 = vpop.f32.mrf.mxu2  ;;  %v2869_v59 = vpop.f32.mrf.mxu0 }
 0x592   : > { %v4893_v22 = vmax.f32 %v4892_v1, %v3397_v7  ;;  %v3523_v53 = vmax.f32 %v2699_v17, 0.0  ;;  %v2499_v5 = vadd.f32 %v2498_v10, %v7678_v48  ;;  %v2870_v40 = vadd.f32 %v2869_v59, %v7584_v36 }
 0x594   : > { %v4773_v62 = vmax.f32 %v4772_v42, %v3523_v53  ;;  %v3418_v38 = vmax.f32 %v2499_v5, 0.0  ;;  %v3532_v13 = vmax.f32 %v2870_v40, 0.0 }
 0x595   : > { %v2997_v58 = vpop.f32.mrf.mxu1 }
 0x596   : > { %v4692_v39 = vmax.f32 %v4691_v18, %v3418_v38  ;;  %v4842_v50 = vmax.f32 %v4841_v24, %v3532_v13  ;;  %v2998_v57 = vadd.f32 %v2997_v58, %v7700_v9 }
 0x597   : > { %v2701_v30 = vpop.f32.mrf.mxu3 }
 0x598   : > { %v3405_v19 = vmax.f32 %v2998_v57, 0.0  ;;  %v2702_v32 = vadd.f32 %v2701_v30, %v7592_v0  ;;  %3036 = vmatmul.bf16.gmra.mxu1 %v7078_v8 }
 0x599   : > { %v2500_v55 = vpop.f32.mrf.mxu2  ;;  %v2871_v29 = vpop.f32.mrf.mxu0 }
 0x59a   : > { %v4894_v25 = vmax.f32 %v4893_v22, %v3405_v19  ;;  %v3531_v4 = vmax.f32 %v2702_v32, 0.0  ;;  %v2501_v37 = vadd.f32 %v2500_v55, %v7678_v48  ;;  %v2872_v46 = vadd.f32 %v2871_v29, %v7584_v36 }
 0x59c   : > { %v4774_v44 = vmax.f32 %v4773_v62, %v3531_v4  ;;  %v3426_v15 = vmax.f32 %v2501_v37, 0.0  ;;  %v3540_v63 = vmax.f32 %v2872_v46, 0.0 }
 0x59d   : > { %v2999_v26 = vpop.f32.mrf.mxu1 }
 0x59e   : > { %v4693_v41 = vmax.f32 %v4692_v39, %v3426_v15  ;;  %v4843_v34 = vmax.f32 %v4842_v50, %v3540_v63  ;;  %v3000_v33 = vadd.f32 %v2999_v26, %v7700_v9 }
 0x59f   : > { %v2703_v6 = vpop.f32.mrf.mxu3 }
 0x5a0   : > { %v3413_v16 = vmax.f32 %v3000_v33, 0.0  ;;  %v2704_v8 = vadd.f32 %v2703_v6, %v7592_v0 }
 0x5a1   : > { %v2503_v2 = vpop.f32.mrf.mxu2  ;;  %v2874_v60 = vpop.f32.mrf.mxu0 }
 0x5a2   : > { %v4895_v3 = vmax.f32 %v4894_v25, %v3413_v16  ;;  %v3539_v51 = vmax.f32 %v2704_v8, 0.0  ;;  %v2504_v43 = vadd.f32 %v2503_v2, %v7678_v48  ;;  %v2875_v12 = vadd.f32 %v2874_v60, %v7584_v36 }
 0x5a4   : > { %v4775_v45 = vmax.f32 %v4774_v44, %v3539_v51  ;;  %v3434_v23 = vmax.f32 %v2504_v43, 0.0  ;;  %v3548_v20 = vmax.f32 %v2875_v12, 0.0 }
 0x5a5   : > { %v3002_v31 = vpop.f32.mrf.mxu1 }
 0x5a6   : > { %v4694_v11 = vmax.f32 %v4693_v41, %v3434_v23  ;;  %v4373_v21 = vsel %vm3744_vm2, %v3548_v20, -inf  ;;  %v3003_v1 = vadd.f32 %v3002_v31, %v7700_v9 }
 0x5a7   : > { %v7968_v54 = vmax.f32 %v4843_v34, %v4373_v21  ;;  %v2706_v49 = vpop.f32.mrf.mxu3 }
 0x5a8   : > { %v3421_v28 = vmax.f32 %v3003_v1, 0.0  ;;  %v2707_v42 = vadd.f32 %v2706_v49, %v7592_v0 }
 0x5a9   : > { %v2505_v14 = vpop.f32.mrf.mxu2  ;;  %v2876_v35 = vpop.f32.mrf.mxu0 }
 0x5aa   : > { %v4896_v56 = vmax.f32 %v4895_v3, %v3421_v28  ;;  %v3547_v36 = vmax.f32 %v2707_v42, 0.0  ;;  %v2506_v18 = vadd.f32 %v2505_v14, %v7678_v48 }
 0x5ac   : > { %v4372_v24 = vsel %vm3744_vm2, %v3547_v36, -inf  ;;  %v3442_v61 = vmax.f32 %v2506_v18, 0.0 }
 0x5ad   : > { %v7974_v52 = vmax.f32 %v4775_v45, %v4372_v24  ;;  %v3004_v7 = vpop.f32.mrf.mxu1 }
 0x5ae   : > { %v4695_v17 = vmax.f32 %v4694_v11, %v3442_v61  ;;  %v3005_v10 = vadd.f32 %v3004_v7, %v7700_v9 }
 0x5af   : > { %v2708_v59 = vpop.f32.mrf.mxu3 }
 0x5b0   : > { %v3429_v22 = vmax.f32 %v3005_v10, 0.0 }
 0x5b1   : > { %v2508_v53 = vpop.f32.mrf.mxu2 }
 0x5b2   : > { %v4897_v0 = vmax.f32 %v4896_v56, %v3429_v22  ;;  %v2509_v5 = vadd.f32 %v2508_v53, %v7678_v48 }
 0x5b4   : > { %v3450_v40 = vmax.f32 %v2509_v5, 0.0 }
 0x5b5   : > { %v3007_v62 = vpop.f32.mrf.mxu1 }
 0x5b6   : > { %v4696_v38 = vmax.f32 %v4695_v17, %v3450_v40  ;;  %v3008_v13 = vadd.f32 %v3007_v62, %v7700_v9 }
 0x5b7   : > { %v7979_v58 = vpop.f32.mrf.mxu3 }
 0x5b8   : > { %v3437_v39 = vmax.f32 %v3008_v13, 0.0 }
 0x5b9   : > { %v2510_v50 = vpop.f32.mrf.mxu2 }
 0x5ba   : > { %v4898_v57 = vmax.f32 %v4897_v0, %v3437_v39  ;;  %v2511_v30 = vadd.f32 %v2510_v50, %v7678_v48 }
 0x5bc   : > { %v3458_v19 = vmax.f32 %v2511_v30, 0.0  ;;  %v4777_v30 = vrot.slane %v7974_v52, 4 }
 0x5bd   : > { %v3009_v32 = vpop.f32.mrf.mxu1 }
 0x5be   : > { %v4697_v55 = vmax.f32 %v4696_v38, %v3458_v19  ;;  %v3010_v29 = vadd.f32 %v3009_v32, %v7700_v9 }
 0x5bf   : > { %v3044_v25 = vpop.f32.mrf.mxu3 }
 0x5c0   : > { %v3445_v4 = vmax.f32 %v3010_v29, 0.0 }
 0x5c1   : > { %v2513_v37 = vpop.f32.mrf.mxu2 }
 0x5c2   : > { %v4899_v46 = vmax.f32 %v4898_v57, %v3445_v4  ;;  %v2514_v44 = vadd.f32 %v2513_v37, %v7678_v48 }
 0x5c4   : > { %v3466_v15 = vmax.f32 %v2514_v44, 0.0 }
 0x5c5   : > { %v3012_v63 = vpop.f32.mrf.mxu1 }
 0x5c6   : > { %v4698_v26 = vmax.f32 %v4697_v55, %v3466_v15  ;;  %v3013_v41 = vadd.f32 %v3012_v63, %v7700_v9 }
 0x5c8   : > { %v3453_v34 = vmax.f32 %v3013_v41, 0.0  ;;  %v4778_v41 = vmax.f32 %v7974_v52, %v4777_v30 }
 0x5c9   : > { %v2515_v33 = vpop.f32.mrf.mxu2 }
 0x5ca   : > { %v4900_v6 = vmax.f32 %v4899_v46, %v3453_v34  ;;  %v2516_v16 = vadd.f32 %v2515_v33, %v7678_v48 }
 0x5cc   : > { %v3474_v8 = vmax.f32 %v2516_v16, 0.0 }
 0x5cd   : > { %v3014_v2 = vpop.f32.mrf.mxu1 }
 0x5ce   : > { %v4699_v60 = vmax.f32 %v4698_v26, %v3474_v8  ;;  %v3015_v61 = vadd.f32 %v3014_v2, %v7700_v9 }
 0x5d0   : > { %v3461_v40 = vmax.f32 %v3015_v61, 0.0  ;;  %v3043_v61 = vadd.f32 %v7979_v58, %v7700_v9 }
 0x5d1   : > { %v2518_v3 = vpop.f32.mrf.mxu2 }
 0x5d2   : > { %v2519_v28 = vadd.f32 %v2518_v3, %v7678_v48  ;;  %v4901_v25 = vmax.f32 %v4900_v6, %v3461_v40 }
 0x5d4   : > { %v3482_v35 = vmax.f32 %v2519_v28, 0.0 }
 0x5d5   : > { %v3017_v51 = vpop.f32.mrf.mxu1 }
 0x5d6   : > { %v4700_v7 = vmax.f32 %v4699_v60, %v3482_v35  ;;  %v3018_v59 = vadd.f32 %v3017_v51, %v7700_v9 }
 0x5d8   : > { %v3469_v50 = vmax.f32 %v3018_v59, 0.0 }
 0x5d9   : > { %v2520_v43 = vpop.f32.mrf.mxu2 }
 0x5da   : > { %v2521_v42 = vadd.f32 %v2520_v43, %v7678_v48  ;;  %v4902_v15 = vmax.f32 %v4901_v25, %v3469_v50 }
 0x5dc   : > { %v3490_v36 = vmax.f32 %v2521_v42, 0.0 }
 0x5dd   : > { %v3019_v12 = vpop.f32.mrf.mxu1 }
 0x5de   : > { %v4701_v22 = vmax.f32 %v4700_v7, %v3490_v36  ;;  %v3020_v62 = vadd.f32 %v3019_v12, %v7700_v9  ;;  %v4845_v36 = vrot.slane %v7968_v54, 4 }
 0x5e0   : > { %v3477_v4 = vmax.f32 %v3020_v62, 0.0  ;;  %v3549_v62 = vmax.f32 %v3043_v61, 0.0 }
 0x5e1   : > { %v2523_v45 = vpop.f32.mrf.mxu2 }
 0x5e2   : > { %v2524_v56 = vadd.f32 %v2523_v45, %v7678_v48  ;;  %v4903_v8 = vmax.f32 %v4902_v15, %v3477_v4 }
 0x5e4   : > { %v3498_v17 = vmax.f32 %v2524_v56, 0.0 }
 0x5e5   : > { %v3022_v23 = vpop.f32.mrf.mxu1 }
 0x5e6   : > { %v4702_v38 = vmax.f32 %v4701_v22, %v3498_v17  ;;  %v3023_v57 = vadd.f32 %v3022_v23, %v7700_v9  ;;  %v4779_v23 = vrot.slane %v4778_v41, 2 }
 0x5e8   : > { %v3485_v63 = vmax.f32 %v3023_v57, 0.0 }
 0x5e9   : > { %v2525_v20 = vpop.f32.mrf.mxu2 }
 0x5ea   : > { %v2526_v18 = vadd.f32 %v2525_v20, %v7678_v48  ;;  %v4904_v51 = vmax.f32 %v4903_v8, %v3485_v63 }
 0x5ec   : > { %v3506_v53 = vmax.f32 %v2526_v18, 0.0 }
 0x5ed   : > { %v3024_v31 = vpop.f32.mrf.mxu1 }
 0x5ee   : > { %v4703_v19 = vmax.f32 %v4702_v38, %v3506_v53  ;;  %v3025_v37 = vadd.f32 %v3024_v31, %v7700_v9 }
 0x5f0   : > { %v3493_v2 = vmax.f32 %v3025_v37, 0.0 }
 0x5f1   : > { %v2528_v11 = vpop.f32.mrf.mxu2 }
 0x5f2   : > { %v2529_v10 = vadd.f32 %v2528_v11, %v7678_v48  ;;  %v4905_v11 = vmax.f32 %v4904_v51, %v3493_v2 }
 0x5f4   : > { %v3514_v13 = vmax.f32 %v2529_v10, 0.0 }
 0x5f5   : > { %v3027_v21 = vpop.f32.mrf.mxu1 }
 0x5f6   : > { %v4704_v46 = vmax.f32 %v4703_v19, %v3514_v13  ;;  %v3028_v26 = vadd.f32 %v3027_v21, %v7700_v9  ;;  %v4374_v19 = vsel %vm3744_vm2, %v3549_v62, -inf }
 0x5f8   : > { %v3501_v43 = vmax.f32 %v3028_v26, 0.0 }
 0x5f9   : > { %v2530_v1 = vpop.f32.mrf.mxu2 }
 0x5fa   : > { %v2531_v0 = vadd.f32 %v2530_v1, %v7678_v48 }
 0x5fc   : > { %v3522_v32 = vmax.f32 %v2531_v0, 0.0  ;;  %v4846_v0 = vmax.f32 %v7968_v54, %v4845_v36 }
 0x5fd   : > { %v3029_v49 = vpop.f32.mrf.mxu1 }
 0x5fe   : > { %v4705_v34 = vmax.f32 %v4704_v46, %v3522_v32  ;;  %v3030_v60 = vadd.f32 %v3029_v49, %v7700_v9  ;;  %v4906_v49 = vmax.f32 %v4905_v11, %v3501_v43  ;;  %v4847_v30 = vrot.slane %v4846_v0, 2 }
 0x600   : > { %v3509_v52 = vmax.f32 %v3030_v60, 0.0  ;;  %v4848_v25 = vmax.f32 %v4846_v0, %v4847_v30 }
 0x601   : > { %v2533_v14 = vpop.f32.mrf.mxu2 }
 0x602   : > { %v2534_v39 = vadd.f32 %v2533_v14, %v7678_v48  ;;  %v4780_v14 = vmax.f32 %v4778_v41, %v4779_v23  ;;  %v4907_v18 = vmax.f32 %v4906_v49, %v3509_v52  ;;  %v4849_v46 = vrot.slane %v4848_v25, 1 }
 0x604   : > { %v3530_v44 = vmax.f32 %v2534_v39, 0.0  ;;  %v4781_v59 = vrot.slane %v4780_v14, 1  ;;  %v4850_v63 = vmax.f32 %v4848_v25, %v4849_v46 }
 0x605   : > { %v3032_v24 = vpop.f32.mrf.mxu1 }
 0x606   : > { %v4706_v3 = vmax.f32 %v4705_v34, %v3530_v44  ;;  %v3033_v12 = vadd.f32 %v3032_v24, %v7700_v9  ;;  %v4782_v50 = vmax.f32 %v4780_v14, %v4781_v59  ;;  %v4933_v41 = vrot.slane %v4850_v63, 2 }
 0x608   : > { %v3517_v42 = vmax.f32 %v3033_v12, 0.0  ;;  %v4932_v54 = vrot.slane %v4782_v50, 3 }
 0x609   : > { %v2535_v5 = vpop.f32.mrf.mxu2 }
 0x60a   : > { %v2536_v55 = vadd.f32 %v2535_v5, %v7678_v48  ;;  %v4908_v17 = vmax.f32 %v4907_v18, %v3517_v42 }
 0x60c   : > { %v3538_v33 = vmax.f32 %v2536_v55, 0.0 }
 0x60d   : > { %v3034_v29 = vpop.f32.mrf.mxu1 }
 0x60e   : > { %v4707_v20 = vmax.f32 %v4706_v3, %v3538_v33  ;;  %v3035_v21 = vadd.f32 %v3034_v29, %v7700_v9 }
 0x610   : > { %v3525_v24 = vmax.f32 %v3035_v21, 0.0 }
 0x611   : > { %v2538_v16 = vpop.f32.mrf.mxu2 }
 0x612   : > { %v2539_v6 = vadd.f32 %v2538_v16, %v7678_v48  ;;  %v4909_v5 = vmax.f32 %v4908_v17, %v3525_v24 }
 0x614   : > { %v3546_v45 = vmax.f32 %v2539_v6, 0.0 }
 0x615   : > { %v3037_v31 = vpop.f32.mrf.mxu1 }
 0x616   : > { %v4371_v1 = vsel %vm3744_vm2, %v3546_v45, -inf  ;;  %v3038_v48 = vadd.f32 %v3037_v31, %v7700_v9 }
 0x617   : > { %v4708_v28 = vmax.f32 %v4707_v20, %v4371_v1 }
 0x618   : > { %v3533_v10 = vmax.f32 %v3038_v48, 0.0 }
 0x619   : > { %v4709_v35 = vrot.slane %v4708_v28, 4  ;;  %v2540_v56 = vpop.f32.mrf.mxu2 }
 0x61a   : > { %v4910_v13 = vmax.f32 %v4909_v5, %v3533_v10 }
 0x61b   : > { %v4710_v7 = vmax.f32 %v4708_v28, %v4709_v35 }
 0x61d   : > { %v4711_v22 = vrot.slane %v4710_v7, 2  ;;  %v3039_v53 = vpop.f32.mrf.mxu1 }
 0x61e   : > { %v3040_v40 = vadd.f32 %v3039_v53, %v7700_v9 }
 0x61f   : > { %v4712_v38 = vmax.f32 %v4710_v7, %v4711_v22 }
 0x620   : > { %v3541_v39 = vmax.f32 %v3040_v40, 0.0 }
 0x621   : > { %v4713_v57 = vrot.slane %v4712_v38, 1 }
 0x622   : > { %v4911_v58 = vmax.f32 %v4910_v13, %v3541_v39 }
 0x623   : > { %v4714_v32 = vmax.f32 %v4712_v38, %v4713_v57 }
 0x624   : > { %v4912_v55 = vmax.f32 %v4911_v58, %v4374_v19 }
 0x625   : > { %v4931_v29 = vrot.slane %v4714_v32, 4 }
 0x626   : > { %v4913_v9 = vrot.slane %v4912_v55, 4 }
 0x627   : > { %v4942_v4 = vsel %vm4941_vm6, %v4931_v29, %v4932_v54 }
 0x628   : > { %v4914_v37 = vmax.f32 %v4912_v55, %v4913_v9 }
 0x62a   : > { %v4915_v44 = vrot.slane %v4914_v37, 2 }
 0x62c   : > { %v4916_v15 = vmax.f32 %v4914_v37, %v4915_v44 }
 0x62e   : > { %v4917_v26 = vrot.slane %v4916_v15, 1 }
 0x630   : > { %v4918_v47 = vmax.f32 %v4916_v15, %v4917_v26 }
 0x632   : > { %v4934_v34 = vrot.slane %v4918_v47, 1 }
 0x634   : > { %v4944_v33 = vsel %vm4943_vm7, %v4933_v41, %v4934_v34 }
 0x635   : > { %v4946_v16 = vsel %vm4945_vm8, %v4942_v4, %v4944_v33 }
 0x636   : > { %v4948_v8 = vsel %vm4947_vm9, %v7708_v27, %v4946_v16 }
 0x637   : > { %4951 = vst [vmem:[%s294_s15] sm:$0xff] %v4948_v8 }
 0x638   : > { %6300 = shalt.err (!%p6297_p5)
}
 0x639   : > { %6211 = dma.vmem_to_hbm [thread:$0]  (%p6433_p4), %s5547_s16, 128, %s5549_s17, %s5534_s27  }
 0x63a PF: > { %p6217_p6 = scmp.ge.s32.totalorder %s6351_s29, 2  ;;  %s5560_s23 = sand.u32 1, %s6331_s24  }
 0x63b   : > { %s5561_s12 = scalar_lea.sflag [#allocation3], %s5560_s23 }
 0x63c   : > { %p6214_p7 = pnand %p6217_p6, %p6440_p8 }
 0x63e   : > { %p6215_p9 = pneg %p6214_p7 }
 0x640   : > { %6326 = dma.done.wait (%p6215_p9), %s5561_s12, 128  }
 0x641   : > { %6328 = vsyncadd (%p6215_p9), %s5561_s12, 4294967168  ;;  %s20_s29 = sadd.s32 1, %s6351_s29   ;;  %s8068_s24 = smov %s6335_s25 }
 0x642   : > { %p17_p10 = scmp.ge.s32.totalorder %s20_s29, 4   ;;  %s8069_s25 = smov %s6339_s26 }
 0x643   : > { %s8070_s26 = smov %s6446_s14  ;;  %s8071_s27 = smov %s6347_s28 }
 0x644   : > { %s8072_s28 = smov %s8074_s9  ;;  %19 = sbr.rel (!%p17_p10) target bundleno = 4 (0x4), region = 95 }
 0x649   :  { %5567 = vsyncpa [#allocation3], 1 }
 0x64a   :  { %5569 = vsyncpa [#allocation3 + $0x1], 1 }

</bundles_post_ra>
